<compile_context>
chip_gen: v7x
topology: tpu7x:2x2x1
jax: 0.10.0
libtpu: 0.0.40
codegen_flags: <defaults>
</compile_context>

<pallas_src>
import functools

import jax
import jax.numpy as jnp
from jax.experimental import pallas as pl
from jax.experimental.pallas import tpu as pltpu


NUM_CLASSES = 10
FC_WIDTH = 128            # lane-dense width for the fused FC stack


def _round_up(v, m):
    return ((v + m - 1) // m) * m


# ---------------------------------------------------------------------------
# Kernel 1: fused Conv3x3 (stride-1) + folded-BN bias + ReLU.  One image / step.
# ---------------------------------------------------------------------------
def _conv_bn_relu_kernel(x_ref, w_ref, b_ref, o_ref, *, ksize):
    """x_ref:(Hp,Wp,Cin) f32 padded image, w_ref:(k*k,Cin,Cout) bf16 (BN scale
    pre-folded), b_ref:(1,Cout) f32, o_ref:(Ho*Wo,Cout) f32 stride-1 output."""
    Hp, Wp, Cin = x_ref.shape
    M, Cout = o_ref.shape
    Ho = Hp - (ksize - 1)
    Wo = Wp - (ksize - 1)
    acc = jnp.zeros((M, Cout), jnp.float32)
    for kh in range(ksize):                      # im2col stays in VMEM / vregs
        for kw in range(ksize):
            win = x_ref[pl.ds(kh, Ho), pl.ds(kw, Wo), :]           # (Ho,Wo,Cin)
            lhs = win.reshape(Ho * Wo, Cin).astype(jnp.bfloat16)   # aligned collapse
            acc = acc + jnp.dot(lhs, w_ref[kh * ksize + kw],
                                preferred_element_type=jnp.float32)
    o_ref[...] = jnp.maximum(acc + b_ref[...], 0.0).astype(o_ref.dtype)


def conv_bn_relu(x, w_taps, bias, stride, ksize=3):
    """x:(N,H,W,Cin) f32 NHWC -> (N,Hout,Wout,Cout) f32  (Conv2d k=3, pad=1)."""
    N, H, W, Cin = x.shape
    Cout = w_taps.shape[-1]
    # Stride-1 output rows/cols computed in-kernel, rounded up to a multiple of 8
    # so every in-kernel reshape is sublane-aligned; extra rows are sliced off.
    Ho = _round_up(H, 8)
    Wo = _round_up(W, 8)
    Hp, Wp = Ho + ksize - 1, Wo + ksize - 1
    pad = ksize // 2
    xp = jnp.pad(x, ((0, 0), (pad, Hp - H - pad), (pad, Wp - W - pad), (0, 0)))
    out = pl.pallas_call(
        functools.partial(_conv_bn_relu_kernel, ksize=ksize),
        out_shape=jax.ShapeDtypeStruct((N, Ho * Wo, Cout), jnp.float32),
        grid=(N,),
        in_specs=[
            pl.BlockSpec((None, Hp, Wp, Cin), lambda n: (n, 0, 0, 0)),
            pl.BlockSpec((ksize * ksize, Cin, Cout), lambda n: (0, 0, 0)),
            pl.BlockSpec((1, Cout), lambda n: (0, 0)),
        ],
        out_specs=pl.BlockSpec((None, Ho * Wo, Cout), lambda n: (n, 0, 0)),
        compiler_params=pltpu.CompilerParams(dimension_semantics=("parallel",)),
    )(xp, w_taps, bias)
    # Subsample stride-1 output -> stride-s output and drop alignment padding.
    return out.reshape(N, Ho, Wo, Cout)[:, :H:stride, :W:stride, :]


# ---------------------------------------------------------------------------
# Kernel 2: fused global-avgpool + fc1..fc4(+ReLU) + fc5, all weights in VMEM.
# ---------------------------------------------------------------------------
def _fc_tail_kernel(x_ref, w_ref, b_ref, o_ref):
    """x_ref:(N,HW,128) f32, w_ref:(5,128,128) bf16 (zero-padded, lane-dense),
    b_ref:(5,1,128) f32, o_ref:(N,128) f32."""
    n_layers = w_ref.shape[0]
    h = jnp.mean(x_ref[...], axis=1)                 # AdaptiveAvgPool2d((1,1)), f32
    for i in range(n_layers):
        acc = jnp.dot(h.astype(jnp.bfloat16), w_ref[i],
                      preferred_element_type=jnp.float32)
        h = acc + b_ref[i]
        if i < n_layers - 1:
            h = jnp.maximum(h, 0.0)
    o_ref[...] = h.astype(o_ref.dtype)


def fc_tail(x, w_stack, b_stack):
    N, HW, C = x.shape
    L, _, D = w_stack.shape
    return pl.pallas_call(
        _fc_tail_kernel,
        out_shape=jax.ShapeDtypeStruct((N, D), jnp.float32),
        grid=(1,),
        in_specs=[
            pl.BlockSpec((N, HW, C), lambda i: (0, 0, 0)),
            pl.BlockSpec((L, D, D), lambda i: (0, 0, 0)),
            pl.BlockSpec((L, 1, D), lambda i: (0, 0, 0)),
        ],
        out_specs=pl.BlockSpec((N, D), lambda i: (0, 0)),
        compiler_params=pltpu.CompilerParams(dimension_semantics=("arbitrary",)),
    )(x, w_stack, b_stack)


# ---------------------------------------------------------------------------
# Parameters (deterministic synthetic init, PyTorch-equivalent layouts)
# ---------------------------------------------------------------------------
def init_params(key):
    params = {}
    conv_dims = [(3, 16), (16, 32), (32, 64), (64, 96), (96, 128)]
    for i, (cin, cout) in enumerate(conv_dims):
        key, k1, k2, k3, k4, k5 = jax.random.split(key, 6)
        params[f"conv{i + 1}"] = dict(
            w=0.1 * jax.random.normal(k1, (3, 3, cin, cout), jnp.float32),  # HWIO
            gamma=1.0 + 0.1 * jax.random.normal(k2, (cout,), jnp.float32),
            beta=0.1 * jax.random.normal(k3, (cout,), jnp.float32),
            mean=0.1 * jax.random.normal(k4, (cout,), jnp.float32),
            var=jnp.abs(jax.random.normal(k5, (cout,), jnp.float32)) + 0.5,
        )
    fc_dims = [(128, 128), (128, 96), (96, 64), (64, 32), (32, NUM_CLASSES)]
    for i, (din, dout) in enumerate(fc_dims):
        key, k1, k2 = jax.random.split(key, 3)
        params[f"fc{i + 1}"] = dict(
            w=jax.random.normal(k1, (din, dout), jnp.float32) / jnp.sqrt(float(din)),
            b=0.1 * jax.random.normal(k2, (dout,), jnp.float32),
        )
    return params


def pack_params(params):
    """Fold eval-mode BN into the conv weights, cast matmul weights to bf16, and
    zero-pad/stack the FC weights to a lane-dense (5,128,128) VMEM-resident block.
    NOTE: if importing real PyTorch weights, permute Conv2d (Cout,Cin,kh,kw) ->
    (kh,kw,Cin,Cout) and transpose Linear (dout,din) -> (din,dout) first."""
    packed = {}
    for i in range(1, 6):
        p = params[f"conv{i}"]
        w = p["w"]                                        # (3,3,Cin,Cout)
        k, _, cin, cout = w.shape
        scale = p["gamma"] / jnp.sqrt(p["var"] + 1e-5)    # BN (eval) folding
        bias = p["beta"] - p["mean"] * scale
        w_folded = (w * scale).reshape(k * k, cin, cout)  # tap-major, BN pre-scaled
        packed[f"conv{i}"] = dict(
            w=w_folded.astype(jnp.bfloat16),
            b=bias.reshape(1, cout).astype(jnp.float32),
        )
    n_fc = 5
    w_stack = jnp.zeros((n_fc, FC_WIDTH, FC_WIDTH), jnp.float32)
    b_stack = jnp.zeros((n_fc, 1, FC_WIDTH), jnp.float32)
    for i in range(1, n_fc + 1):
        w = params[f"fc{i}"]["w"]
        b = params[f"fc{i}"]["b"]
        din, dout = w.shape
        w_stack = w_stack.at[i - 1, :din, :dout].set(w)   # zero cols/rows elsewhere
        b_stack = b_stack.at[i - 1, 0, :dout].set(b)
    packed["fc_w"] = w_stack.astype(jnp.bfloat16)
    packed["fc_b"] = b_stack
    return packed


# ---------------------------------------------------------------------------
# Net_10 forward
# ---------------------------------------------------------------------------
@jax.jit
def net_10_forward(packed, x_nchw):
    x = jnp.transpose(x_nchw, (0, 2, 3, 1)).astype(jnp.float32)   # NCHW -> NHWC
    strides = (1, 1, 2, 2, 2)
    for i, s in enumerate(strides):
        p = packed[f"conv{i + 1}"]
        x = conv_bn_relu(x, p["w"], p["b"], s)
    N, H, W, C = x.shape                                          # (N, 2, 2, 128)
    logits = fc_tail(x.reshape(N, H * W, C), packed["fc_w"], packed["fc_b"])
    return logits[:, :NUM_CLASSES]


if __name__ == "__main__":
    key = jax.random.PRNGKey(0)
    kp, kx = jax.random.split(key)
    params = init_params(kp)
    packed = pack_params(params)
    x = jax.random.normal(kx, (2, 3, 16, 16), jnp.float32)        # NCHW like PyTorch
    out = net_10_forward(packed, x)
    out = jax.block_until_ready(out)
    assert out.shape == (2, NUM_CLASSES), out.shape
    print("KERNEL_OK")
</pallas_src>

<mosaic_0001>
module attributes {stable_mosaic.version = 11 : i64} {
  func.func @_conv_bn_relu_kernel(%arg0: i32, %arg1: memref<1x18x18x3xf32, #tpu.memory_space<vmem>>, %arg2: memref<9x3x16xbf16, #tpu.memory_space<vmem>>, %arg3: memref<1x16xf32, #tpu.memory_space<vmem>>, %arg4: memref<1x256x16xf32, #tpu.memory_space<vmem>>) attributes {dimension_semantics = [#tpu.dimension_semantics<parallel>], iteration_bounds = array<i64: 2>, scalar_prefetch = 0 : i64, scratch_operands = 0 : i64, tpu.core_type = #tpu.core_type<tc>, window_params = [{transform_indices = @transform_0, window_bounds = array<i64: 1, 18, 18, 3>}, {pipeline_mode = #tpu.pipeline_mode<synchronous>, transform_indices = @transform_1, window_bounds = array<i64: 9, 3, 16>}, {pipeline_mode = #tpu.pipeline_mode<synchronous>, transform_indices = @transform_2, window_bounds = array<i64: 1, 16>}, {transform_indices = @transform_3, window_bounds = array<i64: 1, 256, 16>}]} {
    %cst = arith.constant 0.000000e+00 : f32
    %0 = vector.broadcast %cst : f32 to vector<256x16xf32>
    %c0 = arith.constant 0 : index
    %c0_0 = arith.constant 0 : index
    %c0_1 = arith.constant 0 : index
    %c0_2 = arith.constant 0 : index
    %1 = vector.load %arg1[%c0, %c0_0, %c0_1, %c0_2] : memref<1x18x18x3xf32, #tpu.memory_space<vmem>>, vector<1x16x16x3xf32>
    %2 = vector.shape_cast %1 : vector<1x16x16x3xf32> to vector<16x16x3xf32>
    %3 = vector.shape_cast %2 : vector<16x16x3xf32> to vector<256x3xf32>
    %4 = arith.truncf %3 : vector<256x3xf32> to vector<256x3xbf16>
    %c0_3 = arith.constant 0 : index
    %c0_4 = arith.constant 0 : index
    %c0_5 = arith.constant 0 : index
    %5 = vector.load %arg2[%c0_3, %c0_4, %c0_5] : memref<9x3x16xbf16, #tpu.memory_space<vmem>>, vector<1x3x16xbf16>
    %6 = vector.shape_cast %5 : vector<1x3x16xbf16> to vector<3x16xbf16>
    %cst_6 = arith.constant dense<0.000000e+00> : vector<256x16xf32>
    %7 = tpu.matmul %4, %6, %cst_6 {dimension_numbers = #tpu.dot_dimension_numbers<[1], [0], [0], [1], [0, 0, 1, 1], [], []>} : vector<256x3xbf16>, vector<3x16xbf16>, vector<256x16xf32> -> vector<256x16xf32>
    %8 = arith.addf %0, %7 : vector<256x16xf32>
    %c0_7 = arith.constant 0 : index
    %c0_8 = arith.constant 0 : index
    %c1 = arith.constant 1 : index
    %c0_9 = arith.constant 0 : index
    %9 = vector.load %arg1[%c0_7, %c0_8, %c1, %c0_9] : memref<1x18x18x3xf32, #tpu.memory_space<vmem>>, vector<1x16x16x3xf32>
    %10 = vector.shape_cast %9 : vector<1x16x16x3xf32> to vector<16x16x3xf32>
    %11 = vector.shape_cast %10 : vector<16x16x3xf32> to vector<256x3xf32>
    %12 = arith.truncf %11 : vector<256x3xf32> to vector<256x3xbf16>
    %c1_10 = arith.constant 1 : index
    %c0_11 = arith.constant 0 : index
    %c0_12 = arith.constant 0 : index
    %13 = vector.load %arg2[%c1_10, %c0_11, %c0_12] : memref<9x3x16xbf16, #tpu.memory_space<vmem>>, vector<1x3x16xbf16>
    %14 = vector.shape_cast %13 : vector<1x3x16xbf16> to vector<3x16xbf16>
    %cst_13 = arith.constant dense<0.000000e+00> : vector<256x16xf32>
    %15 = tpu.matmul %12, %14, %cst_13 {dimension_numbers = #tpu.dot_dimension_numbers<[1], [0], [0], [1], [0, 0, 1, 1], [], []>} : vector<256x3xbf16>, vector<3x16xbf16>, vector<256x16xf32> -> vector<256x16xf32>
    %16 = arith.addf %8, %15 : vector<256x16xf32>
    %c0_14 = arith.constant 0 : index
    %c0_15 = arith.constant 0 : index
    %c2 = arith.constant 2 : index
    %c0_16 = arith.constant 0 : index
    %17 = vector.load %arg1[%c0_14, %c0_15, %c2, %c0_16] : memref<1x18x18x3xf32, #tpu.memory_space<vmem>>, vector<1x16x16x3xf32>
    %18 = vector.shape_cast %17 : vector<1x16x16x3xf32> to vector<16x16x3xf32>
    %19 = vector.shape_cast %18 : vector<16x16x3xf32> to vector<256x3xf32>
    %20 = arith.truncf %19 : vector<256x3xf32> to vector<256x3xbf16>
    %c2_17 = arith.constant 2 : index
    %c0_18 = arith.constant 0 : index
    %c0_19 = arith.constant 0 : index
    %21 = vector.load %arg2[%c2_17, %c0_18, %c0_19] : memref<9x3x16xbf16, #tpu.memory_space<vmem>>, vector<1x3x16xbf16>
    %22 = vector.shape_cast %21 : vector<1x3x16xbf16> to vector<3x16xbf16>
    %cst_20 = arith.constant dense<0.000000e+00> : vector<256x16xf32>
    %23 = tpu.matmul %20, %22, %cst_20 {dimension_numbers = #tpu.dot_dimension_numbers<[1], [0], [0], [1], [0, 0, 1, 1], [], []>} : vector<256x3xbf16>, vector<3x16xbf16>, vector<256x16xf32> -> vector<256x16xf32>
    %24 = arith.addf %16, %23 : vector<256x16xf32>
    %c0_21 = arith.constant 0 : index
    %c1_22 = arith.constant 1 : index
    %c0_23 = arith.constant 0 : index
    %c0_24 = arith.constant 0 : index
    %25 = vector.load %arg1[%c0_21, %c1_22, %c0_23, %c0_24] : memref<1x18x18x3xf32, #tpu.memory_space<vmem>>, vector<1x16x16x3xf32>
    %26 = vector.shape_cast %25 : vector<1x16x16x3xf32> to vector<16x16x3xf32>
    %27 = vector.shape_cast %26 : vector<16x16x3xf32> to vector<256x3xf32>
    %28 = arith.truncf %27 : vector<256x3xf32> to vector<256x3xbf16>
    %c3 = arith.constant 3 : index
    %c0_25 = arith.constant 0 : index
    %c0_26 = arith.constant 0 : index
    %29 = vector.load %arg2[%c3, %c0_25, %c0_26] : memref<9x3x16xbf16, #tpu.memory_space<vmem>>, vector<1x3x16xbf16>
    %30 = vector.shape_cast %29 : vector<1x3x16xbf16> to vector<3x16xbf16>
    %cst_27 = arith.constant dense<0.000000e+00> : vector<256x16xf32>
    %31 = tpu.matmul %28, %30, %cst_27 {dimension_numbers = #tpu.dot_dimension_numbers<[1], [0], [0], [1], [0, 0, 1, 1], [], []>} : vector<256x3xbf16>, vector<3x16xbf16>, vector<256x16xf32> -> vector<256x16xf32>
    %32 = arith.addf %24, %31 : vector<256x16xf32>
    %c0_28 = arith.constant 0 : index
    %c1_29 = arith.constant 1 : index
    %c1_30 = arith.constant 1 : index
    %c0_31 = arith.constant 0 : index
    %33 = vector.load %arg1[%c0_28, %c1_29, %c1_30, %c0_31] : memref<1x18x18x3xf32, #tpu.memory_space<vmem>>, vector<1x16x16x3xf32>
    %34 = vector.shape_cast %33 : vector<1x16x16x3xf32> to vector<16x16x3xf32>
    %35 = vector.shape_cast %34 : vector<16x16x3xf32> to vector<256x3xf32>
    %36 = arith.truncf %35 : vector<256x3xf32> to vector<256x3xbf16>
    %c4 = arith.constant 4 : index
    %c0_32 = arith.constant 0 : index
    %c0_33 = arith.constant 0 : index
    %37 = vector.load %arg2[%c4, %c0_32, %c0_33] : memref<9x3x16xbf16, #tpu.memory_space<vmem>>, vector<1x3x16xbf16>
    %38 = vector.shape_cast %37 : vector<1x3x16xbf16> to vector<3x16xbf16>
    %cst_34 = arith.constant dense<0.000000e+00> : vector<256x16xf32>
    %39 = tpu.matmul %36, %38, %cst_34 {dimension_numbers = #tpu.dot_dimension_numbers<[1], [0], [0], [1], [0, 0, 1, 1], [], []>} : vector<256x3xbf16>, vector<3x16xbf16>, vector<256x16xf32> -> vector<256x16xf32>
    %40 = arith.addf %32, %39 : vector<256x16xf32>
    %c0_35 = arith.constant 0 : index
    %c1_36 = arith.constant 1 : index
    %c2_37 = arith.constant 2 : index
    %c0_38 = arith.constant 0 : index
    %41 = vector.load %arg1[%c0_35, %c1_36, %c2_37, %c0_38] : memref<1x18x18x3xf32, #tpu.memory_space<vmem>>, vector<1x16x16x3xf32>
    %42 = vector.shape_cast %41 : vector<1x16x16x3xf32> to vector<16x16x3xf32>
    %43 = vector.shape_cast %42 : vector<16x16x3xf32> to vector<256x3xf32>
    %44 = arith.truncf %43 : vector<256x3xf32> to vector<256x3xbf16>
    %c5 = arith.constant 5 : index
    %c0_39 = arith.constant 0 : index
    %c0_40 = arith.constant 0 : index
    %45 = vector.load %arg2[%c5, %c0_39, %c0_40] : memref<9x3x16xbf16, #tpu.memory_space<vmem>>, vector<1x3x16xbf16>
    %46 = vector.shape_cast %45 : vector<1x3x16xbf16> to vector<3x16xbf16>
    %cst_41 = arith.constant dense<0.000000e+00> : vector<256x16xf32>
    %47 = tpu.matmul %44, %46, %cst_41 {dimension_numbers = #tpu.dot_dimension_numbers<[1], [0], [0], [1], [0, 0, 1, 1], [], []>} : vector<256x3xbf16>, vector<3x16xbf16>, vector<256x16xf32> -> vector<256x16xf32>
    %48 = arith.addf %40, %47 : vector<256x16xf32>
    %c0_42 = arith.constant 0 : index
    %c2_43 = arith.constant 2 : index
    %c0_44 = arith.constant 0 : index
    %c0_45 = arith.constant 0 : index
    %49 = vector.load %arg1[%c0_42, %c2_43, %c0_44, %c0_45] : memref<1x18x18x3xf32, #tpu.memory_space<vmem>>, vector<1x16x16x3xf32>
    %50 = vector.shape_cast %49 : vector<1x16x16x3xf32> to vector<16x16x3xf32>
    %51 = vector.shape_cast %50 : vector<16x16x3xf32> to vector<256x3xf32>
    %52 = arith.truncf %51 : vector<256x3xf32> to vector<256x3xbf16>
    %c6 = arith.constant 6 : index
    %c0_46 = arith.constant 0 : index
    %c0_47 = arith.constant 0 : index
    %53 = vector.load %arg2[%c6, %c0_46, %c0_47] : memref<9x3x16xbf16, #tpu.memory_space<vmem>>, vector<1x3x16xbf16>
    %54 = vector.shape_cast %53 : vector<1x3x16xbf16> to vector<3x16xbf16>
    %cst_48 = arith.constant dense<0.000000e+00> : vector<256x16xf32>
    %55 = tpu.matmul %52, %54, %cst_48 {dimension_numbers = #tpu.dot_dimension_numbers<[1], [0], [0], [1], [0, 0, 1, 1], [], []>} : vector<256x3xbf16>, vector<3x16xbf16>, vector<256x16xf32> -> vector<256x16xf32>
    %56 = arith.addf %48, %55 : vector<256x16xf32>
    %c0_49 = arith.constant 0 : index
    %c2_50 = arith.constant 2 : index
    %c1_51 = arith.constant 1 : index
    %c0_52 = arith.constant 0 : index
    %57 = vector.load %arg1[%c0_49, %c2_50, %c1_51, %c0_52] : memref<1x18x18x3xf32, #tpu.memory_space<vmem>>, vector<1x16x16x3xf32>
    %58 = vector.shape_cast %57 : vector<1x16x16x3xf32> to vector<16x16x3xf32>
    %59 = vector.shape_cast %58 : vector<16x16x3xf32> to vector<256x3xf32>
    %60 = arith.truncf %59 : vector<256x3xf32> to vector<256x3xbf16>
    %c7 = arith.constant 7 : index
    %c0_53 = arith.constant 0 : index
    %c0_54 = arith.constant 0 : index
    %61 = vector.load %arg2[%c7, %c0_53, %c0_54] : memref<9x3x16xbf16, #tpu.memory_space<vmem>>, vector<1x3x16xbf16>
    %62 = vector.shape_cast %61 : vector<1x3x16xbf16> to vector<3x16xbf16>
    %cst_55 = arith.constant dense<0.000000e+00> : vector<256x16xf32>
    %63 = tpu.matmul %60, %62, %cst_55 {dimension_numbers = #tpu.dot_dimension_numbers<[1], [0], [0], [1], [0, 0, 1, 1], [], []>} : vector<256x3xbf16>, vector<3x16xbf16>, vector<256x16xf32> -> vector<256x16xf32>
    %64 = arith.addf %56, %63 : vector<256x16xf32>
    %c0_56 = arith.constant 0 : index
    %c2_57 = arith.constant 2 : index
    %c2_58 = arith.constant 2 : index
    %c0_59 = arith.constant 0 : index
    %65 = vector.load %arg1[%c0_56, %c2_57, %c2_58, %c0_59] : memref<1x18x18x3xf32, #tpu.memory_space<vmem>>, vector<1x16x16x3xf32>
    %66 = vector.shape_cast %65 : vector<1x16x16x3xf32> to vector<16x16x3xf32>
    %67 = vector.shape_cast %66 : vector<16x16x3xf32> to vector<256x3xf32>
    %68 = arith.truncf %67 : vector<256x3xf32> to vector<256x3xbf16>
    %c8 = arith.constant 8 : index
    %c0_60 = arith.constant 0 : index
    %c0_61 = arith.constant 0 : index
    %69 = vector.load %arg2[%c8, %c0_60, %c0_61] : memref<9x3x16xbf16, #tpu.memory_space<vmem>>, vector<1x3x16xbf16>
    %70 = vector.shape_cast %69 : vector<1x3x16xbf16> to vector<3x16xbf16>
    %cst_62 = arith.constant dense<0.000000e+00> : vector<256x16xf32>
    %71 = tpu.matmul %68, %70, %cst_62 {dimension_numbers = #tpu.dot_dimension_numbers<[1], [0], [0], [1], [0, 0, 1, 1], [], []>} : vector<256x3xbf16>, vector<3x16xbf16>, vector<256x16xf32> -> vector<256x16xf32>
    %72 = arith.addf %64, %71 : vector<256x16xf32>
    %c0_63 = arith.constant 0 : index
    %c0_64 = arith.constant 0 : index
    %73 = vector.load %arg3[%c0_63, %c0_64] : memref<1x16xf32, #tpu.memory_space<vmem>>, vector<1x16xf32>
    %74 = vector.broadcast %73 : vector<1x16xf32> to vector<256x16xf32>
    %75 = arith.addf %72, %74 : vector<256x16xf32>
    %cst_65 = arith.constant 0.000000e+00 : f32
    %76 = vector.broadcast %cst_65 : f32 to vector<256x16xf32>
    %77 = arith.maximumf %75, %76 : vector<256x16xf32>
    %c0_66 = arith.constant 0 : index
    %c0_67 = arith.constant 0 : index
    %c0_68 = arith.constant 0 : index
    %78 = vector.load %arg4[%c0_66, %c0_67, %c0_68] : memref<1x256x16xf32, #tpu.memory_space<vmem>>, vector<1x256x16xf32>
    %79 = vector.shape_cast %78 : vector<1x256x16xf32> to vector<256x16xf32>
    %80 = vector.shape_cast %77 : vector<256x16xf32> to vector<1x256x16xf32>
    tpu.vector_store %arg4[%c0_66, %c0_67, %c0_68], %80 {strides = array<i32>} : memref<1x256x16xf32, #tpu.memory_space<vmem>>, vector<1x256x16xf32>,
    return
  }
  func.func @transform_0(%arg0: i32) -> (i32, i32, i32, i32) {
    %c0_i32 = arith.constant 0 : i32
    %c0_i32_0 = arith.constant 0 : i32
    %c0_i32_1 = arith.constant 0 : i32
    %c0_i32_2 = arith.constant 0 : i32
    return %arg0, %c0_i32, %c0_i32_0, %c0_i32_1 : i32, i32, i32, i32
  }
  func.func @transform_1(%arg0: i32) -> (i32, i32, i32) {
    %c0_i32 = arith.constant 0 : i32
    %c0_i32_0 = arith.constant 0 : i32
    %c0_i32_1 = arith.constant 0 : i32
    %c0_i32_2 = arith.constant 0 : i32
    return %c0_i32, %c0_i32_0, %c0_i32_1 : i32, i32, i32
  }
  func.func @transform_2(%arg0: i32) -> (i32, i32) {
    %c0_i32 = arith.constant 0 : i32
    %c0_i32_0 = arith.constant 0 : i32
    %c0_i32_1 = arith.constant 0 : i32
    return %c0_i32, %c0_i32_0 : i32, i32
  }
  func.func @transform_3(%arg0: i32) -> (i32, i32, i32) {
    %c0_i32 = arith.constant 0 : i32
    %c0_i32_0 = arith.constant 0 : i32
    %c0_i32_1 = arith.constant 0 : i32
    return %arg0, %c0_i32, %c0_i32_0 : i32, i32, i32
  }
}

module attributes {stable_mosaic.version = 11 : i64} {
  func.func @_conv_bn_relu_kernel(%arg0: i32, %arg1: memref<1x18x18x16xf32, #tpu.memory_space<vmem>>, %arg2: memref<9x16x32xbf16, #tpu.memory_space<vmem>>, %arg3: memref<1x32xf32, #tpu.memory_space<vmem>>, %arg4: memref<1x256x32xf32, #tpu.memory_space<vmem>>) attributes {dimension_semantics = [#tpu.dimension_semantics<parallel>], iteration_bounds = array<i64: 2>, scalar_prefetch = 0 : i64, scratch_operands = 0 : i64, tpu.core_type = #tpu.core_type<tc>, window_params = [{transform_indices = @transform_0, window_bounds = array<i64: 1, 18, 18, 16>}, {pipeline_mode = #tpu.pipeline_mode<synchronous>, transform_indices = @transform_1, window_bounds = array<i64: 9, 16, 32>}, {pipeline_mode = #tpu.pipeline_mode<synchronous>, transform_indices = @transform_2, window_bounds = array<i64: 1, 32>}, {transform_indices = @transform_3, window_bounds = array<i64: 1, 256, 32>}]} {
    %cst = arith.constant 0.000000e+00 : f32
    %0 = vector.broadcast %cst : f32 to vector<256x32xf32>
    %c0 = arith.constant 0 : index
    %c0_0 = arith.constant 0 : index
    %c0_1 = arith.constant 0 : index
    %c0_2 = arith.constant 0 : index
    %1 = vector.load %arg1[%c0, %c0_0, %c0_1, %c0_2] : memref<1x18x18x16xf32, #tpu.memory_space<vmem>>, vector<1x16x16x16xf32>
    %2 = vector.shape_cast %1 : vector<1x16x16x16xf32> to vector<16x16x16xf32>
    %3 = vector.shape_cast %2 : vector<16x16x16xf32> to vector<256x16xf32>
    %4 = arith.truncf %3 : vector<256x16xf32> to vector<256x16xbf16>
    %c0_3 = arith.constant 0 : index
    %c0_4 = arith.constant 0 : index
    %c0_5 = arith.constant 0 : index
    %5 = vector.load %arg2[%c0_3, %c0_4, %c0_5] : memref<9x16x32xbf16, #tpu.memory_space<vmem>>, vector<1x16x32xbf16>
    %6 = vector.shape_cast %5 : vector<1x16x32xbf16> to vector<16x32xbf16>
    %cst_6 = arith.constant dense<0.000000e+00> : vector<256x32xf32>
    %7 = tpu.matmul %4, %6, %cst_6 {dimension_numbers = #tpu.dot_dimension_numbers<[1], [0], [0], [1], [0, 0, 1, 1], [], []>} : vector<256x16xbf16>, vector<16x32xbf16>, vector<256x32xf32> -> vector<256x32xf32>
    %8 = arith.addf %0, %7 : vector<256x32xf32>
    %c0_7 = arith.constant 0 : index
    %c0_8 = arith.constant 0 : index
    %c1 = arith.constant 1 : index
    %c0_9 = arith.constant 0 : index
    %9 = vector.load %arg1[%c0_7, %c0_8, %c1, %c0_9] : memref<1x18x18x16xf32, #tpu.memory_space<vmem>>, vector<1x16x16x16xf32>
    %10 = vector.shape_cast %9 : vector<1x16x16x16xf32> to vector<16x16x16xf32>
    %11 = vector.shape_cast %10 : vector<16x16x16xf32> to vector<256x16xf32>
    %12 = arith.truncf %11 : vector<256x16xf32> to vector<256x16xbf16>
    %c1_10 = arith.constant 1 : index
    %c0_11 = arith.constant 0 : index
    %c0_12 = arith.constant 0 : index
    %13 = vector.load %arg2[%c1_10, %c0_11, %c0_12] : memref<9x16x32xbf16, #tpu.memory_space<vmem>>, vector<1x16x32xbf16>
    %14 = vector.shape_cast %13 : vector<1x16x32xbf16> to vector<16x32xbf16>
    %cst_13 = arith.constant dense<0.000000e+00> : vector<256x32xf32>
    %15 = tpu.matmul %12, %14, %cst_13 {dimension_numbers = #tpu.dot_dimension_numbers<[1], [0], [0], [1], [0, 0, 1, 1], [], []>} : vector<256x16xbf16>, vector<16x32xbf16>, vector<256x32xf32> -> vector<256x32xf32>
    %16 = arith.addf %8, %15 : vector<256x32xf32>
    %c0_14 = arith.constant 0 : index
    %c0_15 = arith.constant 0 : index
    %c2 = arith.constant 2 : index
    %c0_16 = arith.constant 0 : index
    %17 = vector.load %arg1[%c0_14, %c0_15, %c2, %c0_16] : memref<1x18x18x16xf32, #tpu.memory_space<vmem>>, vector<1x16x16x16xf32>
    %18 = vector.shape_cast %17 : vector<1x16x16x16xf32> to vector<16x16x16xf32>
    %19 = vector.shape_cast %18 : vector<16x16x16xf32> to vector<256x16xf32>
    %20 = arith.truncf %19 : vector<256x16xf32> to vector<256x16xbf16>
    %c2_17 = arith.constant 2 : index
    %c0_18 = arith.constant 0 : index
    %c0_19 = arith.constant 0 : index
    %21 = vector.load %arg2[%c2_17, %c0_18, %c0_19] : memref<9x16x32xbf16, #tpu.memory_space<vmem>>, vector<1x16x32xbf16>
    %22 = vector.shape_cast %21 : vector<1x16x32xbf16> to vector<16x32xbf16>
    %cst_20 = arith.constant dense<0.000000e+00> : vector<256x32xf32>
    %23 = tpu.matmul %20, %22, %cst_20 {dimension_numbers = #tpu.dot_dimension_numbers<[1], [0], [0], [1], [0, 0, 1, 1], [], []>} : vector<256x16xbf16>, vector<16x32xbf16>, vector<256x32xf32> -> vector<256x32xf32>
    %24 = arith.addf %16, %23 : vector<256x32xf32>
    %c0_21 = arith.constant 0 : index
    %c1_22 = arith.constant 1 : index
    %c0_23 = arith.constant 0 : index
    %c0_24 = arith.constant 0 : index
    %25 = vector.load %arg1[%c0_21, %c1_22, %c0_23, %c0_24] : memref<1x18x18x16xf32, #tpu.memory_space<vmem>>, vector<1x16x16x16xf32>
    %26 = vector.shape_cast %25 : vector<1x16x16x16xf32> to vector<16x16x16xf32>
    %27 = vector.shape_cast %26 : vector<16x16x16xf32> to vector<256x16xf32>
    %28 = arith.truncf %27 : vector<256x16xf32> to vector<256x16xbf16>
    %c3 = arith.constant 3 : index
    %c0_25 = arith.constant 0 : index
    %c0_26 = arith.constant 0 : index
    %29 = vector.load %arg2[%c3, %c0_25, %c0_26] : memref<9x16x32xbf16, #tpu.memory_space<vmem>>, vector<1x16x32xbf16>
    %30 = vector.shape_cast %29 : vector<1x16x32xbf16> to vector<16x32xbf16>
    %cst_27 = arith.constant dense<0.000000e+00> : vector<256x32xf32>
    %31 = tpu.matmul %28, %30, %cst_27 {dimension_numbers = #tpu.dot_dimension_numbers<[1], [0], [0], [1], [0, 0, 1, 1], [], []>} : vector<256x16xbf16>, vector<16x32xbf16>, vector<256x32xf32> -> vector<256x32xf32>
    %32 = arith.addf %24, %31 : vector<256x32xf32>
    %c0_28 = arith.constant 0 : index
    %c1_29 = arith.constant 1 : index
    %c1_30 = arith.constant 1 : index
    %c0_31 = arith.constant 0 : index
    %33 = vector.load %arg1[%c0_28, %c1_29, %c1_30, %c0_31] : memref<1x18x18x16xf32, #tpu.memory_space<vmem>>, vector<1x16x16x16xf32>
    %34 = vector.shape_cast %33 : vector<1x16x16x16xf32> to vector<16x16x16xf32>
    %35 = vector.shape_cast %34 : vector<16x16x16xf32> to vector<256x16xf32>
    %36 = arith.truncf %35 : vector<256x16xf32> to vector<256x16xbf16>
    %c4 = arith.constant 4 : index
    %c0_32 = arith.constant 0 : index
    %c0_33 = arith.constant 0 : index
    %37 = vector.load %arg2[%c4, %c0_32, %c0_33] : memref<9x16x32xbf16, #tpu.memory_space<vmem>>, vector<1x16x32xbf16>
    %38 = vector.shape_cast %37 : vector<1x16x32xbf16> to vector<16x32xbf16>
    %cst_34 = arith.constant dense<0.000000e+00> : vector<256x32xf32>
    %39 = tpu.matmul %36, %38, %cst_34 {dimension_numbers = #tpu.dot_dimension_numbers<[1], [0], [0], [1], [0, 0, 1, 1], [], []>} : vector<256x16xbf16>, vector<16x32xbf16>, vector<256x32xf32> -> vector<256x32xf32>
    %40 = arith.addf %32, %39 : vector<256x32xf32>
    %c0_35 = arith.constant 0 : index
    %c1_36 = arith.constant 1 : index
    %c2_37 = arith.constant 2 : index
    %c0_38 = arith.constant 0 : index
    %41 = vector.load %arg1[%c0_35, %c1_36, %c2_37, %c0_38] : memref<1x18x18x16xf32, #tpu.memory_space<vmem>>, vector<1x16x16x16xf32>
    %42 = vector.shape_cast %41 : vector<1x16x16x16xf32> to vector<16x16x16xf32>
    %43 = vector.shape_cast %42 : vector<16x16x16xf32> to vector<256x16xf32>
    %44 = arith.truncf %43 : vector<256x16xf32> to vector<256x16xbf16>
    %c5 = arith.constant 5 : index
    %c0_39 = arith.constant 0 : index
    %c0_40 = arith.constant 0 : index
    %45 = vector.load %arg2[%c5, %c0_39, %c0_40] : memref<9x16x32xbf16, #tpu.memory_space<vmem>>, vector<1x16x32xbf16>
    %46 = vector.shape_cast %45 : vector<1x16x32xbf16> to vector<16x32xbf16>
    %cst_41 = arith.constant dense<0.000000e+00> : vector<256x32xf32>
    %47 = tpu.matmul %44, %46, %cst_41 {dimension_numbers = #tpu.dot_dimension_numbers<[1], [0], [0], [1], [0, 0, 1, 1], [], []>} : vector<256x16xbf16>, vector<16x32xbf16>, vector<256x32xf32> -> vector<256x32xf32>
    %48 = arith.addf %40, %47 : vector<256x32xf32>
    %c0_42 = arith.constant 0 : index
    %c2_43 = arith.constant 2 : index
    %c0_44 = arith.constant 0 : index
    %c0_45 = arith.constant 0 : index
    %49 = vector.load %arg1[%c0_42, %c2_43, %c0_44, %c0_45] : memref<1x18x18x16xf32, #tpu.memory_space<vmem>>, vector<1x16x16x16xf32>
    %50 = vector.shape_cast %49 : vector<1x16x16x16xf32> to vector<16x16x16xf32>
    %51 = vector.shape_cast %50 : vector<16x16x16xf32> to vector<256x16xf32>
    %52 = arith.truncf %51 : vector<256x16xf32> to vector<256x16xbf16>
    %c6 = arith.constant 6 : index
    %c0_46 = arith.constant 0 : index
    %c0_47 = arith.constant 0 : index
    %53 = vector.load %arg2[%c6, %c0_46, %c0_47] : memref<9x16x32xbf16, #tpu.memory_space<vmem>>, vector<1x16x32xbf16>
    %54 = vector.shape_cast %53 : vector<1x16x32xbf16> to vector<16x32xbf16>
    %cst_48 = arith.constant dense<0.000000e+00> : vector<256x32xf32>
    %55 = tpu.matmul %52, %54, %cst_48 {dimension_numbers = #tpu.dot_dimension_numbers<[1], [0], [0], [1], [0, 0, 1, 1], [], []>} : vector<256x16xbf16>, vector<16x32xbf16>, vector<256x32xf32> -> vector<256x32xf32>
    %56 = arith.addf %48, %55 : vector<256x32xf32>
    %c0_49 = arith.constant 0 : index
    %c2_50 = arith.constant 2 : index
    %c1_51 = arith.constant 1 : index
    %c0_52 = arith.constant 0 : index
    %57 = vector.load %arg1[%c0_49, %c2_50, %c1_51, %c0_52] : memref<1x18x18x16xf32, #tpu.memory_space<vmem>>, vector<1x16x16x16xf32>
    %58 = vector.shape_cast %57 : vector<1x16x16x16xf32> to vector<16x16x16xf32>
    %59 = vector.shape_cast %58 : vector<16x16x16xf32> to vector<256x16xf32>
    %60 = arith.truncf %59 : vector<256x16xf32> to vector<256x16xbf16>
    %c7 = arith.constant 7 : index
    %c0_53 = arith.constant 0 : index
    %c0_54 = arith.constant 0 : index
    %61 = vector.load %arg2[%c7, %c0_53, %c0_54] : memref<9x16x32xbf16, #tpu.memory_space<vmem>>, vector<1x16x32xbf16>
    %62 = vector.shape_cast %61 : vector<1x16x32xbf16> to vector<16x32xbf16>
    %cst_55 = arith.constant dense<0.000000e+00> : vector<256x32xf32>
    %63 = tpu.matmul %60, %62, %cst_55 {dimension_numbers = #tpu.dot_dimension_numbers<[1], [0], [0], [1], [0, 0, 1, 1], [], []>} : vector<256x16xbf16>, vector<16x32xbf16>, vector<256x32xf32> -> vector<256x32xf32>
    %64 = arith.addf %56, %63 : vector<256x32xf32>
    %c0_56 = arith.constant 0 : index
    %c2_57 = arith.constant 2 : index
    %c2_58 = arith.constant 2 : index
    %c0_59 = arith.constant 0 : index
    %65 = vector.load %arg1[%c0_56, %c2_57, %c2_58, %c0_59] : memref<1x18x18x16xf32, #tpu.memory_space<vmem>>, vector<1x16x16x16xf32>
    %66 = vector.shape_cast %65 : vector<1x16x16x16xf32> to vector<16x16x16xf32>
    %67 = vector.shape_cast %66 : vector<16x16x16xf32> to vector<256x16xf32>
    %68 = arith.truncf %67 : vector<256x16xf32> to vector<256x16xbf16>
    %c8 = arith.constant 8 : index
    %c0_60 = arith.constant 0 : index
    %c0_61 = arith.constant 0 : index
    %69 = vector.load %arg2[%c8, %c0_60, %c0_61] : memref<9x16x32xbf16, #tpu.memory_space<vmem>>, vector<1x16x32xbf16>
    %70 = vector.shape_cast %69 : vector<1x16x32xbf16> to vector<16x32xbf16>
    %cst_62 = arith.constant dense<0.000000e+00> : vector<256x32xf32>
    %71 = tpu.matmul %68, %70, %cst_62 {dimension_numbers = #tpu.dot_dimension_numbers<[1], [0], [0], [1], [0, 0, 1, 1], [], []>} : vector<256x16xbf16>, vector<16x32xbf16>, vector<256x32xf32> -> vector<256x32xf32>
    %72 = arith.addf %64, %71 : vector<256x32xf32>
    %c0_63 = arith.constant 0 : index
    %c0_64 = arith.constant 0 : index
    %73 = vector.load %arg3[%c0_63, %c0_64] : memref<1x32xf32, #tpu.memory_space<vmem>>, vector<1x32xf32>
    %74 = vector.broadcast %73 : vector<1x32xf32> to vector<256x32xf32>
    %75 = arith.addf %72, %74 : vector<256x32xf32>
    %cst_65 = arith.constant 0.000000e+00 : f32
    %76 = vector.broadcast %cst_65 : f32 to vector<256x32xf32>
    %77 = arith.maximumf %75, %76 : vector<256x32xf32>
    %c0_66 = arith.constant 0 : index
    %c0_67 = arith.constant 0 : index
    %c0_68 = arith.constant 0 : index
    %78 = vector.load %arg4[%c0_66, %c0_67, %c0_68] : memref<1x256x32xf32, #tpu.memory_space<vmem>>, vector<1x256x32xf32>
    %79 = vector.shape_cast %78 : vector<1x256x32xf32> to vector<256x32xf32>
    %80 = vector.shape_cast %77 : vector<256x32xf32> to vector<1x256x32xf32>
    tpu.vector_store %arg4[%c0_66, %c0_67, %c0_68], %80 {strides = array<i32>} : memref<1x256x32xf32, #tpu.memory_space<vmem>>, vector<1x256x32xf32>,
    return
  }
  func.func @transform_0(%arg0: i32) -> (i32, i32, i32, i32) {
    %c0_i32 = arith.constant 0 : i32
    %c0_i32_0 = arith.constant 0 : i32
    %c0_i32_1 = arith.constant 0 : i32
    %c0_i32_2 = arith.constant 0 : i32
    return %arg0, %c0_i32, %c0_i32_0, %c0_i32_1 : i32, i32, i32, i32
  }
  func.func @transform_1(%arg0: i32) -> (i32, i32, i32) {
    %c0_i32 = arith.constant 0 : i32
    %c0_i32_0 = arith.constant 0 : i32
    %c0_i32_1 = arith.constant 0 : i32
    %c0_i32_2 = arith.constant 0 : i32
    return %c0_i32, %c0_i32_0, %c0_i32_1 : i32, i32, i32
  }
  func.func @transform_2(%arg0: i32) -> (i32, i32) {
    %c0_i32 = arith.constant 0 : i32
    %c0_i32_0 = arith.constant 0 : i32
    %c0_i32_1 = arith.constant 0 : i32
    return %c0_i32, %c0_i32_0 : i32, i32
  }
  func.func @transform_3(%arg0: i32) -> (i32, i32, i32) {
    %c0_i32 = arith.constant 0 : i32
    %c0_i32_0 = arith.constant 0 : i32
    %c0_i32_1 = arith.constant 0 : i32
    return %arg0, %c0_i32, %c0_i32_0 : i32, i32, i32
  }
}

module attributes {stable_mosaic.version = 11 : i64} {
  func.func @_conv_bn_relu_kernel(%arg0: i32, %arg1: memref<1x18x18x32xf32, #tpu.memory_space<vmem>>, %arg2: memref<9x32x64xbf16, #tpu.memory_space<vmem>>, %arg3: memref<1x64xf32, #tpu.memory_space<vmem>>, %arg4: memref<1x256x64xf32, #tpu.memory_space<vmem>>) attributes {dimension_semantics = [#tpu.dimension_semantics<parallel>], iteration_bounds = array<i64: 2>, scalar_prefetch = 0 : i64, scratch_operands = 0 : i64, tpu.core_type = #tpu.core_type<tc>, window_params = [{transform_indices = @transform_0, window_bounds = array<i64: 1, 18, 18, 32>}, {pipeline_mode = #tpu.pipeline_mode<synchronous>, transform_indices = @transform_1, window_bounds = array<i64: 9, 32, 64>}, {pipeline_mode = #tpu.pipeline_mode<synchronous>, transform_indices = @transform_2, window_bounds = array<i64: 1, 64>}, {transform_indices = @transform_3, window_bounds = array<i64: 1, 256, 64>}]} {
    %cst = arith.constant 0.000000e+00 : f32
    %0 = vector.broadcast %cst : f32 to vector<256x64xf32>
    %c0 = arith.constant 0 : index
    %c0_0 = arith.constant 0 : index
    %c0_1 = arith.constant 0 : index
    %c0_2 = arith.constant 0 : index
    %1 = vector.load %arg1[%c0, %c0_0, %c0_1, %c0_2] : memref<1x18x18x32xf32, #tpu.memory_space<vmem>>, vector<1x16x16x32xf32>
    %2 = vector.shape_cast %1 : vector<1x16x16x32xf32> to vector<16x16x32xf32>
    %3 = vector.shape_cast %2 : vector<16x16x32xf32> to vector<256x32xf32>
    %4 = arith.truncf %3 : vector<256x32xf32> to vector<256x32xbf16>
    %c0_3 = arith.constant 0 : index
    %c0_4 = arith.constant 0 : index
    %c0_5 = arith.constant 0 : index
    %5 = vector.load %arg2[%c0_3, %c0_4, %c0_5] : memref<9x32x64xbf16, #tpu.memory_space<vmem>>, vector<1x32x64xbf16>
    %6 = vector.shape_cast %5 : vector<1x32x64xbf16> to vector<32x64xbf16>
    %cst_6 = arith.constant dense<0.000000e+00> : vector<256x64xf32>
    %7 = tpu.matmul %4, %6, %cst_6 {dimension_numbers = #tpu.dot_dimension_numbers<[1], [0], [0], [1], [0, 0, 1, 1], [], []>} : vector<256x32xbf16>, vector<32x64xbf16>, vector<256x64xf32> -> vector<256x64xf32>
    %8 = arith.addf %0, %7 : vector<256x64xf32>
    %c0_7 = arith.constant 0 : index
    %c0_8 = arith.constant 0 : index
    %c1 = arith.constant 1 : index
    %c0_9 = arith.constant 0 : index
    %9 = vector.load %arg1[%c0_7, %c0_8, %c1, %c0_9] : memref<1x18x18x32xf32, #tpu.memory_space<vmem>>, vector<1x16x16x32xf32>
    %10 = vector.shape_cast %9 : vector<1x16x16x32xf32> to vector<16x16x32xf32>
    %11 = vector.shape_cast %10 : vector<16x16x32xf32> to vector<256x32xf32>
    %12 = arith.truncf %11 : vector<256x32xf32> to vector<256x32xbf16>
    %c1_10 = arith.constant 1 : index
    %c0_11 = arith.constant 0 : index
    %c0_12 = arith.constant 0 : index
    %13 = vector.load %arg2[%c1_10, %c0_11, %c0_12] : memref<9x32x64xbf16, #tpu.memory_space<vmem>>, vector<1x32x64xbf16>
    %14 = vector.shape_cast %13 : vector<1x32x64xbf16> to vector<32x64xbf16>
    %cst_13 = arith.constant dense<0.000000e+00> : vector<256x64xf32>
    %15 = tpu.matmul %12, %14, %cst_13 {dimension_numbers = #tpu.dot_dimension_numbers<[1], [0], [0], [1], [0, 0, 1, 1], [], []>} : vector<256x32xbf16>, vector<32x64xbf16>, vector<256x64xf32> -> vector<256x64xf32>
    %16 = arith.addf %8, %15 : vector<256x64xf32>
    %c0_14 = arith.constant 0 : index
    %c0_15 = arith.constant 0 : index
    %c2 = arith.constant 2 : index
    %c0_16 = arith.constant 0 : index
    %17 = vector.load %arg1[%c0_14, %c0_15, %c2, %c0_16] : memref<1x18x18x32xf32, #tpu.memory_space<vmem>>, vector<1x16x16x32xf32>
    %18 = vector.shape_cast %17 : vector<1x16x16x32xf32> to vector<16x16x32xf32>
    %19 = vector.shape_cast %18 : vector<16x16x32xf32> to vector<256x32xf32>
    %20 = arith.truncf %19 : vector<256x32xf32> to vector<256x32xbf16>
    %c2_17 = arith.constant 2 : index
    %c0_18 = arith.constant 0 : index
    %c0_19 = arith.constant 0 : index
    %21 = vector.load %arg2[%c2_17, %c0_18, %c0_19] : memref<9x32x64xbf16, #tpu.memory_space<vmem>>, vector<1x32x64xbf16>
    %22 = vector.shape_cast %21 : vector<1x32x64xbf16> to vector<32x64xbf16>
    %cst_20 = arith.constant dense<0.000000e+00> : vector<256x64xf32>
    %23 = tpu.matmul %20, %22, %cst_20 {dimension_numbers = #tpu.dot_dimension_numbers<[1], [0], [0], [1], [0, 0, 1, 1], [], []>} : vector<256x32xbf16>, vector<32x64xbf16>, vector<256x64xf32> -> vector<256x64xf32>
    %24 = arith.addf %16, %23 : vector<256x64xf32>
    %c0_21 = arith.constant 0 : index
    %c1_22 = arith.constant 1 : index
    %c0_23 = arith.constant 0 : index
    %c0_24 = arith.constant 0 : index
    %25 = vector.load %arg1[%c0_21, %c1_22, %c0_23, %c0_24] : memref<1x18x18x32xf32, #tpu.memory_space<vmem>>, vector<1x16x16x32xf32>
    %26 = vector.shape_cast %25 : vector<1x16x16x32xf32> to vector<16x16x32xf32>
    %27 = vector.shape_cast %26 : vector<16x16x32xf32> to vector<256x32xf32>
    %28 = arith.truncf %27 : vector<256x32xf32> to vector<256x32xbf16>
    %c3 = arith.constant 3 : index
    %c0_25 = arith.constant 0 : index
    %c0_26 = arith.constant 0 : index
    %29 = vector.load %arg2[%c3, %c0_25, %c0_26] : memref<9x32x64xbf16, #tpu.memory_space<vmem>>, vector<1x32x64xbf16>
    %30 = vector.shape_cast %29 : vector<1x32x64xbf16> to vector<32x64xbf16>
    %cst_27 = arith.constant dense<0.000000e+00> : vector<256x64xf32>
    %31 = tpu.matmul %28, %30, %cst_27 {dimension_numbers = #tpu.dot_dimension_numbers<[1], [0], [0], [1], [0, 0, 1, 1], [], []>} : vector<256x32xbf16>, vector<32x64xbf16>, vector<256x64xf32> -> vector<256x64xf32>
    %32 = arith.addf %24, %31 : vector<256x64xf32>
    %c0_28 = arith.constant 0 : index
    %c1_29 = arith.constant 1 : index
    %c1_30 = arith.constant 1 : index
    %c0_31 = arith.constant 0 : index
    %33 = vector.load %arg1[%c0_28, %c1_29, %c1_30, %c0_31] : memref<1x18x18x32xf32, #tpu.memory_space<vmem>>, vector<1x16x16x32xf32>
    %34 = vector.shape_cast %33 : vector<1x16x16x32xf32> to vector<16x16x32xf32>
    %35 = vector.shape_cast %34 : vector<16x16x32xf32> to vector<256x32xf32>
    %36 = arith.truncf %35 : vector<256x32xf32> to vector<256x32xbf16>
    %c4 = arith.constant 4 : index
    %c0_32 = arith.constant 0 : index
    %c0_33 = arith.constant 0 : index
    %37 = vector.load %arg2[%c4, %c0_32, %c0_33] : memref<9x32x64xbf16, #tpu.memory_space<vmem>>, vector<1x32x64xbf16>
    %38 = vector.shape_cast %37 : vector<1x32x64xbf16> to vector<32x64xbf16>
    %cst_34 = arith.constant dense<0.000000e+00> : vector<256x64xf32>
    %39 = tpu.matmul %36, %38, %cst_34 {dimension_numbers = #tpu.dot_dimension_numbers<[1], [0], [0], [1], [0, 0, 1, 1], [], []>} : vector<256x32xbf16>, vector<32x64xbf16>, vector<256x64xf32> -> vector<256x64xf32>
    %40 = arith.addf %32, %39 : vector<256x64xf32>
    %c0_35 = arith.constant 0 : index
    %c1_36 = arith.constant 1 : index
    %c2_37 = arith.constant 2 : index
    %c0_38 = arith.constant 0 : index
    %41 = vector.load %arg1[%c0_35, %c1_36, %c2_37, %c0_38] : memref<1x18x18x32xf32, #tpu.memory_space<vmem>>, vector<1x16x16x32xf32>
    %42 = vector.shape_cast %41 : vector<1x16x16x32xf32> to vector<16x16x32xf32>
    %43 = vector.shape_cast %42 : vector<16x16x32xf32> to vector<256x32xf32>
    %44 = arith.truncf %43 : vector<256x32xf32> to vector<256x32xbf16>
    %c5 = arith.constant 5 : index
    %c0_39 = arith.constant 0 : index
    %c0_40 = arith.constant 0 : index
    %45 = vector.load %arg2[%c5, %c0_39, %c0_40] : memref<9x32x64xbf16, #tpu.memory_space<vmem>>, vector<1x32x64xbf16>
    %46 = vector.shape_cast %45 : vector<1x32x64xbf16> to vector<32x64xbf16>
    %cst_41 = arith.constant dense<0.000000e+00> : vector<256x64xf32>
    %47 = tpu.matmul %44, %46, %cst_41 {dimension_numbers = #tpu.dot_dimension_numbers<[1], [0], [0], [1], [0, 0, 1, 1], [], []>} : vector<256x32xbf16>, vector<32x64xbf16>, vector<256x64xf32> -> vector<256x64xf32>
    %48 = arith.addf %40, %47 : vector<256x64xf32>
    %c0_42 = arith.constant 0 : index
    %c2_43 = arith.constant 2 : index
    %c0_44 = arith.constant 0 : index
    %c0_45 = arith.constant 0 : index
    %49 = vector.load %arg1[%c0_42, %c2_43, %c0_44, %c0_45] : memref<1x18x18x32xf32, #tpu.memory_space<vmem>>, vector<1x16x16x32xf32>
    %50 = vector.shape_cast %49 : vector<1x16x16x32xf32> to vector<16x16x32xf32>
    %51 = vector.shape_cast %50 : vector<16x16x32xf32> to vector<256x32xf32>
    %52 = arith.truncf %51 : vector<256x32xf32> to vector<256x32xbf16>
    %c6 = arith.constant 6 : index
    %c0_46 = arith.constant 0 : index
    %c0_47 = arith.constant 0 : index
    %53 = vector.load %arg2[%c6, %c0_46, %c0_47] : memref<9x32x64xbf16, #tpu.memory_space<vmem>>, vector<1x32x64xbf16>
    %54 = vector.shape_cast %53 : vector<1x32x64xbf16> to vector<32x64xbf16>
    %cst_48 = arith.constant dense<0.000000e+00> : vector<256x64xf32>
    %55 = tpu.matmul %52, %54, %cst_48 {dimension_numbers = #tpu.dot_dimension_numbers<[1], [0], [0], [1], [0, 0, 1, 1], [], []>} : vector<256x32xbf16>, vector<32x64xbf16>, vector<256x64xf32> -> vector<256x64xf32>
    %56 = arith.addf %48, %55 : vector<256x64xf32>
    %c0_49 = arith.constant 0 : index
    %c2_50 = arith.constant 2 : index
    %c1_51 = arith.constant 1 : index
    %c0_52 = arith.constant 0 : index
    %57 = vector.load %arg1[%c0_49, %c2_50, %c1_51, %c0_52] : memref<1x18x18x32xf32, #tpu.memory_space<vmem>>, vector<1x16x16x32xf32>
    %58 = vector.shape_cast %57 : vector<1x16x16x32xf32> to vector<16x16x32xf32>
    %59 = vector.shape_cast %58 : vector<16x16x32xf32> to vector<256x32xf32>
    %60 = arith.truncf %59 : vector<256x32xf32> to vector<256x32xbf16>
    %c7 = arith.constant 7 : index
    %c0_53 = arith.constant 0 : index
    %c0_54 = arith.constant 0 : index
    %61 = vector.load %arg2[%c7, %c0_53, %c0_54] : memref<9x32x64xbf16, #tpu.memory_space<vmem>>, vector<1x32x64xbf16>
    %62 = vector.shape_cast %61 : vector<1x32x64xbf16> to vector<32x64xbf16>
    %cst_55 = arith.constant dense<0.000000e+00> : vector<256x64xf32>
    %63 = tpu.matmul %60, %62, %cst_55 {dimension_numbers = #tpu.dot_dimension_numbers<[1], [0], [0], [1], [0, 0, 1, 1], [], []>} : vector<256x32xbf16>, vector<32x64xbf16>, vector<256x64xf32> -> vector<256x64xf32>
    %64 = arith.addf %56, %63 : vector<256x64xf32>
    %c0_56 = arith.constant 0 : index
    %c2_57 = arith.constant 2 : index
    %c2_58 = arith.constant 2 : index
    %c0_59 = arith.constant 0 : index
    %65 = vector.load %arg1[%c0_56, %c2_57, %c2_58, %c0_59] : memref<1x18x18x32xf32, #tpu.memory_space<vmem>>, vector<1x16x16x32xf32>
    %66 = vector.shape_cast %65 : vector<1x16x16x32xf32> to vector<16x16x32xf32>
    %67 = vector.shape_cast %66 : vector<16x16x32xf32> to vector<256x32xf32>
    %68 = arith.truncf %67 : vector<256x32xf32> to vector<256x32xbf16>
    %c8 = arith.constant 8 : index
    %c0_60 = arith.constant 0 : index
    %c0_61 = arith.constant 0 : index
    %69 = vector.load %arg2[%c8, %c0_60, %c0_61] : memref<9x32x64xbf16, #tpu.memory_space<vmem>>, vector<1x32x64xbf16>
    %70 = vector.shape_cast %69 : vector<1x32x64xbf16> to vector<32x64xbf16>
    %cst_62 = arith.constant dense<0.000000e+00> : vector<256x64xf32>
    %71 = tpu.matmul %68, %70, %cst_62 {dimension_numbers = #tpu.dot_dimension_numbers<[1], [0], [0], [1], [0, 0, 1, 1], [], []>} : vector<256x32xbf16>, vector<32x64xbf16>, vector<256x64xf32> -> vector<256x64xf32>
    %72 = arith.addf %64, %71 : vector<256x64xf32>
    %c0_63 = arith.constant 0 : index
    %c0_64 = arith.constant 0 : index
    %73 = vector.load %arg3[%c0_63, %c0_64] : memref<1x64xf32, #tpu.memory_space<vmem>>, vector<1x64xf32>
    %74 = vector.broadcast %73 : vector<1x64xf32> to vector<256x64xf32>
    %75 = arith.addf %72, %74 : vector<256x64xf32>
    %cst_65 = arith.constant 0.000000e+00 : f32
    %76 = vector.broadcast %cst_65 : f32 to vector<256x64xf32>
    %77 = arith.maximumf %75, %76 : vector<256x64xf32>
    %c0_66 = arith.constant 0 : index
    %c0_67 = arith.constant 0 : index
    %c0_68 = arith.constant 0 : index
    %78 = vector.load %arg4[%c0_66, %c0_67, %c0_68] : memref<1x256x64xf32, #tpu.memory_space<vmem>>, vector<1x256x64xf32>
    %79 = vector.shape_cast %78 : vector<1x256x64xf32> to vector<256x64xf32>
    %80 = vector.shape_cast %77 : vector<256x64xf32> to vector<1x256x64xf32>
    tpu.vector_store %arg4[%c0_66, %c0_67, %c0_68], %80 {strides = array<i32>} : memref<1x256x64xf32, #tpu.memory_space<vmem>>, vector<1x256x64xf32>,
    return
  }
  func.func @transform_0(%arg0: i32) -> (i32, i32, i32, i32) {
    %c0_i32 = arith.constant 0 : i32
    %c0_i32_0 = arith.constant 0 : i32
    %c0_i32_1 = arith.constant 0 : i32
    %c0_i32_2 = arith.constant 0 : i32
    return %arg0, %c0_i32, %c0_i32_0, %c0_i32_1 : i32, i32, i32, i32
  }
  func.func @transform_1(%arg0: i32) -> (i32, i32, i32) {
    %c0_i32 = arith.constant 0 : i32
    %c0_i32_0 = arith.constant 0 : i32
    %c0_i32_1 = arith.constant 0 : i32
    %c0_i32_2 = arith.constant 0 : i32
    return %c0_i32, %c0_i32_0, %c0_i32_1 : i32, i32, i32
  }
  func.func @transform_2(%arg0: i32) -> (i32, i32) {
    %c0_i32 = arith.constant 0 : i32
    %c0_i32_0 = arith.constant 0 : i32
    %c0_i32_1 = arith.constant 0 : i32
    return %c0_i32, %c0_i32_0 : i32, i32
  }
  func.func @transform_3(%arg0: i32) -> (i32, i32, i32) {
    %c0_i32 = arith.constant 0 : i32
    %c0_i32_0 = arith.constant 0 : i32
    %c0_i32_1 = arith.constant 0 : i32
    return %arg0, %c0_i32, %c0_i32_0 : i32, i32, i32
  }
}

module attributes {stable_mosaic.version = 11 : i64} {
  func.func @_conv_bn_relu_kernel(%arg0: i32, %arg1: memref<1x10x10x64xf32, #tpu.memory_space<vmem>>, %arg2: memref<9x64x96xbf16, #tpu.memory_space<vmem>>, %arg3: memref<1x96xf32, #tpu.memory_space<vmem>>, %arg4: memref<1x64x96xf32, #tpu.memory_space<vmem>>) attributes {dimension_semantics = [#tpu.dimension_semantics<parallel>], iteration_bounds = array<i64: 2>, scalar_prefetch = 0 : i64, scratch_operands = 0 : i64, tpu.core_type = #tpu.core_type<tc>, window_params = [{transform_indices = @transform_0, window_bounds = array<i64: 1, 10, 10, 64>}, {pipeline_mode = #tpu.pipeline_mode<synchronous>, transform_indices = @transform_1, window_bounds = array<i64: 9, 64, 96>}, {pipeline_mode = #tpu.pipeline_mode<synchronous>, transform_indices = @transform_2, window_bounds = array<i64: 1, 96>}, {transform_indices = @transform_3, window_bounds = array<i64: 1, 64, 96>}]} {
    %cst = arith.constant 0.000000e+00 : f32
    %0 = vector.broadcast %cst : f32 to vector<64x96xf32>
    %c0 = arith.constant 0 : index
    %c0_0 = arith.constant 0 : index
    %c0_1 = arith.constant 0 : index
    %c0_2 = arith.constant 0 : index
    %1 = vector.load %arg1[%c0, %c0_0, %c0_1, %c0_2] : memref<1x10x10x64xf32, #tpu.memory_space<vmem>>, vector<1x8x8x64xf32>
    %2 = vector.shape_cast %1 : vector<1x8x8x64xf32> to vector<8x8x64xf32>
    %3 = vector.shape_cast %2 : vector<8x8x64xf32> to vector<64x64xf32>
    %4 = arith.truncf %3 : vector<64x64xf32> to vector<64x64xbf16>
    %c0_3 = arith.constant 0 : index
    %c0_4 = arith.constant 0 : index
    %c0_5 = arith.constant 0 : index
    %5 = vector.load %arg2[%c0_3, %c0_4, %c0_5] : memref<9x64x96xbf16, #tpu.memory_space<vmem>>, vector<1x64x96xbf16>
    %6 = vector.shape_cast %5 : vector<1x64x96xbf16> to vector<64x96xbf16>
    %cst_6 = arith.constant dense<0.000000e+00> : vector<64x96xf32>
    %7 = tpu.matmul %4, %6, %cst_6 {dimension_numbers = #tpu.dot_dimension_numbers<[1], [0], [0], [1], [0, 0, 1, 1], [], []>} : vector<64x64xbf16>, vector<64x96xbf16>, vector<64x96xf32> -> vector<64x96xf32>
    %8 = arith.addf %0, %7 : vector<64x96xf32>
    %c0_7 = arith.constant 0 : index
    %c0_8 = arith.constant 0 : index
    %c1 = arith.constant 1 : index
    %c0_9 = arith.constant 0 : index
    %9 = vector.load %arg1[%c0_7, %c0_8, %c1, %c0_9] : memref<1x10x10x64xf32, #tpu.memory_space<vmem>>, vector<1x8x8x64xf32>
    %10 = vector.shape_cast %9 : vector<1x8x8x64xf32> to vector<8x8x64xf32>
    %11 = vector.shape_cast %10 : vector<8x8x64xf32> to vector<64x64xf32>
    %12 = arith.truncf %11 : vector<64x64xf32> to vector<64x64xbf16>
    %c1_10 = arith.constant 1 : index
    %c0_11 = arith.constant 0 : index
    %c0_12 = arith.constant 0 : index
    %13 = vector.load %arg2[%c1_10, %c0_11, %c0_12] : memref<9x64x96xbf16, #tpu.memory_space<vmem>>, vector<1x64x96xbf16>
    %14 = vector.shape_cast %13 : vector<1x64x96xbf16> to vector<64x96xbf16>
    %cst_13 = arith.constant dense<0.000000e+00> : vector<64x96xf32>
    %15 = tpu.matmul %12, %14, %cst_13 {dimension_numbers = #tpu.dot_dimension_numbers<[1], [0], [0], [1], [0, 0, 1, 1], [], []>} : vector<64x64xbf16>, vector<64x96xbf16>, vector<64x96xf32> -> vector<64x96xf32>
    %16 = arith.addf %8, %15 : vector<64x96xf32>
    %c0_14 = arith.constant 0 : index
    %c0_15 = arith.constant 0 : index
    %c2 = arith.constant 2 : index
    %c0_16 = arith.constant 0 : index
    %17 = vector.load %arg1[%c0_14, %c0_15, %c2, %c0_16] : memref<1x10x10x64xf32, #tpu.memory_space<vmem>>, vector<1x8x8x64xf32>
    %18 = vector.shape_cast %17 : vector<1x8x8x64xf32> to vector<8x8x64xf32>
    %19 = vector.shape_cast %18 : vector<8x8x64xf32> to vector<64x64xf32>
    %20 = arith.truncf %19 : vector<64x64xf32> to vector<64x64xbf16>
    %c2_17 = arith.constant 2 : index
    %c0_18 = arith.constant 0 : index
    %c0_19 = arith.constant 0 : index
    %21 = vector.load %arg2[%c2_17, %c0_18, %c0_19] : memref<9x64x96xbf16, #tpu.memory_space<vmem>>, vector<1x64x96xbf16>
    %22 = vector.shape_cast %21 : vector<1x64x96xbf16> to vector<64x96xbf16>
    %cst_20 = arith.constant dense<0.000000e+00> : vector<64x96xf32>
    %23 = tpu.matmul %20, %22, %cst_20 {dimension_numbers = #tpu.dot_dimension_numbers<[1], [0], [0], [1], [0, 0, 1, 1], [], []>} : vector<64x64xbf16>, vector<64x96xbf16>, vector<64x96xf32> -> vector<64x96xf32>
    %24 = arith.addf %16, %23 : vector<64x96xf32>
    %c0_21 = arith.constant 0 : index
    %c1_22 = arith.constant 1 : index
    %c0_23 = arith.constant 0 : index
    %c0_24 = arith.constant 0 : index
    %25 = vector.load %arg1[%c0_21, %c1_22, %c0_23, %c0_24] : memref<1x10x10x64xf32, #tpu.memory_space<vmem>>, vector<1x8x8x64xf32>
    %26 = vector.shape_cast %25 : vector<1x8x8x64xf32> to vector<8x8x64xf32>
    %27 = vector.shape_cast %26 : vector<8x8x64xf32> to vector<64x64xf32>
    %28 = arith.truncf %27 : vector<64x64xf32> to vector<64x64xbf16>
    %c3 = arith.constant 3 : index
    %c0_25 = arith.constant 0 : index
    %c0_26 = arith.constant 0 : index
    %29 = vector.load %arg2[%c3, %c0_25, %c0_26] : memref<9x64x96xbf16, #tpu.memory_space<vmem>>, vector<1x64x96xbf16>
    %30 = vector.shape_cast %29 : vector<1x64x96xbf16> to vector<64x96xbf16>
    %cst_27 = arith.constant dense<0.000000e+00> : vector<64x96xf32>
    %31 = tpu.matmul %28, %30, %cst_27 {dimension_numbers = #tpu.dot_dimension_numbers<[1], [0], [0], [1], [0, 0, 1, 1], [], []>} : vector<64x64xbf16>, vector<64x96xbf16>, vector<64x96xf32> -> vector<64x96xf32>
    %32 = arith.addf %24, %31 : vector<64x96xf32>
    %c0_28 = arith.constant 0 : index
    %c1_29 = arith.constant 1 : index
    %c1_30 = arith.constant 1 : index
    %c0_31 = arith.constant 0 : index
    %33 = vector.load %arg1[%c0_28, %c1_29, %c1_30, %c0_31] : memref<1x10x10x64xf32, #tpu.memory_space<vmem>>, vector<1x8x8x64xf32>
    %34 = vector.shape_cast %33 : vector<1x8x8x64xf32> to vector<8x8x64xf32>
    %35 = vector.shape_cast %34 : vector<8x8x64xf32> to vector<64x64xf32>
    %36 = arith.truncf %35 : vector<64x64xf32> to vector<64x64xbf16>
    %c4 = arith.constant 4 : index
    %c0_32 = arith.constant 0 : index
    %c0_33 = arith.constant 0 : index
    %37 = vector.load %arg2[%c4, %c0_32, %c0_33] : memref<9x64x96xbf16, #tpu.memory_space<vmem>>, vector<1x64x96xbf16>
    %38 = vector.shape_cast %37 : vector<1x64x96xbf16> to vector<64x96xbf16>
    %cst_34 = arith.constant dense<0.000000e+00> : vector<64x96xf32>
    %39 = tpu.matmul %36, %38, %cst_34 {dimension_numbers = #tpu.dot_dimension_numbers<[1], [0], [0], [1], [0, 0, 1, 1], [], []>} : vector<64x64xbf16>, vector<64x96xbf16>, vector<64x96xf32> -> vector<64x96xf32>
    %40 = arith.addf %32, %39 : vector<64x96xf32>
    %c0_35 = arith.constant 0 : index
    %c1_36 = arith.constant 1 : index
    %c2_37 = arith.constant 2 : index
    %c0_38 = arith.constant 0 : index
    %41 = vector.load %arg1[%c0_35, %c1_36, %c2_37, %c0_38] : memref<1x10x10x64xf32, #tpu.memory_space<vmem>>, vector<1x8x8x64xf32>
    %42 = vector.shape_cast %41 : vector<1x8x8x64xf32> to vector<8x8x64xf32>
    %43 = vector.shape_cast %42 : vector<8x8x64xf32> to vector<64x64xf32>
    %44 = arith.truncf %43 : vector<64x64xf32> to vector<64x64xbf16>
    %c5 = arith.constant 5 : index
    %c0_39 = arith.constant 0 : index
    %c0_40 = arith.constant 0 : index
    %45 = vector.load %arg2[%c5, %c0_39, %c0_40] : memref<9x64x96xbf16, #tpu.memory_space<vmem>>, vector<1x64x96xbf16>
    %46 = vector.shape_cast %45 : vector<1x64x96xbf16> to vector<64x96xbf16>
    %cst_41 = arith.constant dense<0.000000e+00> : vector<64x96xf32>
    %47 = tpu.matmul %44, %46, %cst_41 {dimension_numbers = #tpu.dot_dimension_numbers<[1], [0], [0], [1], [0, 0, 1, 1], [], []>} : vector<64x64xbf16>, vector<64x96xbf16>, vector<64x96xf32> -> vector<64x96xf32>
    %48 = arith.addf %40, %47 : vector<64x96xf32>
    %c0_42 = arith.constant 0 : index
    %c2_43 = arith.constant 2 : index
    %c0_44 = arith.constant 0 : index
    %c0_45 = arith.constant 0 : index
    %49 = vector.load %arg1[%c0_42, %c2_43, %c0_44, %c0_45] : memref<1x10x10x64xf32, #tpu.memory_space<vmem>>, vector<1x8x8x64xf32>
    %50 = vector.shape_cast %49 : vector<1x8x8x64xf32> to vector<8x8x64xf32>
    %51 = vector.shape_cast %50 : vector<8x8x64xf32> to vector<64x64xf32>
    %52 = arith.truncf %51 : vector<64x64xf32> to vector<64x64xbf16>
    %c6 = arith.constant 6 : index
    %c0_46 = arith.constant 0 : index
    %c0_47 = arith.constant 0 : index
    %53 = vector.load %arg2[%c6, %c0_46, %c0_47] : memref<9x64x96xbf16, #tpu.memory_space<vmem>>, vector<1x64x96xbf16>
    %54 = vector.shape_cast %53 : vector<1x64x96xbf16> to vector<64x96xbf16>
    %cst_48 = arith.constant dense<0.000000e+00> : vector<64x96xf32>
    %55 = tpu.matmul %52, %54, %cst_48 {dimension_numbers = #tpu.dot_dimension_numbers<[1], [0], [0], [1], [0, 0, 1, 1], [], []>} : vector<64x64xbf16>, vector<64x96xbf16>, vector<64x96xf32> -> vector<64x96xf32>
    %56 = arith.addf %48, %55 : vector<64x96xf32>
    %c0_49 = arith.constant 0 : index
    %c2_50 = arith.constant 2 : index
    %c1_51 = arith.constant 1 : index
    %c0_52 = arith.constant 0 : index
    %57 = vector.load %arg1[%c0_49, %c2_50, %c1_51, %c0_52] : memref<1x10x10x64xf32, #tpu.memory_space<vmem>>, vector<1x8x8x64xf32>
    %58 = vector.shape_cast %57 : vector<1x8x8x64xf32> to vector<8x8x64xf32>
    %59 = vector.shape_cast %58 : vector<8x8x64xf32> to vector<64x64xf32>
    %60 = arith.truncf %59 : vector<64x64xf32> to vector<64x64xbf16>
    %c7 = arith.constant 7 : index
    %c0_53 = arith.constant 0 : index
    %c0_54 = arith.constant 0 : index
    %61 = vector.load %arg2[%c7, %c0_53, %c0_54] : memref<9x64x96xbf16, #tpu.memory_space<vmem>>, vector<1x64x96xbf16>
    %62 = vector.shape_cast %61 : vector<1x64x96xbf16> to vector<64x96xbf16>
    %cst_55 = arith.constant dense<0.000000e+00> : vector<64x96xf32>
    %63 = tpu.matmul %60, %62, %cst_55 {dimension_numbers = #tpu.dot_dimension_numbers<[1], [0], [0], [1], [0, 0, 1, 1], [], []>} : vector<64x64xbf16>, vector<64x96xbf16>, vector<64x96xf32> -> vector<64x96xf32>
    %64 = arith.addf %56, %63 : vector<64x96xf32>
    %c0_56 = arith.constant 0 : index
    %c2_57 = arith.constant 2 : index
    %c2_58 = arith.constant 2 : index
    %c0_59 = arith.constant 0 : index
    %65 = vector.load %arg1[%c0_56, %c2_57, %c2_58, %c0_59] : memref<1x10x10x64xf32, #tpu.memory_space<vmem>>, vector<1x8x8x64xf32>
    %66 = vector.shape_cast %65 : vector<1x8x8x64xf32> to vector<8x8x64xf32>
    %67 = vector.shape_cast %66 : vector<8x8x64xf32> to vector<64x64xf32>
    %68 = arith.truncf %67 : vector<64x64xf32> to vector<64x64xbf16>
    %c8 = arith.constant 8 : index
    %c0_60 = arith.constant 0 : index
    %c0_61 = arith.constant 0 : index
    %69 = vector.load %arg2[%c8, %c0_60, %c0_61] : memref<9x64x96xbf16, #tpu.memory_space<vmem>>, vector<1x64x96xbf16>
    %70 = vector.shape_cast %69 : vector<1x64x96xbf16> to vector<64x96xbf16>
    %cst_62 = arith.constant dense<0.000000e+00> : vector<64x96xf32>
    %71 = tpu.matmul %68, %70, %cst_62 {dimension_numbers = #tpu.dot_dimension_numbers<[1], [0], [0], [1], [0, 0, 1, 1], [], []>} : vector<64x64xbf16>, vector<64x96xbf16>, vector<64x96xf32> -> vector<64x96xf32>
    %72 = arith.addf %64, %71 : vector<64x96xf32>
    %c0_63 = arith.constant 0 : index
    %c0_64 = arith.constant 0 : index
    %73 = vector.load %arg3[%c0_63, %c0_64] : memref<1x96xf32, #tpu.memory_space<vmem>>, vector<1x96xf32>
    %74 = vector.broadcast %73 : vector<1x96xf32> to vector<64x96xf32>
    %75 = arith.addf %72, %74 : vector<64x96xf32>
    %cst_65 = arith.constant 0.000000e+00 : f32
    %76 = vector.broadcast %cst_65 : f32 to vector<64x96xf32>
    %77 = arith.maximumf %75, %76 : vector<64x96xf32>
    %c0_66 = arith.constant 0 : index
    %c0_67 = arith.constant 0 : index
    %c0_68 = arith.constant 0 : index
    %78 = vector.load %arg4[%c0_66, %c0_67, %c0_68] : memref<1x64x96xf32, #tpu.memory_space<vmem>>, vector<1x64x96xf32>
    %79 = vector.shape_cast %78 : vector<1x64x96xf32> to vector<64x96xf32>
    %80 = vector.shape_cast %77 : vector<64x96xf32> to vector<1x64x96xf32>
    tpu.vector_store %arg4[%c0_66, %c0_67, %c0_68], %80 {strides = array<i32>} : memref<1x64x96xf32, #tpu.memory_space<vmem>>, vector<1x64x96xf32>,
    return
  }
  func.func @transform_0(%arg0: i32) -> (i32, i32, i32, i32) {
    %c0_i32 = arith.constant 0 : i32
    %c0_i32_0 = arith.constant 0 : i32
    %c0_i32_1 = arith.constant 0 : i32
    %c0_i32_2 = arith.constant 0 : i32
    return %arg0, %c0_i32, %c0_i32_0, %c0_i32_1 : i32, i32, i32, i32
  }
  func.func @transform_1(%arg0: i32) -> (i32, i32, i32) {
    %c0_i32 = arith.constant 0 : i32
    %c0_i32_0 = arith.constant 0 : i32
    %c0_i32_1 = arith.constant 0 : i32
    %c0_i32_2 = arith.constant 0 : i32
    return %c0_i32, %c0_i32_0, %c0_i32_1 : i32, i32, i32
  }
  func.func @transform_2(%arg0: i32) -> (i32, i32) {
    %c0_i32 = arith.constant 0 : i32
    %c0_i32_0 = arith.constant 0 : i32
    %c0_i32_1 = arith.constant 0 : i32
    return %c0_i32, %c0_i32_0 : i32, i32
  }
  func.func @transform_3(%arg0: i32) -> (i32, i32, i32) {
    %c0_i32 = arith.constant 0 : i32
    %c0_i32_0 = arith.constant 0 : i32
    %c0_i32_1 = arith.constant 0 : i32
    return %arg0, %c0_i32, %c0_i32_0 : i32, i32, i32
  }
}

module attributes {stable_mosaic.version = 11 : i64} {
  func.func @_conv_bn_relu_kernel(%arg0: i32, %arg1: memref<1x10x10x96xf32, #tpu.memory_space<vmem>>, %arg2: memref<9x96x128xbf16, #tpu.memory_space<vmem>>, %arg3: memref<1x128xf32, #tpu.memory_space<vmem>>, %arg4: memref<1x64x128xf32, #tpu.memory_space<vmem>>) attributes {dimension_semantics = [#tpu.dimension_semantics<parallel>], iteration_bounds = array<i64: 2>, scalar_prefetch = 0 : i64, scratch_operands = 0 : i64, tpu.core_type = #tpu.core_type<tc>, window_params = [{transform_indices = @transform_0, window_bounds = array<i64: 1, 10, 10, 96>}, {pipeline_mode = #tpu.pipeline_mode<synchronous>, transform_indices = @transform_1, window_bounds = array<i64: 9, 96, 128>}, {pipeline_mode = #tpu.pipeline_mode<synchronous>, transform_indices = @transform_2, window_bounds = array<i64: 1, 128>}, {transform_indices = @transform_3, window_bounds = array<i64: 1, 64, 128>}]} {
    %cst = arith.constant 0.000000e+00 : f32
    %0 = vector.broadcast %cst : f32 to vector<64x128xf32>
    %c0 = arith.constant 0 : index
    %c0_0 = arith.constant 0 : index
    %c0_1 = arith.constant 0 : index
    %c0_2 = arith.constant 0 : index
    %1 = vector.load %arg1[%c0, %c0_0, %c0_1, %c0_2] : memref<1x10x10x96xf32, #tpu.memory_space<vmem>>, vector<1x8x8x96xf32>
    %2 = vector.shape_cast %1 : vector<1x8x8x96xf32> to vector<8x8x96xf32>
    %3 = vector.shape_cast %2 : vector<8x8x96xf32> to vector<64x96xf32>
    %4 = arith.truncf %3 : vector<64x96xf32> to vector<64x96xbf16>
    %c0_3 = arith.constant 0 : index
    %c0_4 = arith.constant 0 : index
    %c0_5 = arith.constant 0 : index
    %5 = vector.load %arg2[%c0_3, %c0_4, %c0_5] : memref<9x96x128xbf16, #tpu.memory_space<vmem>>, vector<1x96x128xbf16>
    %6 = vector.shape_cast %5 : vector<1x96x128xbf16> to vector<96x128xbf16>
    %cst_6 = arith.constant dense<0.000000e+00> : vector<64x128xf32>
    %7 = tpu.matmul %4, %6, %cst_6 {dimension_numbers = #tpu.dot_dimension_numbers<[1], [0], [0], [1], [0, 0, 1, 1], [], []>} : vector<64x96xbf16>, vector<96x128xbf16>, vector<64x128xf32> -> vector<64x128xf32>
    %8 = arith.addf %0, %7 : vector<64x128xf32>
    %c0_7 = arith.constant 0 : index
    %c0_8 = arith.constant 0 : index
    %c1 = arith.constant 1 : index
    %c0_9 = arith.constant 0 : index
    %9 = vector.load %arg1[%c0_7, %c0_8, %c1, %c0_9] : memref<1x10x10x96xf32, #tpu.memory_space<vmem>>, vector<1x8x8x96xf32>
    %10 = vector.shape_cast %9 : vector<1x8x8x96xf32> to vector<8x8x96xf32>
    %11 = vector.shape_cast %10 : vector<8x8x96xf32> to vector<64x96xf32>
    %12 = arith.truncf %11 : vector<64x96xf32> to vector<64x96xbf16>
    %c1_10 = arith.constant 1 : index
    %c0_11 = arith.constant 0 : index
    %c0_12 = arith.constant 0 : index
    %13 = vector.load %arg2[%c1_10, %c0_11, %c0_12] : memref<9x96x128xbf16, #tpu.memory_space<vmem>>, vector<1x96x128xbf16>
    %14 = vector.shape_cast %13 : vector<1x96x128xbf16> to vector<96x128xbf16>
    %cst_13 = arith.constant dense<0.000000e+00> : vector<64x128xf32>
    %15 = tpu.matmul %12, %14, %cst_13 {dimension_numbers = #tpu.dot_dimension_numbers<[1], [0], [0], [1], [0, 0, 1, 1], [], []>} : vector<64x96xbf16>, vector<96x128xbf16>, vector<64x128xf32> -> vector<64x128xf32>
    %16 = arith.addf %8, %15 : vector<64x128xf32>
    %c0_14 = arith.constant 0 : index
    %c0_15 = arith.constant 0 : index
    %c2 = arith.constant 2 : index
    %c0_16 = arith.constant 0 : index
    %17 = vector.load %arg1[%c0_14, %c0_15, %c2, %c0_16] : memref<1x10x10x96xf32, #tpu.memory_space<vmem>>, vector<1x8x8x96xf32>
    %18 = vector.shape_cast %17 : vector<1x8x8x96xf32> to vector<8x8x96xf32>
    %19 = vector.shape_cast %18 : vector<8x8x96xf32> to vector<64x96xf32>
    %20 = arith.truncf %19 : vector<64x96xf32> to vector<64x96xbf16>
    %c2_17 = arith.constant 2 : index
    %c0_18 = arith.constant 0 : index
    %c0_19 = arith.constant 0 : index
    %21 = vector.load %arg2[%c2_17, %c0_18, %c0_19] : memref<9x96x128xbf16, #tpu.memory_space<vmem>>, vector<1x96x128xbf16>
    %22 = vector.shape_cast %21 : vector<1x96x128xbf16> to vector<96x128xbf16>
    %cst_20 = arith.constant dense<0.000000e+00> : vector<64x128xf32>
    %23 = tpu.matmul %20, %22, %cst_20 {dimension_numbers = #tpu.dot_dimension_numbers<[1], [0], [0], [1], [0, 0, 1, 1], [], []>} : vector<64x96xbf16>, vector<96x128xbf16>, vector<64x128xf32> -> vector<64x128xf32>
    %24 = arith.addf %16, %23 : vector<64x128xf32>
    %c0_21 = arith.constant 0 : index
    %c1_22 = arith.constant 1 : index
    %c0_23 = arith.constant 0 : index
    %c0_24 = arith.constant 0 : index
    %25 = vector.load %arg1[%c0_21, %c1_22, %c0_23, %c0_24] : memref<1x10x10x96xf32, #tpu.memory_space<vmem>>, vector<1x8x8x96xf32>
    %26 = vector.shape_cast %25 : vector<1x8x8x96xf32> to vector<8x8x96xf32>
    %27 = vector.shape_cast %26 : vector<8x8x96xf32> to vector<64x96xf32>
    %28 = arith.truncf %27 : vector<64x96xf32> to vector<64x96xbf16>
    %c3 = arith.constant 3 : index
    %c0_25 = arith.constant 0 : index
    %c0_26 = arith.constant 0 : index
    %29 = vector.load %arg2[%c3, %c0_25, %c0_26] : memref<9x96x128xbf16, #tpu.memory_space<vmem>>, vector<1x96x128xbf16>
    %30 = vector.shape_cast %29 : vector<1x96x128xbf16> to vector<96x128xbf16>
    %cst_27 = arith.constant dense<0.000000e+00> : vector<64x128xf32>
    %31 = tpu.matmul %28, %30, %cst_27 {dimension_numbers = #tpu.dot_dimension_numbers<[1], [0], [0], [1], [0, 0, 1, 1], [], []>} : vector<64x96xbf16>, vector<96x128xbf16>, vector<64x128xf32> -> vector<64x128xf32>
    %32 = arith.addf %24, %31 : vector<64x128xf32>
    %c0_28 = arith.constant 0 : index
    %c1_29 = arith.constant 1 : index
    %c1_30 = arith.constant 1 : index
    %c0_31 = arith.constant 0 : index
    %33 = vector.load %arg1[%c0_28, %c1_29, %c1_30, %c0_31] : memref<1x10x10x96xf32, #tpu.memory_space<vmem>>, vector<1x8x8x96xf32>
    %34 = vector.shape_cast %33 : vector<1x8x8x96xf32> to vector<8x8x96xf32>
    %35 = vector.shape_cast %34 : vector<8x8x96xf32> to vector<64x96xf32>
    %36 = arith.truncf %35 : vector<64x96xf32> to vector<64x96xbf16>
    %c4 = arith.constant 4 : index
    %c0_32 = arith.constant 0 : index
    %c0_33 = arith.constant 0 : index
    %37 = vector.load %arg2[%c4, %c0_32, %c0_33] : memref<9x96x128xbf16, #tpu.memory_space<vmem>>, vector<1x96x128xbf16>
    %38 = vector.shape_cast %37 : vector<1x96x128xbf16> to vector<96x128xbf16>
    %cst_34 = arith.constant dense<0.000000e+00> : vector<64x128xf32>
    %39 = tpu.matmul %36, %38, %cst_34 {dimension_numbers = #tpu.dot_dimension_numbers<[1], [0], [0], [1], [0, 0, 1, 1], [], []>} : vector<64x96xbf16>, vector<96x128xbf16>, vector<64x128xf32> -> vector<64x128xf32>
    %40 = arith.addf %32, %39 : vector<64x128xf32>
    %c0_35 = arith.constant 0 : index
    %c1_36 = arith.constant 1 : index
    %c2_37 = arith.constant 2 : index
    %c0_38 = arith.constant 0 : index
    %41 = vector.load %arg1[%c0_35, %c1_36, %c2_37, %c0_38] : memref<1x10x10x96xf32, #tpu.memory_space<vmem>>, vector<1x8x8x96xf32>
    %42 = vector.shape_cast %41 : vector<1x8x8x96xf32> to vector<8x8x96xf32>
    %43 = vector.shape_cast %42 : vector<8x8x96xf32> to vector<64x96xf32>
    %44 = arith.truncf %43 : vector<64x96xf32> to vector<64x96xbf16>
    %c5 = arith.constant 5 : index
    %c0_39 = arith.constant 0 : index
    %c0_40 = arith.constant 0 : index
    %45 = vector.load %arg2[%c5, %c0_39, %c0_40] : memref<9x96x128xbf16, #tpu.memory_space<vmem>>, vector<1x96x128xbf16>
    %46 = vector.shape_cast %45 : vector<1x96x128xbf16> to vector<96x128xbf16>
    %cst_41 = arith.constant dense<0.000000e+00> : vector<64x128xf32>
    %47 = tpu.matmul %44, %46, %cst_41 {dimension_numbers = #tpu.dot_dimension_numbers<[1], [0], [0], [1], [0, 0, 1, 1], [], []>} : vector<64x96xbf16>, vector<96x128xbf16>, vector<64x128xf32> -> vector<64x128xf32>
    %48 = arith.addf %40, %47 : vector<64x128xf32>
    %c0_42 = arith.constant 0 : index
    %c2_43 = arith.constant 2 : index
    %c0_44 = arith.constant 0 : index
    %c0_45 = arith.constant 0 : index
    %49 = vector.load %arg1[%c0_42, %c2_43, %c0_44, %c0_45] : memref<1x10x10x96xf32, #tpu.memory_space<vmem>>, vector<1x8x8x96xf32>
    %50 = vector.shape_cast %49 : vector<1x8x8x96xf32> to vector<8x8x96xf32>
    %51 = vector.shape_cast %50 : vector<8x8x96xf32> to vector<64x96xf32>
    %52 = arith.truncf %51 : vector<64x96xf32> to vector<64x96xbf16>
    %c6 = arith.constant 6 : index
    %c0_46 = arith.constant 0 : index
    %c0_47 = arith.constant 0 : index
    %53 = vector.load %arg2[%c6, %c0_46, %c0_47] : memref<9x96x128xbf16, #tpu.memory_space<vmem>>, vector<1x96x128xbf16>
    %54 = vector.shape_cast %53 : vector<1x96x128xbf16> to vector<96x128xbf16>
    %cst_48 = arith.constant dense<0.000000e+00> : vector<64x128xf32>
    %55 = tpu.matmul %52, %54, %cst_48 {dimension_numbers = #tpu.dot_dimension_numbers<[1], [0], [0], [1], [0, 0, 1, 1], [], []>} : vector<64x96xbf16>, vector<96x128xbf16>, vector<64x128xf32> -> vector<64x128xf32>
    %56 = arith.addf %48, %55 : vector<64x128xf32>
    %c0_49 = arith.constant 0 : index
    %c2_50 = arith.constant 2 : index
    %c1_51 = arith.constant 1 : index
    %c0_52 = arith.constant 0 : index
    %57 = vector.load %arg1[%c0_49, %c2_50, %c1_51, %c0_52] : memref<1x10x10x96xf32, #tpu.memory_space<vmem>>, vector<1x8x8x96xf32>
    %58 = vector.shape_cast %57 : vector<1x8x8x96xf32> to vector<8x8x96xf32>
    %59 = vector.shape_cast %58 : vector<8x8x96xf32> to vector<64x96xf32>
    %60 = arith.truncf %59 : vector<64x96xf32> to vector<64x96xbf16>
    %c7 = arith.constant 7 : index
    %c0_53 = arith.constant 0 : index
    %c0_54 = arith.constant 0 : index
    %61 = vector.load %arg2[%c7, %c0_53, %c0_54] : memref<9x96x128xbf16, #tpu.memory_space<vmem>>, vector<1x96x128xbf16>
    %62 = vector.shape_cast %61 : vector<1x96x128xbf16> to vector<96x128xbf16>
    %cst_55 = arith.constant dense<0.000000e+00> : vector<64x128xf32>
    %63 = tpu.matmul %60, %62, %cst_55 {dimension_numbers = #tpu.dot_dimension_numbers<[1], [0], [0], [1], [0, 0, 1, 1], [], []>} : vector<64x96xbf16>, vector<96x128xbf16>, vector<64x128xf32> -> vector<64x128xf32>
    %64 = arith.addf %56, %63 : vector<64x128xf32>
    %c0_56 = arith.constant 0 : index
    %c2_57 = arith.constant 2 : index
    %c2_58 = arith.constant 2 : index
    %c0_59 = arith.constant 0 : index
    %65 = vector.load %arg1[%c0_56, %c2_57, %c2_58, %c0_59] : memref<1x10x10x96xf32, #tpu.memory_space<vmem>>, vector<1x8x8x96xf32>
    %66 = vector.shape_cast %65 : vector<1x8x8x96xf32> to vector<8x8x96xf32>
    %67 = vector.shape_cast %66 : vector<8x8x96xf32> to vector<64x96xf32>
    %68 = arith.truncf %67 : vector<64x96xf32> to vector<64x96xbf16>
    %c8 = arith.constant 8 : index
    %c0_60 = arith.constant 0 : index
    %c0_61 = arith.constant 0 : index
    %69 = vector.load %arg2[%c8, %c0_60, %c0_61] : memref<9x96x128xbf16, #tpu.memory_space<vmem>>, vector<1x96x128xbf16>
    %70 = vector.shape_cast %69 : vector<1x96x128xbf16> to vector<96x128xbf16>
    %cst_62 = arith.constant dense<0.000000e+00> : vector<64x128xf32>
    %71 = tpu.matmul %68, %70, %cst_62 {dimension_numbers = #tpu.dot_dimension_numbers<[1], [0], [0], [1], [0, 0, 1, 1], [], []>} : vector<64x96xbf16>, vector<96x128xbf16>, vector<64x128xf32> -> vector<64x128xf32>
    %72 = arith.addf %64, %71 : vector<64x128xf32>
    %c0_63 = arith.constant 0 : index
    %c0_64 = arith.constant 0 : index
    %73 = vector.load %arg3[%c0_63, %c0_64] : memref<1x128xf32, #tpu.memory_space<vmem>>, vector<1x128xf32>
    %74 = vector.broadcast %73 : vector<1x128xf32> to vector<64x128xf32>
    %75 = arith.addf %72, %74 : vector<64x128xf32>
    %cst_65 = arith.constant 0.000000e+00 : f32
    %76 = vector.broadcast %cst_65 : f32 to vector<64x128xf32>
    %77 = arith.maximumf %75, %76 : vector<64x128xf32>
    %c0_66 = arith.constant 0 : index
    %c0_67 = arith.constant 0 : index
    %c0_68 = arith.constant 0 : index
    %78 = vector.load %arg4[%c0_66, %c0_67, %c0_68] : memref<1x64x128xf32, #tpu.memory_space<vmem>>, vector<1x64x128xf32>
    %79 = vector.shape_cast %78 : vector<1x64x128xf32> to vector<64x128xf32>
    %80 = vector.shape_cast %77 : vector<64x128xf32> to vector<1x64x128xf32>
    tpu.vector_store %arg4[%c0_66, %c0_67, %c0_68], %80 {strides = array<i32>} : memref<1x64x128xf32, #tpu.memory_space<vmem>>, vector<1x64x128xf32>,
    return
  }
  func.func @transform_0(%arg0: i32) -> (i32, i32, i32, i32) {
    %c0_i32 = arith.constant 0 : i32
    %c0_i32_0 = arith.constant 0 : i32
    %c0_i32_1 = arith.constant 0 : i32
    %c0_i32_2 = arith.constant 0 : i32
    return %arg0, %c0_i32, %c0_i32_0, %c0_i32_1 : i32, i32, i32, i32
  }
  func.func @transform_1(%arg0: i32) -> (i32, i32, i32) {
    %c0_i32 = arith.constant 0 : i32
    %c0_i32_0 = arith.constant 0 : i32
    %c0_i32_1 = arith.constant 0 : i32
    %c0_i32_2 = arith.constant 0 : i32
    return %c0_i32, %c0_i32_0, %c0_i32_1 : i32, i32, i32
  }
  func.func @transform_2(%arg0: i32) -> (i32, i32) {
    %c0_i32 = arith.constant 0 : i32
    %c0_i32_0 = arith.constant 0 : i32
    %c0_i32_1 = arith.constant 0 : i32
    return %c0_i32, %c0_i32_0 : i32, i32
  }
  func.func @transform_3(%arg0: i32) -> (i32, i32, i32) {
    %c0_i32 = arith.constant 0 : i32
    %c0_i32_0 = arith.constant 0 : i32
    %c0_i32_1 = arith.constant 0 : i32
    return %arg0, %c0_i32, %c0_i32_0 : i32, i32, i32
  }
}

module attributes {stable_mosaic.version = 11 : i64} {
  func.func @_fc_tail_kernel(%arg0: i32, %arg1: memref<2x4x128xf32, #tpu.memory_space<vmem>>, %arg2: memref<5x128x128xbf16, #tpu.memory_space<vmem>>, %arg3: memref<5x1x128xf32, #tpu.memory_space<vmem>>, %arg4: memref<2x128xf32, #tpu.memory_space<vmem>>) attributes {dimension_semantics = [#tpu.dimension_semantics<arbitrary>], iteration_bounds = array<i64: 1>, scalar_prefetch = 0 : i64, scratch_operands = 0 : i64, tpu.core_type = #tpu.core_type<tc>, window_params = [{pipeline_mode = #tpu.pipeline_mode<synchronous>, transform_indices = @transform_0, window_bounds = array<i64: 2, 4, 128>}, {pipeline_mode = #tpu.pipeline_mode<synchronous>, transform_indices = @transform_1, window_bounds = array<i64: 5, 128, 128>}, {pipeline_mode = #tpu.pipeline_mode<synchronous>, transform_indices = @transform_2, window_bounds = array<i64: 5, 1, 128>}, {pipeline_mode = #tpu.pipeline_mode<synchronous>, transform_indices = @transform_3, window_bounds = array<i64: 2, 128>}]} {
    %c0 = arith.constant 0 : index
    %c0_0 = arith.constant 0 : index
    %c0_1 = arith.constant 0 : index
    %0 = vector.load %arg1[%c0, %c0_0, %c0_1] : memref<2x4x128xf32, #tpu.memory_space<vmem>>, vector<2x4x128xf32>
    %cst = arith.constant dense<0.000000e+00> : vector<2x128xf32>
    %1 = vector.multi_reduction <add>, %0, %cst [1] : vector<2x4x128xf32> to vector<2x128xf32>
    %cst_2 = arith.constant 4.000000e+00 : f32
    %2 = vector.broadcast %cst_2 : f32 to vector<2x128xf32>
    %3 = arith.divf %1, %2 : vector<2x128xf32>
    %4 = arith.truncf %3 : vector<2x128xf32> to vector<2x128xbf16>
    %c0_3 = arith.constant 0 : index
    %c0_4 = arith.constant 0 : index
    %c0_5 = arith.constant 0 : index
    %5 = vector.load %arg2[%c0_3, %c0_4, %c0_5] : memref<5x128x128xbf16, #tpu.memory_space<vmem>>, vector<1x128x128xbf16>
    %6 = vector.shape_cast %5 : vector<1x128x128xbf16> to vector<128x128xbf16>
    %cst_6 = arith.constant dense<0.000000e+00> : vector<2x128xf32>
    %7 = tpu.matmul %4, %6, %cst_6 {dimension_numbers = #tpu.dot_dimension_numbers<[1], [0], [0], [1], [0, 0, 1, 1], [], []>} : vector<2x128xbf16>, vector<128x128xbf16>, vector<2x128xf32> -> vector<2x128xf32>
    %c0_7 = arith.constant 0 : index
    %c0_8 = arith.constant 0 : index
    %c0_9 = arith.constant 0 : index
    %8 = vector.load %arg3[%c0_7, %c0_8, %c0_9] : memref<5x1x128xf32, #tpu.memory_space<vmem>>, vector<1x1x128xf32>
    %9 = vector.shape_cast %8 : vector<1x1x128xf32> to vector<1x128xf32>
    %10 = vector.broadcast %9 : vector<1x128xf32> to vector<2x128xf32>
    %11 = arith.addf %7, %10 : vector<2x128xf32>
    %cst_10 = arith.constant 0.000000e+00 : f32
    %12 = vector.broadcast %cst_10 : f32 to vector<2x128xf32>
    %13 = arith.maximumf %11, %12 : vector<2x128xf32>
    %14 = arith.truncf %13 : vector<2x128xf32> to vector<2x128xbf16>
    %c1 = arith.constant 1 : index
    %c0_11 = arith.constant 0 : index
    %c0_12 = arith.constant 0 : index
    %15 = vector.load %arg2[%c1, %c0_11, %c0_12] : memref<5x128x128xbf16, #tpu.memory_space<vmem>>, vector<1x128x128xbf16>
    %16 = vector.shape_cast %15 : vector<1x128x128xbf16> to vector<128x128xbf16>
    %cst_13 = arith.constant dense<0.000000e+00> : vector<2x128xf32>
    %17 = tpu.matmul %14, %16, %cst_13 {dimension_numbers = #tpu.dot_dimension_numbers<[1], [0], [0], [1], [0, 0, 1, 1], [], []>} : vector<2x128xbf16>, vector<128x128xbf16>, vector<2x128xf32> -> vector<2x128xf32>
    %c1_14 = arith.constant 1 : index
    %c0_15 = arith.constant 0 : index
    %c0_16 = arith.constant 0 : index
    %18 = vector.load %arg3[%c1_14, %c0_15, %c0_16] : memref<5x1x128xf32, #tpu.memory_space<vmem>>, vector<1x1x128xf32>
    %19 = vector.shape_cast %18 : vector<1x1x128xf32> to vector<1x128xf32>
    %20 = vector.broadcast %19 : vector<1x128xf32> to vector<2x128xf32>
    %21 = arith.addf %17, %20 : vector<2x128xf32>
    %cst_17 = arith.constant 0.000000e+00 : f32
    %22 = vector.broadcast %cst_17 : f32 to vector<2x128xf32>
    %23 = arith.maximumf %21, %22 : vector<2x128xf32>
    %24 = arith.truncf %23 : vector<2x128xf32> to vector<2x128xbf16>
    %c2 = arith.constant 2 : index
    %c0_18 = arith.constant 0 : index
    %c0_19 = arith.constant 0 : index
    %25 = vector.load %arg2[%c2, %c0_18, %c0_19] : memref<5x128x128xbf16, #tpu.memory_space<vmem>>, vector<1x128x128xbf16>
    %26 = vector.shape_cast %25 : vector<1x128x128xbf16> to vector<128x128xbf16>
    %cst_20 = arith.constant dense<0.000000e+00> : vector<2x128xf32>
    %27 = tpu.matmul %24, %26, %cst_20 {dimension_numbers = #tpu.dot_dimension_numbers<[1], [0], [0], [1], [0, 0, 1, 1], [], []>} : vector<2x128xbf16>, vector<128x128xbf16>, vector<2x128xf32> -> vector<2x128xf32>
    %c2_21 = arith.constant 2 : index
    %c0_22 = arith.constant 0 : index
    %c0_23 = arith.constant 0 : index
    %28 = vector.load %arg3[%c2_21, %c0_22, %c0_23] : memref<5x1x128xf32, #tpu.memory_space<vmem>>, vector<1x1x128xf32>
    %29 = vector.shape_cast %28 : vector<1x1x128xf32> to vector<1x128xf32>
    %30 = vector.broadcast %29 : vector<1x128xf32> to vector<2x128xf32>
    %31 = arith.addf %27, %30 : vector<2x128xf32>
    %cst_24 = arith.constant 0.000000e+00 : f32
    %32 = vector.broadcast %cst_24 : f32 to vector<2x128xf32>
    %33 = arith.maximumf %31, %32 : vector<2x128xf32>
    %34 = arith.truncf %33 : vector<2x128xf32> to vector<2x128xbf16>
    %c3 = arith.constant 3 : index
    %c0_25 = arith.constant 0 : index
    %c0_26 = arith.constant 0 : index
    %35 = vector.load %arg2[%c3, %c0_25, %c0_26] : memref<5x128x128xbf16, #tpu.memory_space<vmem>>, vector<1x128x128xbf16>
    %36 = vector.shape_cast %35 : vector<1x128x128xbf16> to vector<128x128xbf16>
    %cst_27 = arith.constant dense<0.000000e+00> : vector<2x128xf32>
    %37 = tpu.matmul %34, %36, %cst_27 {dimension_numbers = #tpu.dot_dimension_numbers<[1], [0], [0], [1], [0, 0, 1, 1], [], []>} : vector<2x128xbf16>, vector<128x128xbf16>, vector<2x128xf32> -> vector<2x128xf32>
    %c3_28 = arith.constant 3 : index
    %c0_29 = arith.constant 0 : index
    %c0_30 = arith.constant 0 : index
    %38 = vector.load %arg3[%c3_28, %c0_29, %c0_30] : memref<5x1x128xf32, #tpu.memory_space<vmem>>, vector<1x1x128xf32>
    %39 = vector.shape_cast %38 : vector<1x1x128xf32> to vector<1x128xf32>
    %40 = vector.broadcast %39 : vector<1x128xf32> to vector<2x128xf32>
    %41 = arith.addf %37, %40 : vector<2x128xf32>
    %cst_31 = arith.constant 0.000000e+00 : f32
    %42 = vector.broadcast %cst_31 : f32 to vector<2x128xf32>
    %43 = arith.maximumf %41, %42 : vector<2x128xf32>
    %44 = arith.truncf %43 : vector<2x128xf32> to vector<2x128xbf16>
    %c4 = arith.constant 4 : index
    %c0_32 = arith.constant 0 : index
    %c0_33 = arith.constant 0 : index
    %45 = vector.load %arg2[%c4, %c0_32, %c0_33] : memref<5x128x128xbf16, #tpu.memory_space<vmem>>, vector<1x128x128xbf16>
    %46 = vector.shape_cast %45 : vector<1x128x128xbf16> to vector<128x128xbf16>
    %cst_34 = arith.constant dense<0.000000e+00> : vector<2x128xf32>
    %47 = tpu.matmul %44, %46, %cst_34 {dimension_numbers = #tpu.dot_dimension_numbers<[1], [0], [0], [1], [0, 0, 1, 1], [], []>} : vector<2x128xbf16>, vector<128x128xbf16>, vector<2x128xf32> -> vector<2x128xf32>
    %c4_35 = arith.constant 4 : index
    %c0_36 = arith.constant 0 : index
    %c0_37 = arith.constant 0 : index
    %48 = vector.load %arg3[%c4_35, %c0_36, %c0_37] : memref<5x1x128xf32, #tpu.memory_space<vmem>>, vector<1x1x128xf32>
    %49 = vector.shape_cast %48 : vector<1x1x128xf32> to vector<1x128xf32>
    %50 = vector.broadcast %49 : vector<1x128xf32> to vector<2x128xf32>
    %51 = arith.addf %47, %50 : vector<2x128xf32>
    %c0_38 = arith.constant 0 : index
    %c0_39 = arith.constant 0 : index
    %52 = vector.load %arg4[%c0_38, %c0_39] : memref<2x128xf32, #tpu.memory_space<vmem>>, vector<2x128xf32>
    tpu.vector_store %arg4[%c0_38, %c0_39], %51 {strides = array<i32>} : memref<2x128xf32, #tpu.memory_space<vmem>>, vector<2x128xf32>,
    return
  }
  func.func @transform_0(%arg0: i32) -> (i32, i32, i32) {
    %c0_i32 = arith.constant 0 : i32
    %c0_i32_0 = arith.constant 0 : i32
    %c0_i32_1 = arith.constant 0 : i32
    %c0_i32_2 = arith.constant 0 : i32
    return %c0_i32, %c0_i32_0, %c0_i32_1 : i32, i32, i32
  }
  func.func @transform_1(%arg0: i32) -> (i32, i32, i32) {
    %c0_i32 = arith.constant 0 : i32
    %c0_i32_0 = arith.constant 0 : i32
    %c0_i32_1 = arith.constant 0 : i32
    %c0_i32_2 = arith.constant 0 : i32
    return %c0_i32, %c0_i32_0, %c0_i32_1 : i32, i32, i32
  }
  func.func @transform_2(%arg0: i32) -> (i32, i32, i32) {
    %c0_i32 = arith.constant 0 : i32
    %c0_i32_0 = arith.constant 0 : i32
    %c0_i32_1 = arith.constant 0 : i32
    %c0_i32_2 = arith.constant 0 : i32
    return %c0_i32, %c0_i32_0, %c0_i32_1 : i32, i32, i32
  }
  func.func @transform_3(%arg0: i32) -> (i32, i32) {
    %c0_i32 = arith.constant 0 : i32
    %c0_i32_0 = arith.constant 0 : i32
    %c0_i32_1 = arith.constant 0 : i32
    return %c0_i32, %c0_i32_0 : i32, i32
  }
}

</mosaic_0001>

<bundles_post_ra>
// kernel: net_10_forward.6
= control target key start
LH: loop header
LB: loop body
LE: loop exit
PB: predicated region body
PF: predicated region fallthrough
CT: control target
= control target key end

     0   :  { %s4031_s12 = smov 0   ;;  %s4707_s0 = inlined_call_operand.vmem [shape: f32[2,18,18,3], index: 0, kind: input, shape index: {}]   ;;  %s4708_s1 = inlined_call_operand.vmem [shape: bf16[9,3,16], index: 1, kind: input, shape index: {}]   ;;  %s4709_s2 = inlined_call_operand.vmem [shape: f32[1,16], index: 2, kind: input, shape index: {}]   ;;  %s4710_s3 = inlined_call_operand.vmem [shape: f32[2,256,16], index: 3, kind: output, shape index: {}]  }
   0x1 LB: > { %s2919_s13 = sadd.s32 4294967295, %s4008_s12   ;;  %p2923_p0 = scmp.ge.s32.totalorder %s4008_s12, 1  ;;  %s4008_s12 = sphi %s4031_s12, %s13_s12  }
   0x2   : > { %p137_p1 = scmp.lt.s32.totalorder %s4008_s12, 3 }
   0x4   : > { %p138_p2 = pnand %p2923_p0, %p137_p1 }
   0x5   : > { %v2927_v0 = vld [vmem:[%s4708_s1 + $0x2] sm:$0x3] (!%p138_p2)  ;;  %vm320_vm0 = vcmask (!%p138_p2), 1040384   ;;  %vm321_vm1 = vcmask (!%p138_p2), 1041408   ;;  %p161_p3 = scmp.lt.s32.totalorder (!%p138_p2), %s2919_s13, 1  ;;  %v4010_v1 = vmov (!%p138_p2), 65535  }
   0x6   : > { %141 = sbr.rel (%p138_p2) target bundleno = 524 (0x20c), region = 32  ;;  %v322_v2 = vsel (!%p138_p2), %vm320_vm0, 4294967295, %v4010_v1  ;;  %v3058_v3 = vld [vmem:[%s4708_s1 + $0x8] sm:$0x3] (!%p138_p2)  ;;  %v220_v4 = vld [vmem:[%s4708_s1] sm:$0x3] (!%p138_p2) }
   0x7   : > { %v4048_v5 = vsel (!%p138_p2), %vm321_vm1, %v322_v2, 0  ;;  %v3107_v6 = vld [vmem:[%s4708_s1 + $0xa] sm:$0x3] (!%p138_p2)  ;;  %v3156_v11 = vld [vmem:[%s4708_s1 + $0xc] sm:$0x3] (!%p138_p2)  ;;  %vm271_vm2 = vcmask (!%p138_p2), 23552  }
   0x8   : > { %v325_v7 = vand.u32 (!%p138_p2), %v2927_v0, %v4048_v5  ;;  %v4057_v8 = vand.u32 (!%p138_p2), %v3058_v3, %v4048_v5  ;;  %v537_v9 = vand.u32 (!%p138_p2), %v4048_v5, %v220_v4  ;;  %v1682_v10 = vand.u32 (!%p138_p2), %v3107_v6, %v4048_v5  ;;  %v2960_v12 = vld [vmem:[%s4708_s1 + $0x4] sm:$0x3] (!%p138_p2)  ;;  %v3205_v54 = vld [vmem:[%s4708_s1 + $0xe] sm:$0x3] (!%p138_p2) }
   0x9   : > { %v1977_v25 = vand.u32 (!%p138_p2), %v3156_v11, %v4048_v5  ;;  %v4092_v26 = vand.u32 (!%p138_p2), %v2960_v12, %v4048_v5  ;;  %v4169_v58 = vand.u32 (!%p138_p2), %v3205_v54, %v4048_v5  ;;  %vm2831_vm3 = vcmask (!%p138_p2), 130048  }
   0xa   : > { %3428 = vmatprep.subr.bf16.mxu1 (!%p138_p2), %v325_v7  ;;  %3564 = vmatprep.subr.bf16.mxu0 (!%p138_p2), %v4057_v8 }
   0xb   : > { %3429 = vmatpush3.bf16.msra.mxu1 (!%p138_p2), %v325_v7  ;;  %3565 = vmatpush3.bf16.msra.mxu0 (!%p138_p2), %v4057_v8 }
   0xc   : > { %3462 = vmatprep.subr.bf16.mxu1 (!%p138_p2), %v537_v9  ;;  %3598 = vmatprep.subr.bf16.mxu0 (!%p138_p2), %v1682_v10 }
   0xd   : > { %s4712_s13 = smov (!%p161_p3, %s2919_s13), 1 }
   0xe   : > { %s3992_s22 = smul.u32 432, %s4712_s13  ;;  %s3274_s11 = sshll.u32 %s4712_s13, 8 }
   0xf   : > { %s4603_s16 = scalar_lea.vmem %s4710_s3, %s3274_s11 }
  0x10   : > { %s4067_s25 = scalar_lea.vmem %s4707_s0, %s3992_s22 }
  0x11   : > { %v221_v13 = vld [vmem:[%s4067_s25 + $0x1] sm:$0xff]  ;;  %v222_v14 = vld [vmem:[%s4067_s25 + $0x9] sm:$0xff]  ;;  %v3026_v15 = vld [vmem:[%s4067_s25 + $0x19] sm:$0xff] }
  0x12   : > { %v253_v16 = vpack.c.bf16 %v222_v14, %v221_v13  ;;  %v3027_v17 = vld [vmem:[%s4067_s25 + $0x21] sm:$0xff]  ;;  %v3028_v18 = vld [vmem:[%s4067_s25 + $0x31] sm:$0xff]  ;;  %v3029_v19 = vld [vmem:[%s4067_s25 + $0x39] sm:$0xff] }
  0x13   : > { %v1321_v20 = vpack.c.bf16 %v3027_v17, %v3026_v15  ;;  %v4081_v21 = vpack.c.bf16 %v3029_v19, %v3028_v18  ;;  %v3030_v22 = vld [vmem:[%s4067_s25 + $0x49] sm:$0xff]  ;;  %v3031_v23 = vld [vmem:[%s4067_s25 + $0x51] sm:$0xff]  ;;  %v3032_v27 = vld [vmem:[%s4067_s25 + $0x61] sm:$0xff] }
  0x14   : > { %3430 = vmatprep.mubr.msk.bf16.mxu1 %vm271_vm2, %v253_v16  ;;  %v4086_v24 = vpack.c.bf16 %v3031_v23, %v3030_v22  ;;  %v3033_v28 = vld [vmem:[%s4067_s25 + $0x69] sm:$0xff]  ;;  %v3034_v29 = vld [vmem:[%s4067_s25 + $0x79] sm:$0xff]  ;;  %v3035_v30 = vld [vmem:[%s4067_s25 + $0x81] sm:$0xff] }
  0x15   : > { %3566 = vmatprep.mubr.msk.bf16.mxu0 %vm271_vm2, %v1321_v20  ;;  %3431 = vmatmul.mubr.msk.bf16.vlgmr.msra.gmra.mrb[0].mxu1 %vm271_vm2, %v1321_v20  ;;  %v4105_v31 = vpack.c.bf16 %v3033_v28, %v3032_v27  ;;  %v4107_v32 = vpack.c.bf16 %v3035_v30, %v3034_v29  ;;  %v3036_v33 = vld [vmem:[%s4067_s25 + $0x91] sm:$0xff]  ;;  %v3037_v34 = vld [vmem:[%s4067_s25 + $0x99] sm:$0xff]  ;;  %v3038_v35 = vld [vmem:[%s4067_s25 + $0xa9] sm:$0xff] }
  0x16   : > { %3463 = vmatpush3.bf16.msra.mxu1 %v537_v9  ;;  %3567 = vmatmul.mubr.msk.bf16.vlgmr.msra.gmra.mrb[0].mxu0 %vm271_vm2, %v4081_v21  ;;  %v3039_v36 = vld [vmem:[%s4067_s25 + $0xb1] sm:$0xff]  ;;  %v4121_v37 = vpack.c.bf16 %v3037_v34, %v3036_v33  ;;  %v3040_v39 = vld [vmem:[%s4067_s25 + $0xc1] sm:$0xff]  ;;  %v3041_v40 = vld [vmem:[%s4067_s25 + $0xc9] sm:$0xff] }
  0x17   : > { %3599 = vmatpush3.bf16.msra.mxu0 %v1682_v10  ;;  %3434 = vmatprep.mubr.msk.bf16.mxu1 %vm271_vm2, %v4081_v21  ;;  %v4123_v38 = vpack.c.bf16 %v3039_v36, %v3038_v35  ;;  %v3075_v41 = vld [vmem:[%s4067_s25 + $0x1a] sm:$0xff]  ;;  %v3076_v42 = vld [vmem:[%s4067_s25 + $0x22] sm:$0xff]  ;;  %v4137_v43 = vpack.c.bf16 %v3041_v40, %v3040_v39  ;;  %v3077_v47 = vld [vmem:[%s4067_s25 + $0x32] sm:$0xff] }
  0x18   : > { %3570 = vmatprep.mubr.msk.bf16.mxu0 %vm271_vm2, %v4086_v24  ;;  %3632 = vmatprep.subr.bf16.mxu0 %v1977_v25  ;;  %v4139_v44 = vpack.c.bf16 %v3076_v42, %v3075_v41  ;;  %v239_v45 = vld [vmem:[%s4067_s25 + $0xd9] sm:$0xff]  ;;  %v240_v46 = vld [vmem:[%s4067_s25 + $0xe1] sm:$0xff]  ;;  %v241_v49 = vld [vmem:[%s4067_s25 + $0xf1] sm:$0xff] }
  0x19   : > { %3496 = vmatprep.subr.bf16.mxu1 %v4092_v26  ;;  %v3078_v48 = vld [vmem:[%s4067_s25 + $0x3a] sm:$0xff]  ;;  %v3079_v51 = vld [vmem:[%s4067_s25 + $0x4a] sm:$0xff]  ;;  %v3080_v52 = vld [vmem:[%s4067_s25 + $0x52] sm:$0xff]  ;;  %v4157_v53 = vpack.c.bf16 %v240_v46, %v239_v45 }
  0x1a   : > { %v242_v50 = vld [vmem:[%s4067_s25 + $0xf9] sm:$0xff]  ;;  %v4162_v55 = vpack.c.bf16 %v3078_v48, %v3077_v47  ;;  %v4166_v57 = vpack.c.bf16 %v3080_v52, %v3079_v51  ;;  %v243_v59 = vld [vmem:[%s4067_s25 + $0x109] sm:$0xff]  ;;  %v244_v60 = vld [vmem:[%s4067_s25 + $0x111] sm:$0xff] }
  0x1b   : > { %v4164_v56 = vpack.c.bf16 %v242_v50, %v241_v49  ;;  %v3081_v61 = vld [vmem:[%s4067_s25 + $0x62] sm:$0xff]  ;;  %v3082_v62 = vld [vmem:[%s4067_s25 + $0x6a] sm:$0xff]  ;;  %v3083_v1 = vld [vmem:[%s4067_s25 + $0x7a] sm:$0xff]  ;;  %v4188_v3 = vpack.c.bf16 %v244_v60, %v243_v59 }
  0x1c   : > { %v245_v63 = vld [vmem:[%s4067_s25 + $0x121] sm:$0xff]  ;;  %v246_v0 = vld [vmem:[%s4067_s25 + $0x129] sm:$0xff]  ;;  %v4190_v4 = vpack.c.bf16 %v3082_v62, %v3081_v61  ;;  %v247_v9 = vld [vmem:[%s4067_s25 + $0x139] sm:$0xff] }
  0x1d   : > { %3435 = vmatmul.mubr.msk.bf16.gmra.mrb[4].mxu1 %vm271_vm2, %v4086_v24  ;;  %v3084_v2 = vld [vmem:[%s4067_s25 + $0x82] sm:$0xff]  ;;  %v4192_v6 = vpack.c.bf16 %v246_v0, %v245_v63  ;;  %v3085_v11 = vld [vmem:[%s4067_s25 + $0x92] sm:$0xff]  ;;  %v3086_v12 = vld [vmem:[%s4067_s25 + $0x9a] sm:$0xff] }
  0x1e   : > { %3571 = vmatmul.mubr.msk.bf16.gmra.mrb[4].mxu0 %vm271_vm2, %v4105_v31  ;;  %3438 = vmatprep.mubr.msk.bf16.mxu1 %vm271_vm2, %v4105_v31  ;;  %v4194_v7 = vpack.c.bf16 %v3084_v2, %v3083_v1  ;;  %v248_v10 = vld [vmem:[%s4067_s25 + $0x141] sm:$0xff]  ;;  %v249_v13 = vld [vmem:[%s4067_s25 + $0x151] sm:$0xff]  ;;  %v250_v14 = vld [vmem:[%s4067_s25 + $0x159] sm:$0xff]  ;;  %v4214_v18 = vpack.c.bf16 %v3086_v12, %v3085_v11 }
  0x1f   : > { %3574 = vmatprep.mubr.msk.bf16.mxu0 %vm271_vm2, %v4107_v32  ;;  %v3087_v15 = vld [vmem:[%s4067_s25 + $0xaa] sm:$0xff]  ;;  %v3088_v16 = vld [vmem:[%s4067_s25 + $0xb2] sm:$0xff]  ;;  %v4212_v17 = vpack.c.bf16 %v248_v10, %v247_v9  ;;  %v4216_v19 = vpack.c.bf16 %v250_v14, %v249_v13  ;;  %v172_v28 = vld [vmem:[%s4067_s25] sm:$0xff] }
  0x20   : > { %v4218_v20 = vpack.c.bf16 %v3088_v16, %v3087_v15  ;;  %v251_v22 = vld [vmem:[%s4067_s25 + $0x169] sm:$0xff]  ;;  %v252_v23 = vld [vmem:[%s4067_s25 + $0x171] sm:$0xff]  ;;  %v3091_v30 = vld [vmem:[%s4067_s25 + $0xda] sm:$0xff] }
  0x21   : > { %v3090_v27 = vld [vmem:[%s4067_s25 + $0xca] sm:$0xff]  ;;  %v3092_v33 = vld [vmem:[%s4067_s25 + $0xe2] sm:$0xff]  ;;  %v4236_v34 = vpack.c.bf16 %v252_v23, %v251_v22  ;;  %v174_v40 = vld [vmem:[%s4067_s25 + $0x18] sm:$0xff] }
  0x22   : > { %v173_v29 = vld [vmem:[%s4067_s25 + $0x8] sm:$0xff]  ;;  %v4240_v39 = vpack.c.bf16 %v3092_v33, %v3091_v30  ;;  %v175_v41 = vld [vmem:[%s4067_s25 + $0x20] sm:$0xff]  ;;  %v3093_v42 = vld [vmem:[%s4067_s25 + $0xf2] sm:$0xff] }
  0x23   : > { %v204_v36 = vpack.c.bf16 %v173_v29, %v172_v28  ;;  %v3094_v45 = vld [vmem:[%s4067_s25 + $0xfa] sm:$0xff]  ;;  %v176_v46 = vld [vmem:[%s4067_s25 + $0x30] sm:$0xff]  ;;  %v4257_v50 = vpack.c.bf16 %v175_v41, %v174_v40  ;;  %v3009_v51 = vld [vmem:[%s4708_s1 + $0x6] sm:$0x3] }
  0x24   : > { %v177_v47 = vld [vmem:[%s4067_s25 + $0x38] sm:$0xff]  ;;  %v3095_v48 = vld [vmem:[%s4067_s25 + $0x10a] sm:$0xff]  ;;  %v4262_v52 = vpack.c.bf16 %v3094_v45, %v3093_v42  ;;  %v4269_v60 = vand.u32 %v3009_v51, %v4048_v5  ;;  %v3097_v63 = vld [vmem:[%s4067_s25 + $0x122] sm:$0xff] }
  0x25   : > { %3439 = vmatmul.mubr.msk.bf16.gmra.mrb[8].mxu1 %vm271_vm2, %v4107_v32  ;;  %v3096_v49 = vld [vmem:[%s4067_s25 + $0x112] sm:$0xff]  ;;  %v4264_v54 = vpack.c.bf16 %v177_v47, %v176_v46  ;;  %v178_v61 = vld [vmem:[%s4067_s25 + $0x48] sm:$0xff]  ;;  %v180_v1 = vld [vmem:[%s4067_s25 + $0x60] sm:$0xff] }
  0x26   : > { %3575 = vmatmul.mubr.msk.bf16.gmra.mrb[8].mxu0 %vm271_vm2, %v4121_v37  ;;  %3442 = vmatprep.mubr.msk.bf16.mxu1 %vm271_vm2, %v4121_v37  ;;  %v4266_v59 = vpack.c.bf16 %v3096_v49, %v3095_v48  ;;  %v179_v62 = vld [vmem:[%s4067_s25 + $0x50] sm:$0xff]  ;;  %v181_v2 = vld [vmem:[%s4067_s25 + $0x68] sm:$0xff]  ;;  %v182_v14 = vld [vmem:[%s4067_s25 + $0x78] sm:$0xff] }
  0x27   : > { %3578 = vmatprep.mubr.msk.bf16.mxu0 %vm271_vm2, %v4123_v38  ;;  %v3098_v0 = vld [vmem:[%s4067_s25 + $0x12a] sm:$0xff]  ;;  %v3100_v9 = vld [vmem:[%s4067_s25 + $0x142] sm:$0xff]  ;;  %v4289_v10 = vpack.c.bf16 %v179_v62, %v178_v61  ;;  %v4293_v12 = vpack.c.bf16 %v181_v2, %v180_v1  ;;  %v3101_v16 = vld [vmem:[%s4067_s25 + $0x152] sm:$0xff] }
  0x28   : > { %v4291_v11 = vpack.c.bf16 %v3098_v0, %v3097_v63  ;;  %v183_v15 = vld [vmem:[%s4067_s25 + $0x80] sm:$0xff]  ;;  %v184_v23 = vld [vmem:[%s4067_s25 + $0x90] sm:$0xff]  ;;  %v186_v40 = vld [vmem:[%s4067_s25 + $0xa8] sm:$0xff] }
  0x29   : > { %v3102_v22 = vld [vmem:[%s4067_s25 + $0x15a] sm:$0xff]  ;;  %v3104_v28 = vld [vmem:[%s4067_s25 + $0x172] sm:$0xff]  ;;  %v4313_v29 = vpack.c.bf16 %v183_v15, %v182_v14  ;;  %v3105_v42 = vld [vmem:[%s4067_s25 + $0x182] sm:$0xff] }
  0x2a   : > { %v4315_v30 = vpack.c.bf16 %v3102_v22, %v3101_v16  ;;  %v187_v41 = vld [vmem:[%s4067_s25 + $0xb0] sm:$0xff]  ;;  %v188_v46 = vld [vmem:[%s4067_s25 + $0xc0] sm:$0xff]  ;;  %v189_v47 = vld [vmem:[%s4067_s25 + $0xc8] sm:$0xff] }
  0x2b   : > { %v3106_v45 = vld [vmem:[%s4067_s25 + $0x18a] sm:$0xff]  ;;  %v4335_v48 = vpack.c.bf16 %v187_v41, %v186_v40  ;;  %v4339_v51 = vpack.c.bf16 %v189_v47, %v188_v46  ;;  %v190_v61 = vld [vmem:[%s4067_s25 + $0xd8] sm:$0xff]  ;;  %v191_v62 = vld [vmem:[%s4067_s25 + $0xe0] sm:$0xff] }
  0x2c   : > { %v4337_v49 = vpack.c.bf16 %v3106_v45, %v3105_v42  ;;  %v192_v63 = vld [vmem:[%s4067_s25 + $0xf0] sm:$0xff]  ;;  %v193_v0 = vld [vmem:[%s4067_s25 + $0xf8] sm:$0xff]  ;;  %v4353_v1 = vpack.c.bf16 %v191_v62, %v190_v61  ;;  %v194_v14 = vld [vmem:[%s4067_s25 + $0x108] sm:$0xff] }
  0x2d   : > { %3443 = vmatmul.mubr.msk.bf16.gmra.mrb[12].mxu1 %vm271_vm2, %v4123_v38  ;;  %v3254_v2 = vld [vmem:[%s4708_s1 + $0x10] sm:$0x3]  ;;  %v197_v16 = vld [vmem:[%s4067_s25 + $0x128] sm:$0xff] }
  0x2e   : > { %3579 = vmatmul.mubr.msk.bf16.gmra.mrb[12].mxu0 %vm271_vm2, %v4137_v43  ;;  %3446 = vmatprep.mubr.msk.bf16.mxu1 %vm271_vm2, %v4137_v43  ;;  %v195_v15 = vld [vmem:[%s4067_s25 + $0x110] sm:$0xff]  ;;  %v202_v42 = vld [vmem:[%s4067_s25 + $0x168] sm:$0xff] }
  0x2f   : > { %3600 = vmatprep.mubr.msk.bf16.mxu0 %vm271_vm2, %v4139_v44  ;;  %v4377_v22 = vpack.c.bf16 %v195_v15, %v194_v14  ;;  %v203_v45 = vld [vmem:[%s4067_s25 + $0x170] sm:$0xff]  ;;  %v700_v46 = vld [vmem:[%s4067_s25 + $0x2] sm:$0xff] }
  0x30   : > { %v701_v47 = vld [vmem:[%s4067_s25 + $0xa] sm:$0xff]  ;;  %v4409_v61 = vpack.c.bf16 %v203_v45, %v202_v42 }
  0x31   : > { %v732_v62 = vpack.c.bf16 %v701_v47, %v700_v46 }
  0x35   : > { %3447 = vmatmul.mubr.msk.bf16.gmra.mrb[16].mxu1 %vm271_vm2, %v4157_v53 }
  0x36   : > { %3601 = vmatmul.mubr.msk.bf16.vlgmr.msra.gmra.mrb[0].mxu0 %vm271_vm2, %v4162_v55  ;;  %3450 = vmatprep.mubr.msk.bf16.mxu1 %vm271_vm2, %v4164_v56 }
  0x37   : > { %3633 = vmatpush3.bf16.msra.mxu0 %v1977_v25  ;;  %3604 = vmatprep.mubr.msk.bf16.mxu0 %vm271_vm2, %v4166_v57  ;;  %v3089_v25 = vld [vmem:[%s4067_s25 + $0xc2] sm:$0xff] }
  0x38   : > { %3666 = vmatprep.subr.bf16.mxu0 %v4169_v58  ;;  %v4238_v35 = vpack.c.bf16 %v3090_v27, %v3089_v25  ;;  %v185_v25 = vld [vmem:[%s4067_s25 + $0x98] sm:$0xff]  ;;  %v3103_v27 = vld [vmem:[%s4067_s25 + $0x16a] sm:$0xff] }
  0x39   : > { %v4317_v33 = vpack.c.bf16 %v185_v25, %v184_v23  ;;  %v199_v25 = vld [vmem:[%s4067_s25 + $0x140] sm:$0xff] }
  0x3d   : > { %3451 = vmatmul.mubr.msk.bf16.gmra.mrb[20].mxu1 %vm271_vm2, %v4188_v3 }
  0x3e   : > { %3605 = vmatmul.mubr.msk.bf16.gmra.mrb[4].mxu0 %vm271_vm2, %v4190_v4  ;;  %3454 = vmatprep.mubr.msk.bf16.mxu1 %vm271_vm2, %v4192_v6 }
  0x3f   : > { %3608 = vmatprep.mubr.msk.bf16.mxu0 %vm271_vm2, %v4194_v7 }
  0x45   : > { %3455 = vmatmul.mubr.msk.bf16.gmra.mrb[24].mxu1 %vm271_vm2, %v4212_v17 }
  0x46   : > { %3609 = vmatmul.mubr.msk.bf16.gmra.mrb[8].mxu0 %vm271_vm2, %v4214_v18  ;;  %3458 = vmatprep.mubr.msk.bf16.mxu1 %vm271_vm2, %v4216_v19 }
  0x47   : > { %3612 = vmatprep.mubr.msk.bf16.mxu0 %vm271_vm2, %v4218_v20 }
  0x4d   : > { %3459 = vmatmul.mubr.msk.bf16.gmra.mrb[28].mxu1 %vm271_vm2, %v4236_v34 }
  0x4e   : > { %3613 = vmatmul.mubr.msk.bf16.gmra.mrb[12].mxu0 %vm271_vm2, %v4238_v35  ;;  %3464 = vmatprep.mubr.msk.bf16.mxu1 %vm271_vm2, %v204_v36  ;;  %v4319_v36 = vpack.c.bf16 %v3104_v28, %v3103_v27  ;;  %v200_v27 = vld [vmem:[%s4067_s25 + $0x150] sm:$0xff]  ;;  %v201_v28 = vld [vmem:[%s4067_s25 + $0x158] sm:$0xff] }
  0x4f   : > { %3616 = vmatprep.mubr.msk.bf16.mxu0 %vm271_vm2, %v4240_v39  ;;  %v4395_v41 = vpack.c.bf16 %v201_v28, %v200_v27 }
  0x55   : > { %3465 = vmatmul.mubr.msk.bf16.vlgmr.msra.gmra.mrb[0].mxu1 %vm271_vm2, %v4257_v50 }
  0x56   : > { %3497 = vmatpush3.bf16.msra.mxu1 %v4092_v26  ;;  %3617 = vmatmul.mubr.msk.bf16.gmra.mrb[16].mxu0 %vm271_vm2, %v4262_v52  ;;  %v3099_v26 = vld [vmem:[%s4067_s25 + $0x13a] sm:$0xff] }
  0x57   : > { %3468 = vmatprep.mubr.msk.bf16.mxu1 %vm271_vm2, %v4264_v54  ;;  %3620 = vmatprep.mubr.msk.bf16.mxu0 %vm271_vm2, %v4266_v59  ;;  %v4295_v13 = vpack.c.bf16 %v3100_v9, %v3099_v26  ;;  %v4358_v26 = vpack.c.bf16 %v193_v0, %v192_v63  ;;  %v4361_v9 = vand.u32 %v3254_v2, %v4048_v5  ;;  %v196_v5 = vld [vmem:[%s4067_s25 + $0x120] sm:$0xff]  ;;  %v3154_v0 = vld [vmem:[%s4067_s25 + $0x198] sm:$0xff] }
  0x58   : > { %3530 = vmatprep.subr.bf16.mxu1 %v4269_v60  ;;  %v4379_v23 = vpack.c.bf16 %v197_v16, %v196_v5  ;;  %v3155_v2 = vld [vmem:[%s4067_s25 + $0x1a0] sm:$0xff] }
  0x59   : > { %v1925_v14 = vpack.c.bf16 %v3155_v2, %v3154_v0 }
  0x5d   : > { %3469 = vmatmul.mubr.msk.bf16.gmra.mrb[4].mxu1 %vm271_vm2, %v4289_v10 }
  0x5e   : > { %3621 = vmatmul.mubr.msk.bf16.gmra.mrb[20].mxu0 %vm271_vm2, %v4291_v11  ;;  %3472 = vmatprep.mubr.msk.bf16.mxu1 %vm271_vm2, %v4293_v12 }
  0x5f   : > { %3624 = vmatprep.mubr.msk.bf16.mxu0 %vm271_vm2, %v4295_v13 }
  0x65   : > { %3473 = vmatmul.mubr.msk.bf16.gmra.mrb[8].mxu1 %vm271_vm2, %v4313_v29 }
  0x66   : > { %3625 = vmatmul.mubr.msk.bf16.gmra.mrb[24].mxu0 %vm271_vm2, %v4315_v30  ;;  %3476 = vmatprep.mubr.msk.bf16.mxu1 %vm271_vm2, %v4317_v33 }
  0x67   : > { %3628 = vmatprep.mubr.msk.bf16.mxu0 %vm271_vm2, %v4319_v36 }
  0x6d   : > { %3477 = vmatmul.mubr.msk.bf16.gmra.mrb[12].mxu1 %vm271_vm2, %v4335_v48 }
  0x6e   : > { %3629 = vmatmul.mubr.msk.bf16.gmra.mrb[28].mxu0 %vm271_vm2, %v4337_v49  ;;  %3480 = vmatprep.mubr.msk.bf16.mxu1 %vm271_vm2, %v4339_v51 }
  0x6f   : > { %3634 = vmatprep.mubr.msk.bf16.mxu0 %vm271_vm2, %v4264_v54 }
  0x75   : > { %3481 = vmatmul.mubr.msk.bf16.gmra.mrb[16].mxu1 %vm271_vm2, %v4353_v1 }
  0x76   : > { %3635 = vmatmul.mubr.msk.bf16.vlgmr.msra.gmra.mrb[0].mxu0 %vm271_vm2, %v4289_v10  ;;  %3484 = vmatprep.mubr.msk.bf16.mxu1 %vm271_vm2, %v4358_v26 }
  0x77   : > { %3667 = vmatpush3.bf16.msra.mxu0 %v4169_v58  ;;  %3638 = vmatprep.mubr.msk.bf16.mxu0 %vm271_vm2, %v4293_v12  ;;  %v198_v58 = vld [vmem:[%s4067_s25 + $0x138] sm:$0xff] }
  0x78   : > { %3700 = vmatprep.subr.bf16.mxu0 %v4361_v9  ;;  %v4393_v40 = vpack.c.bf16 %v199_v25, %v198_v58 }
  0x7d   : > { %3485 = vmatmul.mubr.msk.bf16.gmra.mrb[20].mxu1 %vm271_vm2, %v4377_v22 }
  0x7e   : > { %3639 = vmatmul.mubr.msk.bf16.gmra.mrb[4].mxu0 %vm271_vm2, %v4313_v29  ;;  %3488 = vmatprep.mubr.msk.bf16.mxu1 %vm271_vm2, %v4379_v23 }
  0x7f   : > { %3642 = vmatprep.mubr.msk.bf16.mxu0 %vm271_vm2, %v4317_v33 }
  0x85   : > { %3489 = vmatmul.mubr.msk.bf16.gmra.mrb[24].mxu1 %vm271_vm2, %v4393_v40 }
  0x86   : > { %3643 = vmatmul.mubr.msk.bf16.gmra.mrb[8].mxu0 %vm271_vm2, %v4335_v48  ;;  %3492 = vmatprep.mubr.msk.bf16.mxu1 %vm271_vm2, %v4395_v41 }
  0x87   : > { %3646 = vmatprep.mubr.msk.bf16.mxu0 %vm271_vm2, %v4339_v51 }
  0x8d   : > { %3493 = vmatmul.mubr.msk.bf16.gmra.mrb[28].mxu1 %vm271_vm2, %v4409_v61 }
  0x8e   : > { %3647 = vmatmul.mubr.msk.bf16.gmra.mrb[12].mxu0 %vm271_vm2, %v4353_v1  ;;  %3498 = vmatprep.mubr.msk.bf16.mxu1 %vm271_vm2, %v732_v62 }
  0x8f   : > { %3650 = vmatprep.mubr.msk.bf16.mxu0 %vm271_vm2, %v4358_v26 }
  0x95   : > { %3499 = vmatmul.mubr.msk.bf16.vlgmr.msra.gmra.mrb[0].mxu1 %vm271_vm2, %v4139_v44  ;;  %v3152_v44 = vld [vmem:[%s4067_s25 + $0x180] sm:$0xff] }
  0x96   : > { %3531 = vmatpush3.bf16.msra.mxu1 %v4269_v60  ;;  %3651 = vmatmul.mubr.msk.bf16.gmra.mrb[16].mxu0 %vm271_vm2, %v4377_v22  ;;  %v3153_v60 = vld [vmem:[%s4067_s25 + $0x188] sm:$0xff] }
  0x97   : > { %3502 = vmatprep.mubr.msk.bf16.mxu1 %vm271_vm2, %v4162_v55  ;;  %3654 = vmatprep.mubr.msk.bf16.mxu0 %vm271_vm2, %v4379_v23  ;;  %v4438_v63 = vpack.c.bf16 %v3153_v60, %v3152_v44 }
  0x98   : > { %3734 = vmatprep.subr.bf16.mxu1 %v4057_v8 }
  0x9d   : > { %3503 = vmatmul.mubr.msk.bf16.gmra.mrb[4].mxu1 %vm271_vm2, %v4166_v57 }
  0x9e   : > { %3655 = vmatmul.mubr.msk.bf16.gmra.mrb[20].mxu0 %vm271_vm2, %v4393_v40  ;;  %3506 = vmatprep.mubr.msk.bf16.mxu1 %vm271_vm2, %v4190_v4 }
  0x9f   : > { %3658 = vmatprep.mubr.msk.bf16.mxu0 %vm271_vm2, %v4395_v41 }
  0xa5   : > { %3507 = vmatmul.mubr.msk.bf16.gmra.mrb[8].mxu1 %vm271_vm2, %v4194_v7 }
  0xa6   : > { %3659 = vmatmul.mubr.msk.bf16.gmra.mrb[24].mxu0 %vm271_vm2, %v4409_v61  ;;  %3510 = vmatprep.mubr.msk.bf16.mxu1 %vm271_vm2, %v4214_v18 }
  0xa7   : > { %3662 = vmatprep.mubr.msk.bf16.mxu0 %vm271_vm2, %v4438_v63 }
  0xad   : > { %3511 = vmatmul.mubr.msk.bf16.gmra.mrb[12].mxu1 %vm271_vm2, %v4218_v20 }
  0xae   : > { %3663 = vmatmul.mubr.msk.bf16.gmra.mrb[28].mxu0 %vm271_vm2, %v1925_v14  ;;  %3514 = vmatprep.mubr.msk.bf16.mxu1 %vm271_vm2, %v4238_v35 }
  0xaf   : > { %3668 = vmatprep.mubr.msk.bf16.mxu0 %vm271_vm2, %v4081_v21  ;;  %v3202_v21 = vld [vmem:[%s4067_s25 + $0x189] sm:$0xff] }
  0xb5   : > { %3515 = vmatmul.mubr.msk.bf16.gmra.mrb[16].mxu1 %vm271_vm2, %v4240_v39 }
  0xb6   : > { %3669 = vmatmul.mubr.msk.bf16.vlgmr.msra.gmra.mrb[0].mxu0 %vm271_vm2, %v4086_v24  ;;  %3518 = vmatprep.mubr.msk.bf16.mxu1 %vm271_vm2, %v4262_v52 }
  0xb7   : > { %3701 = vmatpush3.bf16.msra.mxu0 %v4361_v9  ;;  %3672 = vmatprep.mubr.msk.bf16.mxu0 %vm271_vm2, %v4105_v31  ;;  %v3203_v31 = vld [vmem:[%s4067_s25 + $0x199] sm:$0xff] }
  0xbd   : > { %3519 = vmatmul.mubr.msk.bf16.gmra.mrb[20].mxu1 %vm271_vm2, %v4266_v59 }
  0xbe   : > { %3673 = vmatmul.mubr.msk.bf16.gmra.mrb[4].mxu0 %vm271_vm2, %v4107_v32  ;;  %3522 = vmatprep.mubr.msk.bf16.mxu1 %vm271_vm2, %v4291_v11  ;;  %v3204_v32 = vld [vmem:[%s4067_s25 + $0x1a1] sm:$0xff] }
  0xbf   : > { %3676 = vmatprep.mubr.msk.bf16.mxu0 %vm271_vm2, %v4121_v37  ;;  %v2219_v37 = vpack.c.bf16 %v3204_v32, %v3203_v31 }
  0xc5   : > { %3523 = vmatmul.mubr.msk.bf16.gmra.mrb[24].mxu1 %vm271_vm2, %v4295_v13 }
  0xc6   : > { %3677 = vmatmul.mubr.msk.bf16.gmra.mrb[8].mxu0 %vm271_vm2, %v4123_v38  ;;  %3526 = vmatprep.mubr.msk.bf16.mxu1 %vm271_vm2, %v4315_v30  ;;  %v3252_v38 = vld [vmem:[%s4067_s25 + $0x19a] sm:$0xff] }
  0xc7   : > { %3680 = vmatprep.mubr.msk.bf16.mxu0 %vm271_vm2, %v4137_v43  ;;  %v3253_v43 = vld [vmem:[%s4067_s25 + $0x1a2] sm:$0xff] }
  0xcd   : > { %3527 = vmatmul.mubr.msk.bf16.gmra.mrb[28].mxu1 %vm271_vm2, %v4319_v36 }
  0xce   : > { %3681 = vmatmul.mubr.msk.bf16.gmra.mrb[12].mxu0 %vm271_vm2, %v4157_v53  ;;  %3532 = vmatprep.mubr.msk.bf16.mxu1 %vm271_vm2, %v4257_v50 }
  0xcf   : > { %3684 = vmatprep.mubr.msk.bf16.mxu0 %vm271_vm2, %v4164_v56 }
  0xd5   : > { %3533 = vmatmul.mubr.msk.bf16.vlgmr.msra.gmra.mrb[0].mxu1 %vm271_vm2, %v4264_v54 }
  0xd6   : > { %3735 = vmatpush3.bf16.msra.mxu1 %v4057_v8  ;;  %3685 = vmatmul.mubr.msk.bf16.gmra.mrb[16].mxu0 %vm271_vm2, %v4188_v3  ;;  %v3201_v8 = vld [vmem:[%s4067_s25 + $0x181] sm:$0xff] }
  0xd7   : > { %3536 = vmatprep.mubr.msk.bf16.mxu1 %vm271_vm2, %v4289_v10  ;;  %3688 = vmatprep.mubr.msk.bf16.mxu0 %vm271_vm2, %v4192_v6  ;;  %v2218_v24 = vpack.c.bf16 %v3202_v21, %v3201_v8 }
  0xdd   : > { %3537 = vmatmul.mubr.msk.bf16.gmra.mrb[4].mxu1 %vm271_vm2, %v4293_v12 }
  0xde   : > { %3689 = vmatmul.mubr.msk.bf16.gmra.mrb[20].mxu0 %vm271_vm2, %v4212_v17  ;;  %3540 = vmatprep.mubr.msk.bf16.mxu1 %vm271_vm2, %v4313_v29 }
  0xdf   : > { %3692 = vmatprep.mubr.msk.bf16.mxu0 %vm271_vm2, %v4216_v19 }
  0xe5   : > { %3541 = vmatmul.mubr.msk.bf16.gmra.mrb[8].mxu1 %vm271_vm2, %v4317_v33 }
  0xe6   : > { %3693 = vmatmul.mubr.msk.bf16.gmra.mrb[24].mxu0 %vm271_vm2, %v4236_v34  ;;  %3544 = vmatprep.mubr.msk.bf16.mxu1 %vm271_vm2, %v4335_v48 }
  0xe7   : > { %3696 = vmatprep.mubr.msk.bf16.mxu0 %vm271_vm2, %v2218_v24 }
  0xed   : > { %3545 = vmatmul.mubr.msk.bf16.gmra.mrb[12].mxu1 %vm271_vm2, %v4339_v51 }
  0xee   : > { %3697 = vmatmul.mubr.msk.bf16.gmra.mrb[28].mxu0 %vm271_vm2, %v2219_v37  ;;  %3548 = vmatprep.mubr.msk.bf16.mxu1 %vm271_vm2, %v4353_v1 }
  0xef   : > { %3702 = vmatprep.mubr.msk.bf16.mxu0 %vm271_vm2, %v4162_v55 }
  0xf5   : > { %3549 = vmatmul.mubr.msk.bf16.gmra.mrb[16].mxu1 %vm271_vm2, %v4358_v26 }
  0xf6   : > { %3703 = vmatmul.mubr.msk.bf16.vlgmr.msra.gmra.mrb[0].mxu0 %vm271_vm2, %v4166_v57  ;;  %3552 = vmatprep.mubr.msk.bf16.mxu1 %vm271_vm2, %v4377_v22 }
  0xf7   : > { %3706 = vmatprep.mubr.msk.bf16.mxu0 %vm271_vm2, %v4190_v4 }
  0xfd   : > { %3553 = vmatmul.mubr.msk.bf16.gmra.mrb[20].mxu1 %vm271_vm2, %v4379_v23 }
  0xfe   : > { %3707 = vmatmul.mubr.msk.bf16.gmra.mrb[4].mxu0 %vm271_vm2, %v4194_v7  ;;  %3556 = vmatprep.mubr.msk.bf16.mxu1 %vm271_vm2, %v4393_v40 }
  0xff   : > { %3710 = vmatprep.mubr.msk.bf16.mxu0 %vm271_vm2, %v4214_v18 }
 0x105   : > { %3557 = vmatmul.mubr.msk.bf16.gmra.mrb[24].mxu1 %vm271_vm2, %v4395_v41 }
 0x106   : > { %3711 = vmatmul.mubr.msk.bf16.gmra.mrb[8].mxu0 %vm271_vm2, %v4218_v20  ;;  %3560 = vmatprep.mubr.msk.bf16.mxu1 %vm271_vm2, %v4409_v61 }
 0x107   : > { %3714 = vmatprep.mubr.msk.bf16.mxu0 %vm271_vm2, %v4238_v35 }
 0x10d   : > { %3561 = vmatmul.mubr.msk.bf16.gmra.mrb[28].mxu1 %vm271_vm2, %v4438_v63 }
 0x10e   : > { %3715 = vmatmul.mubr.msk.bf16.gmra.mrb[12].mxu0 %vm271_vm2, %v4240_v39  ;;  %3582 = vmatprep.mubr.msk.bf16.mxu1 %vm271_vm2, %v4157_v53  ;;  %v2513_v53 = vpack.c.bf16 %v3253_v43, %v3252_v38 }
 0x10f   : > { %3718 = vmatprep.mubr.msk.bf16.mxu0 %vm271_vm2, %v4262_v52 }
 0x115   : > { %3583 = vmatmul.mubr.msk.bf16.vlgmr.msra.gmra.mrb[16].mxu1 %vm271_vm2, %v4164_v56 }
 0x116   : > { %3719 = vmatmul.mubr.msk.bf16.gmra.mrb[16].mxu0 %vm271_vm2, %v4266_v59  ;;  %3586 = vmatprep.mubr.msk.bf16.mxu1 %vm271_vm2, %v4188_v3  ;;  %v4596_v59 = vld [vmem:[%s4709_s2] ss:$0 sm:$0xff] }
 0x117   : > { %3722 = vmatprep.mubr.msk.bf16.mxu0 %vm271_vm2, %v4291_v11 }
 0x11d   : > { %3587 = vmatmul.mubr.msk.bf16.gmra.mrb[20].mxu1 %vm271_vm2, %v4192_v6 }
 0x11e   : > { %3723 = vmatmul.mubr.msk.bf16.gmra.mrb[20].mxu0 %vm271_vm2, %v4295_v13  ;;  %3590 = vmatprep.mubr.msk.bf16.mxu1 %vm271_vm2, %v4212_v17 }
 0x11f   : > { %3726 = vmatprep.mubr.msk.bf16.mxu0 %vm271_vm2, %v4315_v30 }
 0x125   : > { %3591 = vmatmul.mubr.msk.bf16.gmra.mrb[24].mxu1 %vm271_vm2, %v4216_v19 }
 0x126   : > { %3727 = vmatmul.mubr.msk.bf16.gmra.mrb[24].mxu0 %vm271_vm2, %v4319_v36  ;;  %3594 = vmatprep.mubr.msk.bf16.mxu1 %vm271_vm2, %v4236_v34 }
 0x127   : > { %3730 = vmatprep.mubr.msk.bf16.mxu0 %vm271_vm2, %v4337_v49 }
 0x12d   : > { %3595 = vmatmul.mubr.msk.bf16.gmra.mrb[28].mxu1 %vm271_vm2, %v2218_v24 }
 0x12e   : > { %3731 = vmatmul.mubr.msk.bf16.gmra.mrb[28].mxu0 %vm271_vm2, %v2513_v53 }
 0x1a8   : > { %v3534_v55 = vpop.f32.mrb[0].mxu1 }
 0x1a9   : > { %v1130_v56 = vpop.f32.mrb[1].mxu1 }
 0x1aa   : > { %v3535_v57 = vpop.f32.mrb[2].mxu1 }
 0x1ab   : > { %v1133_v3 = vpop.f32.mrb[3].mxu1 }
 0x1b0   : > { %v3538_v4 = vpop.f32.mrb[4].mxu1 }
 0x1b1   : > { %v1146_v6 = vpop.f32.mrb[5].mxu1 }
 0x1b2   : > { %v3539_v7 = vpop.f32.mrb[6].mxu1 }
 0x1b3   : > { %v1149_v17 = vpop.f32.mrb[7].mxu1 }
 0x1b8   : > { %v3542_v18 = vpop.f32.mrb[8].mxu1 }
 0x1b9   : > { %v1162_v19 = vpop.f32.mrb[9].mxu1 }
 0x1ba   : > { %v3543_v20 = vpop.f32.mrb[10].mxu1 }
 0x1bb   : > { %v1165_v34 = vpop.f32.mrb[11].mxu1 }
 0x1c0   : > { %v4585_v35 = vpop.f32.mrb[12].mxu1 }
 0x1c1   : > { %v4587_v39 = vpop.f32.mrb[13].mxu1 }
 0x1c2   : > { %v4589_v50 = vpop.f32.mrb[14].mxu1 }
 0x1c3   : > { %v4591_v52 = vpop.f32.mrb[15].mxu1 }
 0x1c9   : > { %v3704_v54 = vpop.f32.mrb[0].mxu0 }
 0x1ca   : > { %v3736_v10 = vadd.f32 %v3704_v54, %v3534_v55  ;;  %v2601_v11 = vpop.f32.mrb[1].mxu0 }
 0x1cb   : > { %v3737_v12 = vadd.f32 %v2601_v11, %v1130_v56  ;;  %v3705_v13 = vpop.f32.mrb[2].mxu0 }
 0x1cc   : > { %v2769_v29 = vadd.f32 %v3736_v10, %v4596_v59  ;;  %v3738_v30 = vadd.f32 %v3705_v13, %v3535_v57  ;;  %v2604_v33 = vpop.f32.mrb[3].mxu0 }
 0x1cd   : > { %v2767_v36 = vadd.f32 %v3737_v12, %v4596_v59  ;;  %v3739_v48 = vadd.f32 %v2604_v33, %v1133_v3 }
 0x1ce   : > { %v2801_v49 = vmax.f32 %v2769_v29, 0.0  ;;  %v2770_v51 = vadd.f32 %v3738_v30, %v4596_v59 }
 0x1cf   : > { %v2799_v1 = vmax.f32 %v2767_v36, 0.0  ;;  %v2768_v26 = vadd.f32 %v3739_v48, %v4596_v59 }
 0x1d0   : > { %2834 = vst.msk [vmem:[%s4603_s16 + $0x10] sm:$0xff] %vm2831_vm3, %v2801_v49  ;;  %v2802_v9 = vmax.f32 %v2770_v51, 0.0 }
 0x1d1   : > { %2832 = vst.msk [vmem:[%s4603_s16] sm:$0xff] %vm2831_vm3, %v2799_v1  ;;  %v2800_v15 = vmax.f32 %v2768_v26, 0.0  ;;  %v3708_v5 = vpop.f32.mrb[4].mxu0 }
 0x1d2   : > { %2835 = vst.msk [vmem:[%s4603_s16 + $0x18] sm:$0xff] %vm2831_vm3, %v2802_v9  ;;  %v3740_v16 = vadd.f32 %v3708_v5, %v3538_v4  ;;  %v2617_v22 = vpop.f32.mrb[5].mxu0 }
 0x1d3   : > { %2833 = vst.msk [vmem:[%s4603_s16 + $0x8] sm:$0xff] %vm2831_vm3, %v2800_v15  ;;  %v3741_v23 = vadd.f32 %v2617_v22, %v1146_v6  ;;  %v3709_v58 = vpop.f32.mrb[6].mxu0 }
 0x1d4   : > { %v2773_v25 = vadd.f32 %v3740_v16, %v4596_v59  ;;  %v3742_v27 = vadd.f32 %v3709_v58, %v3539_v7  ;;  %v2620_v28 = vpop.f32.mrb[7].mxu0 }
 0x1d5   : > { %v2771_v40 = vadd.f32 %v3741_v23, %v4596_v59  ;;  %v3743_v41 = vadd.f32 %v2620_v28, %v1149_v17 }
 0x1d6   : > { %v2805_v42 = vmax.f32 %v2773_v25, 0.0  ;;  %v2774_v45 = vadd.f32 %v3742_v27, %v4596_v59 }
 0x1d7   : > { %v2803_v46 = vmax.f32 %v2771_v40, 0.0  ;;  %v2772_v47 = vadd.f32 %v3743_v41, %v4596_v59 }
 0x1d8   : > { %2838 = vst.msk [vmem:[%s4603_s16 + $0x30] sm:$0xff] %vm2831_vm3, %v2805_v42  ;;  %v2806_v61 = vmax.f32 %v2774_v45, 0.0 }
 0x1d9   : > { %2836 = vst.msk [vmem:[%s4603_s16 + $0x20] sm:$0xff] %vm2831_vm3, %v2803_v46  ;;  %v2804_v62 = vmax.f32 %v2772_v47, 0.0  ;;  %v3712_v44 = vpop.f32.mrb[8].mxu0 }
 0x1da   : > { %2839 = vst.msk [vmem:[%s4603_s16 + $0x38] sm:$0xff] %vm2831_vm3, %v2806_v61  ;;  %v3744_v60 = vadd.f32 %v3712_v44, %v3542_v18  ;;  %v2633_v63 = vpop.f32.mrb[9].mxu0 }
 0x1db   : > { %2837 = vst.msk [vmem:[%s4603_s16 + $0x28] sm:$0xff] %vm2831_vm3, %v2804_v62  ;;  %v3745_v0 = vadd.f32 %v2633_v63, %v1162_v19  ;;  %v3713_v2 = vpop.f32.mrb[10].mxu0 }
 0x1dc   : > { %v2777_v14 = vadd.f32 %v3744_v60, %v4596_v59  ;;  %v3746_v8 = vadd.f32 %v3713_v2, %v3543_v20  ;;  %v2636_v21 = vpop.f32.mrb[11].mxu0 }
 0x1dd   : > { %v2775_v24 = vadd.f32 %v3745_v0, %v4596_v59  ;;  %v3747_v31 = vadd.f32 %v2636_v21, %v1165_v34 }
 0x1de   : > { %v2809_v32 = vmax.f32 %v2777_v14, 0.0  ;;  %v2778_v37 = vadd.f32 %v3746_v8, %v4596_v59 }
 0x1df   : > { %v2807_v38 = vmax.f32 %v2775_v24, 0.0  ;;  %v2776_v43 = vadd.f32 %v3747_v31, %v4596_v59 }
 0x1e0   : > { %2842 = vst.msk [vmem:[%s4603_s16 + $0x50] sm:$0xff] %vm2831_vm3, %v2809_v32  ;;  %v2810_v53 = vmax.f32 %v2778_v37, 0.0 }
 0x1e1   : > { %2840 = vst.msk [vmem:[%s4603_s16 + $0x40] sm:$0xff] %vm2831_vm3, %v2807_v38  ;;  %v2808_v55 = vmax.f32 %v2776_v43, 0.0  ;;  %v3716_v56 = vpop.f32.mrb[12].mxu0 }
 0x1e2   : > { %2843 = vst.msk [vmem:[%s4603_s16 + $0x58] sm:$0xff] %vm2831_vm3, %v2810_v53  ;;  %v3748_v57 = vadd.f32 %v3716_v56, %v4585_v35  ;;  %v2649_v3 = vpop.f32.mrb[13].mxu0 }
 0x1e3   : > { %2841 = vst.msk [vmem:[%s4603_s16 + $0x48] sm:$0xff] %vm2831_vm3, %v2808_v55  ;;  %v3749_v4 = vadd.f32 %v2649_v3, %v4587_v39  ;;  %v3717_v6 = vpop.f32.mrb[14].mxu0 }
 0x1e4   : > { %v2781_v7 = vadd.f32 %v3748_v57, %v4596_v59  ;;  %v3750_v17 = vadd.f32 %v3717_v6, %v4589_v50  ;;  %v2652_v18 = vpop.f32.mrb[15].mxu0 }
 0x1e5   : > { %v2779_v19 = vadd.f32 %v3749_v4, %v4596_v59  ;;  %v3751_v20 = vadd.f32 %v2652_v18, %v4591_v52 }
 0x1e6   : > { %v2813_v34 = vmax.f32 %v2781_v7, 0.0  ;;  %v2782_v35 = vadd.f32 %v3750_v17, %v4596_v59 }
 0x1e7   : > { %v2811_v54 = vmax.f32 %v2779_v19, 0.0  ;;  %v2780_v10 = vadd.f32 %v3751_v20, %v4596_v59 }
 0x1e8   : > { %2846 = vst.msk [vmem:[%s4603_s16 + $0x70] sm:$0xff] %vm2831_vm3, %v2813_v34  ;;  %v2814_v39 = vmax.f32 %v2782_v35, 0.0  ;;  %v3584_v11 = vpop.f32.mrb[16].mxu1 }
 0x1e9   : > { %2844 = vst.msk [vmem:[%s4603_s16 + $0x60] sm:$0xff] %vm2831_vm3, %v2811_v54  ;;  %v2812_v12 = vmax.f32 %v2780_v10, 0.0  ;;  %v3720_v50 = vpop.f32.mrb[16].mxu0  ;;  %v1488_v13 = vpop.f32.mrb[17].mxu1 }
 0x1ea   : > { %2847 = vst.msk [vmem:[%s4603_s16 + $0x78] sm:$0xff] %vm2831_vm3, %v2814_v39  ;;  %v3752_v29 = vadd.f32 %v3720_v50, %v3584_v11  ;;  %v2665_v52 = vpop.f32.mrb[17].mxu0  ;;  %v3585_v30 = vpop.f32.mrb[18].mxu1 }
 0x1eb   : > { %2845 = vst.msk [vmem:[%s4603_s16 + $0x68] sm:$0xff] %vm2831_vm3, %v2812_v12  ;;  %v3753_v33 = vadd.f32 %v2665_v52, %v1488_v13  ;;  %v3721_v36 = vpop.f32.mrb[18].mxu0  ;;  %v1491_v48 = vpop.f32.mrb[19].mxu1 }
 0x1ec   : > { %v2785_v49 = vadd.f32 %v3752_v29, %v4596_v59  ;;  %v3754_v51 = vadd.f32 %v3721_v36, %v3585_v30  ;;  %v2668_v1 = vpop.f32.mrb[19].mxu0 }
 0x1ed   : > { %v2783_v26 = vadd.f32 %v3753_v33, %v4596_v59  ;;  %v3755_v9 = vadd.f32 %v2668_v1, %v1491_v48 }
 0x1ee   : > { %v2817_v15 = vmax.f32 %v2785_v49, 0.0  ;;  %v2786_v5 = vadd.f32 %v3754_v51, %v4596_v59 }
 0x1ef   : > { %v2815_v16 = vmax.f32 %v2783_v26, 0.0  ;;  %v2784_v22 = vadd.f32 %v3755_v9, %v4596_v59 }
 0x1f0   : > { %2850 = vst.msk [vmem:[%s4603_s16 + $0x90] sm:$0xff] %vm2831_vm3, %v2817_v15  ;;  %v2818_v23 = vmax.f32 %v2786_v5, 0.0  ;;  %v3588_v58 = vpop.f32.mrb[20].mxu1 }
 0x1f1   : > { %2848 = vst.msk [vmem:[%s4603_s16 + $0x80] sm:$0xff] %vm2831_vm3, %v2815_v16  ;;  %v2816_v25 = vmax.f32 %v2784_v22, 0.0  ;;  %v3724_v27 = vpop.f32.mrb[20].mxu0  ;;  %v1504_v28 = vpop.f32.mrb[21].mxu1 }
 0x1f2   : > { %2851 = vst.msk [vmem:[%s4603_s16 + $0x98] sm:$0xff] %vm2831_vm3, %v2818_v23  ;;  %v3756_v40 = vadd.f32 %v3724_v27, %v3588_v58  ;;  %v2681_v41 = vpop.f32.mrb[21].mxu0  ;;  %v3589_v42 = vpop.f32.mrb[22].mxu1 }
 0x1f3   : > { %2849 = vst.msk [vmem:[%s4603_s16 + $0x88] sm:$0xff] %vm2831_vm3, %v2816_v25  ;;  %v3757_v45 = vadd.f32 %v2681_v41, %v1504_v28  ;;  %v3725_v46 = vpop.f32.mrb[22].mxu0  ;;  %v1507_v47 = vpop.f32.mrb[23].mxu1 }
 0x1f4   : > { %v2789_v61 = vadd.f32 %v3756_v40, %v4596_v59  ;;  %v3758_v62 = vadd.f32 %v3725_v46, %v3589_v42  ;;  %v2684_v44 = vpop.f32.mrb[23].mxu0 }
 0x1f5   : > { %v2787_v60 = vadd.f32 %v3757_v45, %v4596_v59  ;;  %v3759_v63 = vadd.f32 %v2684_v44, %v1507_v47 }
 0x1f6   : > { %v2821_v0 = vmax.f32 %v2789_v61, 0.0  ;;  %v2790_v2 = vadd.f32 %v3758_v62, %v4596_v59 }
 0x1f7   : > { %v2819_v14 = vmax.f32 %v2787_v60, 0.0  ;;  %v2788_v8 = vadd.f32 %v3759_v63, %v4596_v59 }
 0x1f8   : > { %2854 = vst.msk [vmem:[%s4603_s16 + $0xb0] sm:$0xff] %vm2831_vm3, %v2821_v0  ;;  %v2822_v21 = vmax.f32 %v2790_v2, 0.0  ;;  %v3592_v24 = vpop.f32.mrb[24].mxu1 }
 0x1f9   : > { %2852 = vst.msk [vmem:[%s4603_s16 + $0xa0] sm:$0xff] %vm2831_vm3, %v2819_v14  ;;  %v2820_v31 = vmax.f32 %v2788_v8, 0.0  ;;  %v3728_v32 = vpop.f32.mrb[24].mxu0  ;;  %v1520_v37 = vpop.f32.mrb[25].mxu1 }
 0x1fa   : > { %2855 = vst.msk [vmem:[%s4603_s16 + $0xb8] sm:$0xff] %vm2831_vm3, %v2822_v21  ;;  %v3760_v38 = vadd.f32 %v3728_v32, %v3592_v24  ;;  %v2697_v43 = vpop.f32.mrb[25].mxu0  ;;  %v3593_v53 = vpop.f32.mrb[26].mxu1 }
 0x1fb   : > { %2853 = vst.msk [vmem:[%s4603_s16 + $0xa8] sm:$0xff] %vm2831_vm3, %v2820_v31  ;;  %v3761_v55 = vadd.f32 %v2697_v43, %v1520_v37  ;;  %v3729_v56 = vpop.f32.mrb[26].mxu0  ;;  %v1523_v57 = vpop.f32.mrb[27].mxu1 }
 0x1fc   : > { %v2793_v3 = vadd.f32 %v3760_v38, %v4596_v59  ;;  %v3762_v4 = vadd.f32 %v3729_v56, %v3593_v53  ;;  %v2700_v6 = vpop.f32.mrb[27].mxu0 }
 0x1fd   : > { %v2791_v7 = vadd.f32 %v3761_v55, %v4596_v59  ;;  %v3763_v17 = vadd.f32 %v2700_v6, %v1523_v57 }
 0x1fe   : > { %v2825_v18 = vmax.f32 %v2793_v3, 0.0  ;;  %v2794_v19 = vadd.f32 %v3762_v4, %v4596_v59 }
 0x1ff   : > { %v2823_v20 = vmax.f32 %v2791_v7, 0.0  ;;  %v2792_v34 = vadd.f32 %v3763_v17, %v4596_v59 }
 0x200   : > { %2858 = vst.msk [vmem:[%s4603_s16 + $0xd0] sm:$0xff] %vm2831_vm3, %v2825_v18  ;;  %v2826_v35 = vmax.f32 %v2794_v19, 0.0  ;;  %v3596_v54 = vpop.f32.mrb[28].mxu1 }
 0x201   : > { %2856 = vst.msk [vmem:[%s4603_s16 + $0xc0] sm:$0xff] %vm2831_vm3, %v2823_v20  ;;  %v2824_v10 = vmax.f32 %v2792_v34, 0.0  ;;  %v3732_v39 = vpop.f32.mrb[28].mxu0  ;;  %v1536_v11 = vpop.f32.mrb[29].mxu1 }
 0x202   : > { %2859 = vst.msk [vmem:[%s4603_s16 + $0xd8] sm:$0xff] %vm2831_vm3, %v2826_v35  ;;  %v3764_v12 = vadd.f32 %v3732_v39, %v3596_v54  ;;  %v2713_v50 = vpop.f32.mrb[29].mxu0  ;;  %v3597_v13 = vpop.f32.mrb[30].mxu1 }
 0x203   : > { %2857 = vst.msk [vmem:[%s4603_s16 + $0xc8] sm:$0xff] %vm2831_vm3, %v2824_v10  ;;  %v3765_v29 = vadd.f32 %v2713_v50, %v1536_v11  ;;  %v3733_v52 = vpop.f32.mrb[30].mxu0  ;;  %v1539_v30 = vpop.f32.mrb[31].mxu1 }
 0x204   : > { %v2797_v33 = vadd.f32 %v3764_v12, %v4596_v59  ;;  %v3766_v36 = vadd.f32 %v3733_v52, %v3597_v13  ;;  %v2716_v48 = vpop.f32.mrb[31].mxu0 }
 0x205   : > { %v2795_v49 = vadd.f32 %v3765_v29, %v4596_v59  ;;  %v3767_v51 = vadd.f32 %v2716_v48, %v1539_v30 }
 0x206   : > { %v2829_v1 = vmax.f32 %v2797_v33, 0.0  ;;  %v2798_v26 = vadd.f32 %v3766_v36, %v4596_v59 }
 0x207   : > { %v2827_v9 = vmax.f32 %v2795_v49, 0.0  ;;  %v2796_v15 = vadd.f32 %v3767_v51, %v4596_v59 }
 0x208   : > { %2862 = vst.msk [vmem:[%s4603_s16 + $0xf0] sm:$0xff] %vm2831_vm3, %v2829_v1  ;;  %v2830_v5 = vmax.f32 %v2798_v26, 0.0 }
 0x209   : > { %2860 = vst.msk [vmem:[%s4603_s16 + $0xe0] sm:$0xff] %vm2831_vm3, %v2827_v9  ;;  %v2828_v16 = vmax.f32 %v2796_v15, 0.0 }
 0x20a   : > { %2863 = vst.msk [vmem:[%s4603_s16 + $0xf8] sm:$0xff] %vm2831_vm3, %v2830_v5 }
 0x20b   : > { %2861 = vst.msk [vmem:[%s4603_s16 + $0xe8] sm:$0xff] %vm2831_vm3, %v2828_v16 }
 0x20c PF: > { %s13_s12 = sadd.s32 1, %s4008_s12  }
 0x20d   : > { %p10_p4 = scmp.ge.s32.totalorder %s13_s12, 4  }
 0x20f   :  { %12 = sbr.rel (!%p10_p4) target bundleno = 1 (0x1), region = 72 }

// kernel: net_10_forward.7
= control target key start
LH: loop header
LB: loop body
LE: loop exit
PB: predicated region body
PF: predicated region fallthrough
CT: control target
= control target key end

     0   :  { %s4087_s12 = smov 0   ;;  %s4752_s0 = inlined_call_operand.vmem [shape: f32[2,18,18,16], index: 0, kind: input, shape index: {}]   ;;  %s4753_s1 = inlined_call_operand.vmem [shape: bf16[9,16,32], index: 1, kind: input, shape index: {}]   ;;  %s4754_s2 = inlined_call_operand.vmem [shape: f32[1,32], index: 2, kind: input, shape index: {}]   ;;  %s4755_s3 = inlined_call_operand.vmem [shape: f32[2,256,32], index: 3, kind: output, shape index: {}]  }
   0x1 LB: > { %s2951_s13 = sadd.s32 4294967295, %s4065_s12   ;;  %p2955_p0 = scmp.ge.s32.totalorder %s4065_s12, 1  ;;  %s4065_s12 = sphi %s4087_s12, %s13_s12  }
   0x2   : > { %p137_p1 = scmp.lt.s32.totalorder %s4065_s12, 3 }
   0x4   : > { %p138_p2 = pnand %p2955_p0, %p137_p1 }
   0x5   : > { %v4050_v0 = vld [vmem:[%s4753_s1 + $0x8] sm:$0xff] (!%p138_p2)   ;;  %p161_p3 = scmp.lt.s32.totalorder (!%p138_p2), %s2951_s13, 1  ;;  %v4101_v1 = vld [vmem:[%s4753_s1 + $0x20] sm:$0xff] (!%p138_p2)   ;;  %vm279_vm0 = vcmask (!%p138_p2), 130048   ;;  %v4054_v16 = vld [vmem:[%s4753_s1 + $0x30] sm:$0xff] (!%p138_p2)   ;;  %vm2863_vm1 = vcmask (!%p138_p2), 261120  }
   0x6   : > { %141 = sbr.rel (%p138_p2) target bundleno = 524 (0x20c), region = 32  ;;  %3477 = vmatprep.subr.bf16.mxu1 (!%p138_p2), %v4050_v0  ;;  %v4052_v2 = vld [vmem:[%s4753_s1] sm:$0xff] (!%p138_p2)   ;;  %3613 = vmatprep.subr.bf16.mxu0 (!%p138_p2), %v4101_v1  ;;  %v4053_v3 = vld [vmem:[%s4753_s1 + $0x28] sm:$0xff] (!%p138_p2)   ;;  %v4140_v17 = vld [vmem:[%s4753_s1 + $0x10] sm:$0xff] (!%p138_p2)  }
   0x7   : > { %3478 = vmatpush3.bf16.msra.mxu1 (!%p138_p2), %v4050_v0  ;;  %3614 = vmatpush3.bf16.msra.mxu0 (!%p138_p2), %v4101_v1  ;;  %v4216_v48 = vld [vmem:[%s4753_s1 + $0x38] sm:$0xff] (!%p138_p2)  }
   0x8   : > { %3511 = vmatprep.subr.bf16.mxu1 (!%p138_p2), %v4052_v2  ;;  %3647 = vmatprep.subr.bf16.mxu0 (!%p138_p2), %v4053_v3 }
   0xd   : > { %s4757_s13 = smov (!%p161_p3, %s2951_s13), 1 }
   0xe   : > { %s4041_s22 = smul.u32 432, %s4757_s13  ;;  %s3323_s11 = sshll.u32 %s4757_s13, 8 }
   0xf   : > { %s4648_s16 = scalar_lea.vmem %s4755_s3, %s3323_s11 }
  0x10   : > { %s4117_s25 = scalar_lea.vmem %s4752_s0, %s4041_s22 }
  0x11   : > { %v222_v4 = vld [vmem:[%s4117_s25 + $0x1] sm:$0xff]  ;;  %v223_v5 = vld [vmem:[%s4117_s25 + $0x9] sm:$0xff]  ;;  %v3065_v6 = vld [vmem:[%s4117_s25 + $0x19] sm:$0xff] }
  0x12   : > { %v254_v7 = vpack.c.bf16 %v223_v5, %v222_v4  ;;  %v3066_v8 = vld [vmem:[%s4117_s25 + $0x21] sm:$0xff]  ;;  %v3067_v9 = vld [vmem:[%s4117_s25 + $0x31] sm:$0xff]  ;;  %v3068_v10 = vld [vmem:[%s4117_s25 + $0x39] sm:$0xff] }
  0x13   : > { %v1333_v11 = vpack.c.bf16 %v3066_v8, %v3065_v6  ;;  %v4125_v12 = vpack.c.bf16 %v3068_v10, %v3067_v9  ;;  %v3069_v13 = vld [vmem:[%s4117_s25 + $0x49] sm:$0xff]  ;;  %v3070_v14 = vld [vmem:[%s4117_s25 + $0x51] sm:$0xff]  ;;  %v3071_v18 = vld [vmem:[%s4117_s25 + $0x61] sm:$0xff] }
  0x14   : > { %3479 = vmatprep.mubr.msk.bf16.mxu1 %vm279_vm0, %v254_v7  ;;  %v4130_v15 = vpack.c.bf16 %v3070_v14, %v3069_v13  ;;  %v3072_v19 = vld [vmem:[%s4117_s25 + $0x69] sm:$0xff]  ;;  %v3073_v20 = vld [vmem:[%s4117_s25 + $0x79] sm:$0xff]  ;;  %v3074_v21 = vld [vmem:[%s4117_s25 + $0x81] sm:$0xff] }
  0x15   : > { %3615 = vmatprep.mubr.msk.bf16.mxu0 %vm279_vm0, %v1333_v11  ;;  %3480 = vmatmul.mubr.msk.bf16.vlgmr.msra.gmra.mrb[0].mxu1 %vm279_vm0, %v1333_v11  ;;  %v4153_v22 = vpack.c.bf16 %v3072_v19, %v3071_v18  ;;  %v4155_v23 = vpack.c.bf16 %v3074_v21, %v3073_v20  ;;  %v3075_v24 = vld [vmem:[%s4117_s25 + $0x91] sm:$0xff]  ;;  %v3076_v25 = vld [vmem:[%s4117_s25 + $0x99] sm:$0xff]  ;;  %v3077_v26 = vld [vmem:[%s4117_s25 + $0xa9] sm:$0xff] }
  0x16   : > { %3512 = vmatpush3.bf16.msra.mxu1 %v4052_v2  ;;  %3616 = vmatmul.mubr.msk.bf16.vlgmr.msra.gmra.mrb[0].mxu0 %vm279_vm0, %v4125_v12  ;;  %v3078_v27 = vld [vmem:[%s4117_s25 + $0xb1] sm:$0xff]  ;;  %v4169_v28 = vpack.c.bf16 %v3076_v25, %v3075_v24  ;;  %v3079_v30 = vld [vmem:[%s4117_s25 + $0xc1] sm:$0xff]  ;;  %v3080_v31 = vld [vmem:[%s4117_s25 + $0xc9] sm:$0xff] }
  0x17   : > { %3648 = vmatpush3.bf16.msra.mxu0 %v4053_v3  ;;  %3483 = vmatprep.mubr.msk.bf16.mxu1 %vm279_vm0, %v4125_v12  ;;  %v4171_v29 = vpack.c.bf16 %v3078_v27, %v3077_v26  ;;  %v3116_v32 = vld [vmem:[%s4117_s25 + $0x1a] sm:$0xff]  ;;  %v3117_v33 = vld [vmem:[%s4117_s25 + $0x22] sm:$0xff]  ;;  %v4185_v34 = vpack.c.bf16 %v3080_v31, %v3079_v30  ;;  %v3118_v38 = vld [vmem:[%s4117_s25 + $0x32] sm:$0xff] }
  0x18   : > { %3619 = vmatprep.mubr.msk.bf16.mxu0 %vm279_vm0, %v4130_v15  ;;  %3681 = vmatprep.subr.bf16.mxu0 %v4054_v16  ;;  %v4187_v35 = vpack.c.bf16 %v3117_v33, %v3116_v32  ;;  %v240_v36 = vld [vmem:[%s4117_s25 + $0xd9] sm:$0xff]  ;;  %v241_v37 = vld [vmem:[%s4117_s25 + $0xe1] sm:$0xff]  ;;  %v242_v40 = vld [vmem:[%s4117_s25 + $0xf1] sm:$0xff] }
  0x19   : > { %3545 = vmatprep.subr.bf16.mxu1 %v4140_v17  ;;  %v3119_v39 = vld [vmem:[%s4117_s25 + $0x3a] sm:$0xff]  ;;  %v3120_v42 = vld [vmem:[%s4117_s25 + $0x4a] sm:$0xff]  ;;  %v3121_v43 = vld [vmem:[%s4117_s25 + $0x52] sm:$0xff]  ;;  %v4205_v44 = vpack.c.bf16 %v241_v37, %v240_v36 }
  0x1a   : > { %v243_v41 = vld [vmem:[%s4117_s25 + $0xf9] sm:$0xff]  ;;  %v4207_v45 = vpack.c.bf16 %v3119_v39, %v3118_v38  ;;  %v4211_v47 = vpack.c.bf16 %v3121_v43, %v3120_v42  ;;  %v244_v49 = vld [vmem:[%s4117_s25 + $0x109] sm:$0xff]  ;;  %v245_v50 = vld [vmem:[%s4117_s25 + $0x111] sm:$0xff] }
  0x1b   : > { %v4209_v46 = vpack.c.bf16 %v243_v41, %v242_v40  ;;  %v3122_v51 = vld [vmem:[%s4117_s25 + $0x62] sm:$0xff]  ;;  %v3123_v52 = vld [vmem:[%s4117_s25 + $0x6a] sm:$0xff]  ;;  %v3124_v55 = vld [vmem:[%s4117_s25 + $0x7a] sm:$0xff]  ;;  %v4235_v57 = vpack.c.bf16 %v245_v50, %v244_v49 }
  0x1c   : > { %v246_v53 = vld [vmem:[%s4117_s25 + $0x121] sm:$0xff]  ;;  %v247_v54 = vld [vmem:[%s4117_s25 + $0x129] sm:$0xff]  ;;  %v4237_v58 = vpack.c.bf16 %v3123_v52, %v3122_v51  ;;  %v248_v61 = vld [vmem:[%s4117_s25 + $0x139] sm:$0xff] }
  0x1d   : > { %3484 = vmatmul.mubr.msk.bf16.gmra.mrb[4].mxu1 %vm279_vm0, %v4130_v15  ;;  %v3125_v56 = vld [vmem:[%s4117_s25 + $0x82] sm:$0xff]  ;;  %v4239_v59 = vpack.c.bf16 %v247_v54, %v246_v53  ;;  %v3126_v63 = vld [vmem:[%s4117_s25 + $0x92] sm:$0xff]  ;;  %v3127_v0 = vld [vmem:[%s4117_s25 + $0x9a] sm:$0xff] }
  0x1e   : > { %3620 = vmatmul.mubr.msk.bf16.gmra.mrb[4].mxu0 %vm279_vm0, %v4153_v22  ;;  %3487 = vmatprep.mubr.msk.bf16.mxu1 %vm279_vm0, %v4153_v22  ;;  %v4241_v60 = vpack.c.bf16 %v3125_v56, %v3124_v55  ;;  %v249_v62 = vld [vmem:[%s4117_s25 + $0x141] sm:$0xff]  ;;  %v250_v2 = vld [vmem:[%s4117_s25 + $0x151] sm:$0xff]  ;;  %v251_v3 = vld [vmem:[%s4117_s25 + $0x159] sm:$0xff]  ;;  %v4261_v7 = vpack.c.bf16 %v3127_v0, %v3126_v63 }
  0x1f   : > { %3623 = vmatprep.mubr.msk.bf16.mxu0 %vm279_vm0, %v4155_v23  ;;  %v3128_v4 = vld [vmem:[%s4117_s25 + $0xaa] sm:$0xff]  ;;  %v3129_v5 = vld [vmem:[%s4117_s25 + $0xb2] sm:$0xff]  ;;  %v4259_v6 = vpack.c.bf16 %v249_v62, %v248_v61  ;;  %v4263_v8 = vpack.c.bf16 %v251_v3, %v250_v2  ;;  %v3130_v13 = vld [vmem:[%s4117_s25 + $0xc2] sm:$0xff] }
  0x20   : > { %v4265_v9 = vpack.c.bf16 %v3129_v5, %v3128_v4  ;;  %v252_v10 = vld [vmem:[%s4117_s25 + $0x169] sm:$0xff]  ;;  %v253_v11 = vld [vmem:[%s4117_s25 + $0x171] sm:$0xff]  ;;  %v3132_v19 = vld [vmem:[%s4117_s25 + $0xda] sm:$0xff] }
  0x21   : > { %v3131_v14 = vld [vmem:[%s4117_s25 + $0xca] sm:$0xff]  ;;  %v3133_v20 = vld [vmem:[%s4117_s25 + $0xe2] sm:$0xff]  ;;  %v4283_v21 = vpack.c.bf16 %v253_v11, %v252_v10  ;;  %v174_v27 = vld [vmem:[%s4117_s25 + $0x18] sm:$0xff] }
  0x22   : > { %v173_v18 = vld [vmem:[%s4117_s25 + $0x8] sm:$0xff]  ;;  %v4285_v24 = vpack.c.bf16 %v3131_v14, %v3130_v13  ;;  %v4287_v26 = vpack.c.bf16 %v3133_v20, %v3132_v19  ;;  %v175_v30 = vld [vmem:[%s4117_s25 + $0x20] sm:$0xff]  ;;  %v3134_v31 = vld [vmem:[%s4117_s25 + $0xf2] sm:$0xff] }
  0x23   : > { %v3135_v32 = vld [vmem:[%s4117_s25 + $0xfa] sm:$0xff]  ;;  %v176_v33 = vld [vmem:[%s4117_s25 + $0x30] sm:$0xff]  ;;  %v4304_v39 = vpack.c.bf16 %v175_v30, %v174_v27  ;;  %v178_v49 = vld [vmem:[%s4117_s25 + $0x48] sm:$0xff] }
  0x24   : > { %v177_v36 = vld [vmem:[%s4117_s25 + $0x38] sm:$0xff]  ;;  %v3136_v37 = vld [vmem:[%s4117_s25 + $0x10a] sm:$0xff]  ;;  %v4306_v40 = vpack.c.bf16 %v3135_v32, %v3134_v31  ;;  %v3138_v51 = vld [vmem:[%s4117_s25 + $0x122] sm:$0xff] }
  0x25   : > { %3488 = vmatmul.mubr.msk.bf16.gmra.mrb[8].mxu1 %vm279_vm0, %v4155_v23  ;;  %v3137_v38 = vld [vmem:[%s4117_s25 + $0x112] sm:$0xff]  ;;  %v4308_v41 = vpack.c.bf16 %v177_v36, %v176_v33  ;;  %v3139_v52 = vld [vmem:[%s4117_s25 + $0x12a] sm:$0xff]  ;;  %v180_v53 = vld [vmem:[%s4117_s25 + $0x60] sm:$0xff] }
  0x26   : > { %3624 = vmatmul.mubr.msk.bf16.gmra.mrb[8].mxu0 %vm279_vm0, %v4169_v28  ;;  %3491 = vmatprep.mubr.msk.bf16.mxu1 %vm279_vm0, %v4169_v28  ;;  %v4310_v42 = vpack.c.bf16 %v3137_v38, %v3136_v37  ;;  %v4315_v43 = vld [vmem:[%s4753_s1 + $0x18] sm:$0xff]   ;;  %v179_v50 = vld [vmem:[%s4117_s25 + $0x50] sm:$0xff]  ;;  %v181_v54 = vld [vmem:[%s4117_s25 + $0x68] sm:$0xff]  ;;  %v4337_v61 = vpack.c.bf16 %v3139_v52, %v3138_v51 }
  0x27   : > { %3627 = vmatprep.mubr.msk.bf16.mxu0 %vm279_vm0, %v4171_v29  ;;  %v3141_v55 = vld [vmem:[%s4117_s25 + $0x142] sm:$0xff]  ;;  %v4335_v56 = vpack.c.bf16 %v179_v50, %v178_v49  ;;  %v4339_v62 = vpack.c.bf16 %v181_v54, %v180_v53  ;;  %v182_v0 = vld [vmem:[%s4117_s25 + $0x78] sm:$0xff]  ;;  %v184_v5 = vld [vmem:[%s4117_s25 + $0x90] sm:$0xff] }
  0x28   : > { %v183_v2 = vld [vmem:[%s4117_s25 + $0x80] sm:$0xff]  ;;  %v3142_v3 = vld [vmem:[%s4117_s25 + $0x152] sm:$0xff]  ;;  %v3144_v11 = vld [vmem:[%s4117_s25 + $0x16a] sm:$0xff] }
  0x29   : > { %v3143_v4 = vld [vmem:[%s4117_s25 + $0x15a] sm:$0xff]  ;;  %v3145_v13 = vld [vmem:[%s4117_s25 + $0x172] sm:$0xff]  ;;  %v4359_v14 = vpack.c.bf16 %v183_v2, %v182_v0  ;;  %v186_v20 = vld [vmem:[%s4117_s25 + $0xa8] sm:$0xff] }
  0x2a   : > { %v185_v10 = vld [vmem:[%s4117_s25 + $0x98] sm:$0xff]  ;;  %v4365_v19 = vpack.c.bf16 %v3145_v13, %v3144_v11  ;;  %v3146_v27 = vld [vmem:[%s4117_s25 + $0x182] sm:$0xff]  ;;  %v3147_v30 = vld [vmem:[%s4117_s25 + $0x18a] sm:$0xff] }
  0x2b   : > { %v188_v31 = vld [vmem:[%s4117_s25 + $0xc0] sm:$0xff]  ;;  %v189_v32 = vld [vmem:[%s4117_s25 + $0xc8] sm:$0xff]  ;;  %v4383_v36 = vpack.c.bf16 %v3147_v30, %v3146_v27  ;;  %v190_v38 = vld [vmem:[%s4117_s25 + $0xd8] sm:$0xff] }
  0x2c   : > { %v4385_v37 = vpack.c.bf16 %v189_v32, %v188_v31  ;;  %v191_v49 = vld [vmem:[%s4117_s25 + $0xe0] sm:$0xff]  ;;  %v192_v50 = vld [vmem:[%s4117_s25 + $0xf0] sm:$0xff]  ;;  %v193_v51 = vld [vmem:[%s4117_s25 + $0xf8] sm:$0xff] }
  0x2d   : > { %3492 = vmatmul.mubr.msk.bf16.gmra.mrb[12].mxu1 %vm279_vm0, %v4171_v29  ;;  %v4399_v52 = vpack.c.bf16 %v191_v49, %v190_v38  ;;  %v4401_v53 = vpack.c.bf16 %v193_v51, %v192_v50  ;;  %v4406_v54 = vld [vmem:[%s4753_s1 + $0x40] sm:$0xff]   ;;  %v197_v2 = vld [vmem:[%s4117_s25 + $0x128] sm:$0xff]  ;;  %v201_v11 = vld [vmem:[%s4117_s25 + $0x158] sm:$0xff] }
  0x2e   : > { %3628 = vmatmul.mubr.msk.bf16.gmra.mrb[12].mxu0 %vm279_vm0, %v4185_v34  ;;  %3495 = vmatprep.mubr.msk.bf16.mxu1 %vm279_vm0, %v4185_v34  ;;  %v196_v0 = vld [vmem:[%s4117_s25 + $0x120] sm:$0xff]  ;;  %v203_v27 = vld [vmem:[%s4117_s25 + $0x170] sm:$0xff]  ;;  %v3197_v50 = vld [vmem:[%s4117_s25 + $0x198] sm:$0xff] }
  0x2f   : > { %3649 = vmatprep.mubr.msk.bf16.mxu0 %vm279_vm0, %v4187_v35  ;;  %v704_v30 = vld [vmem:[%s4117_s25 + $0x2] sm:$0xff]  ;;  %v705_v31 = vld [vmem:[%s4117_s25 + $0xa] sm:$0xff] }
  0x30   : > { %v736_v38 = vpack.c.bf16 %v705_v31, %v704_v30  ;;  %v3198_v51 = vld [vmem:[%s4117_s25 + $0x1a0] sm:$0xff] }
  0x35   : > { %3496 = vmatmul.mubr.msk.bf16.gmra.mrb[16].mxu1 %vm279_vm0, %v4205_v44 }
  0x36   : > { %3650 = vmatmul.mubr.msk.bf16.vlgmr.msra.gmra.mrb[0].mxu0 %vm279_vm0, %v4207_v45  ;;  %3499 = vmatprep.mubr.msk.bf16.mxu1 %vm279_vm0, %v4209_v46 }
  0x37   : > { %3682 = vmatpush3.bf16.msra.mxu0 %v4054_v16  ;;  %3653 = vmatprep.mubr.msk.bf16.mxu0 %vm279_vm0, %v4211_v47  ;;  %v172_v16 = vld [vmem:[%s4117_s25] sm:$0xff] }
  0x38   : > { %3715 = vmatprep.subr.bf16.mxu0 %v4216_v48  ;;  %v204_v25 = vpack.c.bf16 %v173_v18, %v172_v16  ;;  %v4361_v16 = vpack.c.bf16 %v3143_v4, %v3142_v3  ;;  %v4363_v18 = vpack.c.bf16 %v185_v10, %v184_v5  ;;  %v4424_v4 = vpack.c.bf16 %v197_v2, %v196_v0  ;;  %v199_v5 = vld [vmem:[%s4117_s25 + $0x140] sm:$0xff]  ;;  %v200_v10 = vld [vmem:[%s4117_s25 + $0x150] sm:$0xff] }
  0x3d   : > { %3500 = vmatmul.mubr.msk.bf16.gmra.mrb[20].mxu1 %vm279_vm0, %v4235_v57 }
  0x3e   : > { %3654 = vmatmul.mubr.msk.bf16.gmra.mrb[4].mxu0 %vm279_vm0, %v4237_v58  ;;  %3503 = vmatprep.mubr.msk.bf16.mxu1 %vm279_vm0, %v4239_v59 }
  0x3f   : > { %3657 = vmatprep.mubr.msk.bf16.mxu0 %vm279_vm0, %v4241_v60 }
  0x45   : > { %3504 = vmatmul.mubr.msk.bf16.gmra.mrb[24].mxu1 %vm279_vm0, %v4259_v6 }
  0x46   : > { %3658 = vmatmul.mubr.msk.bf16.gmra.mrb[8].mxu0 %vm279_vm0, %v4261_v7  ;;  %3507 = vmatprep.mubr.msk.bf16.mxu1 %vm279_vm0, %v4263_v8 }
  0x47   : > { %3661 = vmatprep.mubr.msk.bf16.mxu0 %vm279_vm0, %v4265_v9 }
  0x4d   : > { %3508 = vmatmul.mubr.msk.bf16.gmra.mrb[28].mxu1 %vm279_vm0, %v4283_v21 }
  0x4e   : > { %3662 = vmatmul.mubr.msk.bf16.gmra.mrb[12].mxu0 %vm279_vm0, %v4285_v24  ;;  %3513 = vmatprep.mubr.msk.bf16.mxu1 %vm279_vm0, %v204_v25  ;;  %v187_v25 = vld [vmem:[%s4117_s25 + $0xb0] sm:$0xff] }
  0x4f   : > { %3665 = vmatprep.mubr.msk.bf16.mxu0 %vm279_vm0, %v4287_v26  ;;  %v4381_v33 = vpack.c.bf16 %v187_v25, %v186_v20  ;;  %v4440_v20 = vpack.c.bf16 %v201_v11, %v200_v10  ;;  %v202_v25 = vld [vmem:[%s4117_s25 + $0x168] sm:$0xff] }
  0x50   : > { %v4454_v32 = vpack.c.bf16 %v203_v27, %v202_v25 }
  0x55   : > { %3514 = vmatmul.mubr.msk.bf16.vlgmr.msra.gmra.mrb[0].mxu1 %vm279_vm0, %v4304_v39 }
  0x56   : > { %3546 = vmatpush3.bf16.msra.mxu1 %v4140_v17  ;;  %3666 = vmatmul.mubr.msk.bf16.gmra.mrb[16].mxu0 %vm279_vm0, %v4306_v40  ;;  %v3140_v17 = vld [vmem:[%s4117_s25 + $0x13a] sm:$0xff] }
  0x57   : > { %3517 = vmatprep.mubr.msk.bf16.mxu1 %vm279_vm0, %v4308_v41  ;;  %3669 = vmatprep.mubr.msk.bf16.mxu0 %vm279_vm0, %v4310_v42  ;;  %v4341_v63 = vpack.c.bf16 %v3141_v55, %v3140_v17  ;;  %v194_v17 = vld [vmem:[%s4117_s25 + $0x108] sm:$0xff]  ;;  %v195_v55 = vld [vmem:[%s4117_s25 + $0x110] sm:$0xff] }
  0x58   : > { %3579 = vmatprep.subr.bf16.mxu1 %v4315_v43  ;;  %v4422_v3 = vpack.c.bf16 %v195_v55, %v194_v17  ;;  %v1945_v17 = vpack.c.bf16 %v3198_v51, %v3197_v50 }
  0x5d   : > { %3518 = vmatmul.mubr.msk.bf16.gmra.mrb[4].mxu1 %vm279_vm0, %v4335_v56 }
  0x5e   : > { %3670 = vmatmul.mubr.msk.bf16.gmra.mrb[20].mxu0 %vm279_vm0, %v4337_v61  ;;  %3521 = vmatprep.mubr.msk.bf16.mxu1 %vm279_vm0, %v4339_v62 }
  0x5f   : > { %3673 = vmatprep.mubr.msk.bf16.mxu0 %vm279_vm0, %v4341_v63 }
  0x65   : > { %3522 = vmatmul.mubr.msk.bf16.gmra.mrb[8].mxu1 %vm279_vm0, %v4359_v14 }
  0x66   : > { %3674 = vmatmul.mubr.msk.bf16.gmra.mrb[24].mxu0 %vm279_vm0, %v4361_v16  ;;  %3525 = vmatprep.mubr.msk.bf16.mxu1 %vm279_vm0, %v4363_v18 }
  0x67   : > { %3677 = vmatprep.mubr.msk.bf16.mxu0 %vm279_vm0, %v4365_v19 }
  0x6d   : > { %3526 = vmatmul.mubr.msk.bf16.gmra.mrb[12].mxu1 %vm279_vm0, %v4381_v33 }
  0x6e   : > { %3678 = vmatmul.mubr.msk.bf16.gmra.mrb[28].mxu0 %vm279_vm0, %v4383_v36  ;;  %3529 = vmatprep.mubr.msk.bf16.mxu1 %vm279_vm0, %v4385_v37 }
  0x6f   : > { %3683 = vmatprep.mubr.msk.bf16.mxu0 %vm279_vm0, %v4308_v41 }
  0x75   : > { %3530 = vmatmul.mubr.msk.bf16.gmra.mrb[16].mxu1 %vm279_vm0, %v4399_v52 }
  0x76   : > { %3684 = vmatmul.mubr.msk.bf16.vlgmr.msra.gmra.mrb[0].mxu0 %vm279_vm0, %v4335_v56  ;;  %3533 = vmatprep.mubr.msk.bf16.mxu1 %vm279_vm0, %v4401_v53 }
  0x77   : > { %3716 = vmatpush3.bf16.msra.mxu0 %v4216_v48  ;;  %3687 = vmatprep.mubr.msk.bf16.mxu0 %vm279_vm0, %v4339_v62  ;;  %v198_v48 = vld [vmem:[%s4117_s25 + $0x138] sm:$0xff] }
  0x78   : > { %3749 = vmatprep.subr.bf16.mxu0 %v4406_v54  ;;  %v4438_v13 = vpack.c.bf16 %v199_v5, %v198_v48 }
  0x7d   : > { %3534 = vmatmul.mubr.msk.bf16.gmra.mrb[20].mxu1 %vm279_vm0, %v4422_v3 }
  0x7e   : > { %3688 = vmatmul.mubr.msk.bf16.gmra.mrb[4].mxu0 %vm279_vm0, %v4359_v14  ;;  %3537 = vmatprep.mubr.msk.bf16.mxu1 %vm279_vm0, %v4424_v4 }
  0x7f   : > { %3691 = vmatprep.mubr.msk.bf16.mxu0 %vm279_vm0, %v4363_v18 }
  0x85   : > { %3538 = vmatmul.mubr.msk.bf16.gmra.mrb[24].mxu1 %vm279_vm0, %v4438_v13 }
  0x86   : > { %3692 = vmatmul.mubr.msk.bf16.gmra.mrb[8].mxu0 %vm279_vm0, %v4381_v33  ;;  %3541 = vmatprep.mubr.msk.bf16.mxu1 %vm279_vm0, %v4440_v20 }
  0x87   : > { %3695 = vmatprep.mubr.msk.bf16.mxu0 %vm279_vm0, %v4385_v37 }
  0x8d   : > { %3542 = vmatmul.mubr.msk.bf16.gmra.mrb[28].mxu1 %vm279_vm0, %v4454_v32 }
  0x8e   : > { %3696 = vmatmul.mubr.msk.bf16.gmra.mrb[12].mxu0 %vm279_vm0, %v4399_v52  ;;  %3547 = vmatprep.mubr.msk.bf16.mxu1 %vm279_vm0, %v736_v38 }
  0x8f   : > { %3699 = vmatprep.mubr.msk.bf16.mxu0 %vm279_vm0, %v4401_v53 }
  0x95   : > { %3548 = vmatmul.mubr.msk.bf16.vlgmr.msra.gmra.mrb[0].mxu1 %vm279_vm0, %v4187_v35  ;;  %v3195_v35 = vld [vmem:[%s4117_s25 + $0x180] sm:$0xff] }
  0x96   : > { %3580 = vmatpush3.bf16.msra.mxu1 %v4315_v43  ;;  %3700 = vmatmul.mubr.msk.bf16.gmra.mrb[16].mxu0 %vm279_vm0, %v4422_v3  ;;  %v3196_v43 = vld [vmem:[%s4117_s25 + $0x188] sm:$0xff] }
  0x97   : > { %3551 = vmatprep.mubr.msk.bf16.mxu1 %vm279_vm0, %v4207_v45  ;;  %3703 = vmatprep.mubr.msk.bf16.mxu0 %vm279_vm0, %v4424_v4  ;;  %v4483_v49 = vpack.c.bf16 %v3196_v43, %v3195_v35 }
  0x98   : > { %3783 = vmatprep.subr.bf16.mxu1 %v4101_v1 }
  0x9d   : > { %3552 = vmatmul.mubr.msk.bf16.gmra.mrb[4].mxu1 %vm279_vm0, %v4211_v47 }
  0x9e   : > { %3704 = vmatmul.mubr.msk.bf16.gmra.mrb[20].mxu0 %vm279_vm0, %v4438_v13  ;;  %3555 = vmatprep.mubr.msk.bf16.mxu1 %vm279_vm0, %v4237_v58 }
  0x9f   : > { %3707 = vmatprep.mubr.msk.bf16.mxu0 %vm279_vm0, %v4440_v20 }
  0xa5   : > { %3556 = vmatmul.mubr.msk.bf16.gmra.mrb[8].mxu1 %vm279_vm0, %v4241_v60 }
  0xa6   : > { %3708 = vmatmul.mubr.msk.bf16.gmra.mrb[24].mxu0 %vm279_vm0, %v4454_v32  ;;  %3559 = vmatprep.mubr.msk.bf16.mxu1 %vm279_vm0, %v4261_v7 }
  0xa7   : > { %3711 = vmatprep.mubr.msk.bf16.mxu0 %vm279_vm0, %v4483_v49 }
  0xad   : > { %3560 = vmatmul.mubr.msk.bf16.gmra.mrb[12].mxu1 %vm279_vm0, %v4265_v9 }
  0xae   : > { %3712 = vmatmul.mubr.msk.bf16.gmra.mrb[28].mxu0 %vm279_vm0, %v1945_v17  ;;  %3563 = vmatprep.mubr.msk.bf16.mxu1 %vm279_vm0, %v4285_v24 }
  0xaf   : > { %3717 = vmatprep.mubr.msk.bf16.mxu0 %vm279_vm0, %v4125_v12  ;;  %v3247_v12 = vld [vmem:[%s4117_s25 + $0x189] sm:$0xff] }
  0xb5   : > { %3564 = vmatmul.mubr.msk.bf16.gmra.mrb[16].mxu1 %vm279_vm0, %v4287_v26 }
  0xb6   : > { %3718 = vmatmul.mubr.msk.bf16.vlgmr.msra.gmra.mrb[0].mxu0 %vm279_vm0, %v4130_v15  ;;  %3567 = vmatprep.mubr.msk.bf16.mxu1 %vm279_vm0, %v4306_v40 }
  0xb7   : > { %3750 = vmatpush3.bf16.msra.mxu0 %v4406_v54  ;;  %3721 = vmatprep.mubr.msk.bf16.mxu0 %vm279_vm0, %v4153_v22  ;;  %v3248_v22 = vld [vmem:[%s4117_s25 + $0x199] sm:$0xff] }
  0xbd   : > { %3568 = vmatmul.mubr.msk.bf16.gmra.mrb[20].mxu1 %vm279_vm0, %v4310_v42 }
  0xbe   : > { %3722 = vmatmul.mubr.msk.bf16.gmra.mrb[4].mxu0 %vm279_vm0, %v4155_v23  ;;  %3571 = vmatprep.mubr.msk.bf16.mxu1 %vm279_vm0, %v4337_v61  ;;  %v3249_v23 = vld [vmem:[%s4117_s25 + $0x1a1] sm:$0xff] }
  0xbf   : > { %3725 = vmatprep.mubr.msk.bf16.mxu0 %vm279_vm0, %v4169_v28  ;;  %v2243_v28 = vpack.c.bf16 %v3249_v23, %v3248_v22 }
  0xc5   : > { %3572 = vmatmul.mubr.msk.bf16.gmra.mrb[24].mxu1 %vm279_vm0, %v4341_v63 }
  0xc6   : > { %3726 = vmatmul.mubr.msk.bf16.gmra.mrb[8].mxu0 %vm279_vm0, %v4171_v29  ;;  %3575 = vmatprep.mubr.msk.bf16.mxu1 %vm279_vm0, %v4361_v16  ;;  %v3299_v29 = vld [vmem:[%s4117_s25 + $0x19a] sm:$0xff] }
  0xc7   : > { %3729 = vmatprep.mubr.msk.bf16.mxu0 %vm279_vm0, %v4185_v34  ;;  %v3300_v34 = vld [vmem:[%s4117_s25 + $0x1a2] sm:$0xff] }
  0xcd   : > { %3576 = vmatmul.mubr.msk.bf16.gmra.mrb[28].mxu1 %vm279_vm0, %v4365_v19 }
  0xce   : > { %3730 = vmatmul.mubr.msk.bf16.gmra.mrb[12].mxu0 %vm279_vm0, %v4205_v44  ;;  %3581 = vmatprep.mubr.msk.bf16.mxu1 %vm279_vm0, %v4304_v39 }
  0xcf   : > { %3733 = vmatprep.mubr.msk.bf16.mxu0 %vm279_vm0, %v4209_v46 }
  0xd5   : > { %3582 = vmatmul.mubr.msk.bf16.vlgmr.msra.gmra.mrb[0].mxu1 %vm279_vm0, %v4308_v41 }
  0xd6   : > { %3784 = vmatpush3.bf16.msra.mxu1 %v4101_v1  ;;  %3734 = vmatmul.mubr.msk.bf16.gmra.mrb[16].mxu0 %vm279_vm0, %v4235_v57  ;;  %v3246_v1 = vld [vmem:[%s4117_s25 + $0x181] sm:$0xff] }
  0xd7   : > { %3585 = vmatprep.mubr.msk.bf16.mxu1 %vm279_vm0, %v4335_v56  ;;  %3737 = vmatprep.mubr.msk.bf16.mxu0 %vm279_vm0, %v4239_v59  ;;  %v2242_v15 = vpack.c.bf16 %v3247_v12, %v3246_v1 }
  0xdd   : > { %3586 = vmatmul.mubr.msk.bf16.gmra.mrb[4].mxu1 %vm279_vm0, %v4339_v62 }
  0xde   : > { %3738 = vmatmul.mubr.msk.bf16.gmra.mrb[20].mxu0 %vm279_vm0, %v4259_v6  ;;  %3589 = vmatprep.mubr.msk.bf16.mxu1 %vm279_vm0, %v4359_v14 }
  0xdf   : > { %3741 = vmatprep.mubr.msk.bf16.mxu0 %vm279_vm0, %v4263_v8 }
  0xe5   : > { %3590 = vmatmul.mubr.msk.bf16.gmra.mrb[8].mxu1 %vm279_vm0, %v4363_v18 }
  0xe6   : > { %3742 = vmatmul.mubr.msk.bf16.gmra.mrb[24].mxu0 %vm279_vm0, %v4283_v21  ;;  %3593 = vmatprep.mubr.msk.bf16.mxu1 %vm279_vm0, %v4381_v33 }
  0xe7   : > { %3745 = vmatprep.mubr.msk.bf16.mxu0 %vm279_vm0, %v2242_v15 }
  0xed   : > { %3594 = vmatmul.mubr.msk.bf16.gmra.mrb[12].mxu1 %vm279_vm0, %v4385_v37 }
  0xee   : > { %3746 = vmatmul.mubr.msk.bf16.gmra.mrb[28].mxu0 %vm279_vm0, %v2243_v28  ;;  %3597 = vmatprep.mubr.msk.bf16.mxu1 %vm279_vm0, %v4399_v52 }
  0xef   : > { %3751 = vmatprep.mubr.msk.bf16.mxu0 %vm279_vm0, %v4207_v45 }
  0xf5   : > { %3598 = vmatmul.mubr.msk.bf16.gmra.mrb[16].mxu1 %vm279_vm0, %v4401_v53 }
  0xf6   : > { %3752 = vmatmul.mubr.msk.bf16.vlgmr.msra.gmra.mrb[0].mxu0 %vm279_vm0, %v4211_v47  ;;  %3601 = vmatprep.mubr.msk.bf16.mxu1 %vm279_vm0, %v4422_v3 }
  0xf7   : > { %3755 = vmatprep.mubr.msk.bf16.mxu0 %vm279_vm0, %v4237_v58 }
  0xfd   : > { %3602 = vmatmul.mubr.msk.bf16.gmra.mrb[20].mxu1 %vm279_vm0, %v4424_v4 }
  0xfe   : > { %3756 = vmatmul.mubr.msk.bf16.gmra.mrb[4].mxu0 %vm279_vm0, %v4241_v60  ;;  %3605 = vmatprep.mubr.msk.bf16.mxu1 %vm279_vm0, %v4438_v13 }
  0xff   : > { %3759 = vmatprep.mubr.msk.bf16.mxu0 %vm279_vm0, %v4261_v7 }
 0x105   : > { %3606 = vmatmul.mubr.msk.bf16.gmra.mrb[24].mxu1 %vm279_vm0, %v4440_v20 }
 0x106   : > { %3760 = vmatmul.mubr.msk.bf16.gmra.mrb[8].mxu0 %vm279_vm0, %v4265_v9  ;;  %3609 = vmatprep.mubr.msk.bf16.mxu1 %vm279_vm0, %v4454_v32 }
 0x107   : > { %3763 = vmatprep.mubr.msk.bf16.mxu0 %vm279_vm0, %v4285_v24 }
 0x10d   : > { %3610 = vmatmul.mubr.msk.bf16.gmra.mrb[28].mxu1 %vm279_vm0, %v4483_v49 }
 0x10e   : > { %3764 = vmatmul.mubr.msk.bf16.gmra.mrb[12].mxu0 %vm279_vm0, %v4287_v26  ;;  %3631 = vmatprep.mubr.msk.bf16.mxu1 %vm279_vm0, %v4205_v44  ;;  %v2541_v44 = vpack.c.bf16 %v3300_v34, %v3299_v29 }
 0x10f   : > { %3767 = vmatprep.mubr.msk.bf16.mxu0 %vm279_vm0, %v4306_v40 }
 0x115   : > { %3632 = vmatmul.mubr.msk.bf16.vlgmr.msra.gmra.mrb[16].mxu1 %vm279_vm0, %v4209_v46 }
 0x116   : > { %3768 = vmatmul.mubr.msk.bf16.gmra.mrb[16].mxu0 %vm279_vm0, %v4310_v42  ;;  %3635 = vmatprep.mubr.msk.bf16.mxu1 %vm279_vm0, %v4235_v57  ;;  %v4641_v42 = vld [vmem:[%s4754_s2] ss:$0 sm:$0xff] }
 0x117   : > { %3771 = vmatprep.mubr.msk.bf16.mxu0 %vm279_vm0, %v4337_v61 }
 0x11d   : > { %3636 = vmatmul.mubr.msk.bf16.gmra.mrb[20].mxu1 %vm279_vm0, %v4239_v59 }
 0x11e   : > { %3772 = vmatmul.mubr.msk.bf16.gmra.mrb[20].mxu0 %vm279_vm0, %v4341_v63  ;;  %3639 = vmatprep.mubr.msk.bf16.mxu1 %vm279_vm0, %v4259_v6 }
 0x11f   : > { %3775 = vmatprep.mubr.msk.bf16.mxu0 %vm279_vm0, %v4361_v16 }
 0x125   : > { %3640 = vmatmul.mubr.msk.bf16.gmra.mrb[24].mxu1 %vm279_vm0, %v4263_v8 }
 0x126   : > { %3776 = vmatmul.mubr.msk.bf16.gmra.mrb[24].mxu0 %vm279_vm0, %v4365_v19  ;;  %3643 = vmatprep.mubr.msk.bf16.mxu1 %vm279_vm0, %v4283_v21 }
 0x127   : > { %3779 = vmatprep.mubr.msk.bf16.mxu0 %vm279_vm0, %v4383_v36 }
 0x12d   : > { %3644 = vmatmul.mubr.msk.bf16.gmra.mrb[28].mxu1 %vm279_vm0, %v2242_v15 }
 0x12e   : > { %3780 = vmatmul.mubr.msk.bf16.gmra.mrb[28].mxu0 %vm279_vm0, %v2541_v44 }
 0x1a8   : > { %v3583_v45 = vpop.f32.mrb[0].mxu1 }
 0x1a9   : > { %v1142_v46 = vpop.f32.mrb[1].mxu1 }
 0x1aa   : > { %v3584_v47 = vpop.f32.mrb[2].mxu1 }
 0x1ab   : > { %v1145_v57 = vpop.f32.mrb[3].mxu1 }
 0x1b0   : > { %v3587_v58 = vpop.f32.mrb[4].mxu1 }
 0x1b1   : > { %v1158_v59 = vpop.f32.mrb[5].mxu1 }
 0x1b2   : > { %v3588_v60 = vpop.f32.mrb[6].mxu1 }
 0x1b3   : > { %v1161_v6 = vpop.f32.mrb[7].mxu1 }
 0x1b8   : > { %v3591_v7 = vpop.f32.mrb[8].mxu1 }
 0x1b9   : > { %v1174_v8 = vpop.f32.mrb[9].mxu1 }
 0x1ba   : > { %v3592_v9 = vpop.f32.mrb[10].mxu1 }
 0x1bb   : > { %v1177_v21 = vpop.f32.mrb[11].mxu1 }
 0x1c0   : > { %v4630_v24 = vpop.f32.mrb[12].mxu1 }
 0x1c1   : > { %v4632_v26 = vpop.f32.mrb[13].mxu1 }
 0x1c2   : > { %v4634_v39 = vpop.f32.mrb[14].mxu1 }
 0x1c3   : > { %v4636_v40 = vpop.f32.mrb[15].mxu1 }
 0x1c9   : > { %v3753_v41 = vpop.f32.mrb[0].mxu0 }
 0x1ca   : > { %v3785_v56 = vadd.f32 %v3753_v41, %v3583_v45  ;;  %v2633_v61 = vpop.f32.mrb[1].mxu0 }
 0x1cb   : > { %v3786_v62 = vadd.f32 %v2633_v61, %v1142_v46  ;;  %v3754_v63 = vpop.f32.mrb[2].mxu0 }
 0x1cc   : > { %v2801_v14 = vadd.f32 %v3785_v56, %v4641_v42  ;;  %v3787_v16 = vadd.f32 %v3754_v63, %v3584_v47  ;;  %v2636_v18 = vpop.f32.mrb[3].mxu0 }
 0x1cd   : > { %v2799_v19 = vadd.f32 %v3786_v62, %v4641_v42  ;;  %v3788_v33 = vadd.f32 %v2636_v18, %v1145_v57 }
 0x1ce   : > { %v2833_v36 = vmax.f32 %v2801_v14, 0.0  ;;  %v2802_v37 = vadd.f32 %v3787_v16, %v4641_v42 }
 0x1cf   : > { %v2831_v52 = vmax.f32 %v2799_v19, 0.0  ;;  %v2800_v53 = vadd.f32 %v3788_v33, %v4641_v42 }
 0x1d0   : > { %2866 = vst.msk [vmem:[%s4648_s16 + $0x10] sm:$0xff] %vm2863_vm1, %v2833_v36  ;;  %v2834_v54 = vmax.f32 %v2802_v37, 0.0 }
 0x1d1   : > { %2864 = vst.msk [vmem:[%s4648_s16] sm:$0xff] %vm2863_vm1, %v2831_v52  ;;  %v2832_v55 = vmax.f32 %v2800_v53, 0.0  ;;  %v3757_v0 = vpop.f32.mrb[4].mxu0 }
 0x1d2   : > { %2867 = vst.msk [vmem:[%s4648_s16 + $0x18] sm:$0xff] %vm2863_vm1, %v2834_v54  ;;  %v3789_v2 = vadd.f32 %v3757_v0, %v3587_v58  ;;  %v2649_v3 = vpop.f32.mrb[5].mxu0 }
 0x1d3   : > { %2865 = vst.msk [vmem:[%s4648_s16 + $0x8] sm:$0xff] %vm2863_vm1, %v2832_v55  ;;  %v3790_v4 = vadd.f32 %v2649_v3, %v1158_v59  ;;  %v3758_v48 = vpop.f32.mrb[6].mxu0 }
 0x1d4   : > { %v2805_v5 = vadd.f32 %v3789_v2, %v4641_v42  ;;  %v3791_v10 = vadd.f32 %v3758_v48, %v3588_v60  ;;  %v2652_v11 = vpop.f32.mrb[7].mxu0 }
 0x1d5   : > { %v2803_v13 = vadd.f32 %v3790_v4, %v4641_v42  ;;  %v3792_v20 = vadd.f32 %v2652_v11, %v1161_v6 }
 0x1d6   : > { %v2837_v25 = vmax.f32 %v2805_v5, 0.0  ;;  %v2806_v27 = vadd.f32 %v3791_v10, %v4641_v42 }
 0x1d7   : > { %v2835_v30 = vmax.f32 %v2803_v13, 0.0  ;;  %v2804_v31 = vadd.f32 %v3792_v20, %v4641_v42 }
 0x1d8   : > { %2870 = vst.msk [vmem:[%s4648_s16 + $0x30] sm:$0xff] %vm2863_vm1, %v2837_v25  ;;  %v2838_v32 = vmax.f32 %v2806_v27, 0.0 }
 0x1d9   : > { %2868 = vst.msk [vmem:[%s4648_s16 + $0x20] sm:$0xff] %vm2863_vm1, %v2835_v30  ;;  %v2836_v38 = vmax.f32 %v2804_v31, 0.0  ;;  %v3761_v35 = vpop.f32.mrb[8].mxu0 }
 0x1da   : > { %2871 = vst.msk [vmem:[%s4648_s16 + $0x38] sm:$0xff] %vm2863_vm1, %v2838_v32  ;;  %v3793_v43 = vadd.f32 %v3761_v35, %v3591_v7  ;;  %v2665_v49 = vpop.f32.mrb[9].mxu0 }
 0x1db   : > { %2869 = vst.msk [vmem:[%s4648_s16 + $0x28] sm:$0xff] %vm2863_vm1, %v2836_v38  ;;  %v3794_v50 = vadd.f32 %v2665_v49, %v1174_v8  ;;  %v3762_v51 = vpop.f32.mrb[10].mxu0 }
 0x1dc   : > { %v2809_v17 = vadd.f32 %v3793_v43, %v4641_v42  ;;  %v3795_v1 = vadd.f32 %v3762_v51, %v3592_v9  ;;  %v2668_v12 = vpop.f32.mrb[11].mxu0 }
 0x1dd   : > { %v2807_v15 = vadd.f32 %v3794_v50, %v4641_v42  ;;  %v3796_v22 = vadd.f32 %v2668_v12, %v1177_v21 }
 0x1de   : > { %v2841_v23 = vmax.f32 %v2809_v17, 0.0  ;;  %v2810_v28 = vadd.f32 %v3795_v1, %v4641_v42 }
 0x1df   : > { %v2839_v29 = vmax.f32 %v2807_v15, 0.0  ;;  %v2808_v34 = vadd.f32 %v3796_v22, %v4641_v42 }
 0x1e0   : > { %2874 = vst.msk [vmem:[%s4648_s16 + $0x50] sm:$0xff] %vm2863_vm1, %v2841_v23  ;;  %v2842_v44 = vmax.f32 %v2810_v28, 0.0 }
 0x1e1   : > { %2872 = vst.msk [vmem:[%s4648_s16 + $0x40] sm:$0xff] %vm2863_vm1, %v2839_v29  ;;  %v2840_v45 = vmax.f32 %v2808_v34, 0.0  ;;  %v3765_v46 = vpop.f32.mrb[12].mxu0 }
 0x1e2   : > { %2875 = vst.msk [vmem:[%s4648_s16 + $0x58] sm:$0xff] %vm2863_vm1, %v2842_v44  ;;  %v3797_v47 = vadd.f32 %v3765_v46, %v4630_v24  ;;  %v2681_v57 = vpop.f32.mrb[13].mxu0 }
 0x1e3   : > { %2873 = vst.msk [vmem:[%s4648_s16 + $0x48] sm:$0xff] %vm2863_vm1, %v2840_v45  ;;  %v3798_v58 = vadd.f32 %v2681_v57, %v4632_v26  ;;  %v3766_v59 = vpop.f32.mrb[14].mxu0 }
 0x1e4   : > { %v2813_v60 = vadd.f32 %v3797_v47, %v4641_v42  ;;  %v3799_v6 = vadd.f32 %v3766_v59, %v4634_v39  ;;  %v2684_v7 = vpop.f32.mrb[15].mxu0 }
 0x1e5   : > { %v2811_v8 = vadd.f32 %v3798_v58, %v4641_v42  ;;  %v3800_v9 = vadd.f32 %v2684_v7, %v4636_v40 }
 0x1e6   : > { %v2845_v21 = vmax.f32 %v2813_v60, 0.0  ;;  %v2814_v24 = vadd.f32 %v3799_v6, %v4641_v42 }
 0x1e7   : > { %v2843_v41 = vmax.f32 %v2811_v8, 0.0  ;;  %v2812_v56 = vadd.f32 %v3800_v9, %v4641_v42 }
 0x1e8   : > { %2878 = vst.msk [vmem:[%s4648_s16 + $0x70] sm:$0xff] %vm2863_vm1, %v2845_v21  ;;  %v2846_v26 = vmax.f32 %v2814_v24, 0.0  ;;  %v3633_v61 = vpop.f32.mrb[16].mxu1 }
 0x1e9   : > { %2876 = vst.msk [vmem:[%s4648_s16 + $0x60] sm:$0xff] %vm2863_vm1, %v2843_v41  ;;  %v2844_v62 = vmax.f32 %v2812_v56, 0.0  ;;  %v3769_v39 = vpop.f32.mrb[16].mxu0  ;;  %v1504_v63 = vpop.f32.mrb[17].mxu1 }
 0x1ea   : > { %2879 = vst.msk [vmem:[%s4648_s16 + $0x78] sm:$0xff] %vm2863_vm1, %v2846_v26  ;;  %v3801_v14 = vadd.f32 %v3769_v39, %v3633_v61  ;;  %v2697_v40 = vpop.f32.mrb[17].mxu0  ;;  %v3634_v16 = vpop.f32.mrb[18].mxu1 }
 0x1eb   : > { %2877 = vst.msk [vmem:[%s4648_s16 + $0x68] sm:$0xff] %vm2863_vm1, %v2844_v62  ;;  %v3802_v18 = vadd.f32 %v2697_v40, %v1504_v63  ;;  %v3770_v19 = vpop.f32.mrb[18].mxu0  ;;  %v1507_v33 = vpop.f32.mrb[19].mxu1 }
 0x1ec   : > { %v2817_v36 = vadd.f32 %v3801_v14, %v4641_v42  ;;  %v3803_v37 = vadd.f32 %v3770_v19, %v3634_v16  ;;  %v2700_v52 = vpop.f32.mrb[19].mxu0 }
 0x1ed   : > { %v2815_v53 = vadd.f32 %v3802_v18, %v4641_v42  ;;  %v3804_v54 = vadd.f32 %v2700_v52, %v1507_v33 }
 0x1ee   : > { %v2849_v55 = vmax.f32 %v2817_v36, 0.0  ;;  %v2818_v0 = vadd.f32 %v3803_v37, %v4641_v42 }
 0x1ef   : > { %v2847_v2 = vmax.f32 %v2815_v53, 0.0  ;;  %v2816_v3 = vadd.f32 %v3804_v54, %v4641_v42 }
 0x1f0   : > { %2882 = vst.msk [vmem:[%s4648_s16 + $0x90] sm:$0xff] %vm2863_vm1, %v2849_v55  ;;  %v2850_v4 = vmax.f32 %v2818_v0, 0.0  ;;  %v3637_v48 = vpop.f32.mrb[20].mxu1 }
 0x1f1   : > { %2880 = vst.msk [vmem:[%s4648_s16 + $0x80] sm:$0xff] %vm2863_vm1, %v2847_v2  ;;  %v2848_v5 = vmax.f32 %v2816_v3, 0.0  ;;  %v3773_v10 = vpop.f32.mrb[20].mxu0  ;;  %v1520_v11 = vpop.f32.mrb[21].mxu1 }
 0x1f2   : > { %2883 = vst.msk [vmem:[%s4648_s16 + $0x98] sm:$0xff] %vm2863_vm1, %v2850_v4  ;;  %v3805_v13 = vadd.f32 %v3773_v10, %v3637_v48  ;;  %v2713_v20 = vpop.f32.mrb[21].mxu0  ;;  %v3638_v25 = vpop.f32.mrb[22].mxu1 }
 0x1f3   : > { %2881 = vst.msk [vmem:[%s4648_s16 + $0x88] sm:$0xff] %vm2863_vm1, %v2848_v5  ;;  %v3806_v27 = vadd.f32 %v2713_v20, %v1520_v11  ;;  %v3774_v30 = vpop.f32.mrb[22].mxu0  ;;  %v1523_v31 = vpop.f32.mrb[23].mxu1 }
 0x1f4   : > { %v2821_v32 = vadd.f32 %v3805_v13, %v4641_v42  ;;  %v3807_v38 = vadd.f32 %v3774_v30, %v3638_v25  ;;  %v2716_v35 = vpop.f32.mrb[23].mxu0 }
 0x1f5   : > { %v2819_v43 = vadd.f32 %v3806_v27, %v4641_v42  ;;  %v3808_v49 = vadd.f32 %v2716_v35, %v1523_v31 }
 0x1f6   : > { %v2853_v50 = vmax.f32 %v2821_v32, 0.0  ;;  %v2822_v51 = vadd.f32 %v3807_v38, %v4641_v42 }
 0x1f7   : > { %v2851_v17 = vmax.f32 %v2819_v43, 0.0  ;;  %v2820_v1 = vadd.f32 %v3808_v49, %v4641_v42 }
 0x1f8   : > { %2886 = vst.msk [vmem:[%s4648_s16 + $0xb0] sm:$0xff] %vm2863_vm1, %v2853_v50  ;;  %v2854_v12 = vmax.f32 %v2822_v51, 0.0  ;;  %v3641_v15 = vpop.f32.mrb[24].mxu1 }
 0x1f9   : > { %2884 = vst.msk [vmem:[%s4648_s16 + $0xa0] sm:$0xff] %vm2863_vm1, %v2851_v17  ;;  %v2852_v22 = vmax.f32 %v2820_v1, 0.0  ;;  %v3777_v23 = vpop.f32.mrb[24].mxu0  ;;  %v1536_v28 = vpop.f32.mrb[25].mxu1 }
 0x1fa   : > { %2887 = vst.msk [vmem:[%s4648_s16 + $0xb8] sm:$0xff] %vm2863_vm1, %v2854_v12  ;;  %v3809_v29 = vadd.f32 %v3777_v23, %v3641_v15  ;;  %v2729_v34 = vpop.f32.mrb[25].mxu0  ;;  %v3642_v44 = vpop.f32.mrb[26].mxu1 }
 0x1fb   : > { %2885 = vst.msk [vmem:[%s4648_s16 + $0xa8] sm:$0xff] %vm2863_vm1, %v2852_v22  ;;  %v3810_v45 = vadd.f32 %v2729_v34, %v1536_v28  ;;  %v3778_v46 = vpop.f32.mrb[26].mxu0  ;;  %v1539_v47 = vpop.f32.mrb[27].mxu1 }
 0x1fc   : > { %v2825_v57 = vadd.f32 %v3809_v29, %v4641_v42  ;;  %v3811_v58 = vadd.f32 %v3778_v46, %v3642_v44  ;;  %v2732_v59 = vpop.f32.mrb[27].mxu0 }
 0x1fd   : > { %v2823_v60 = vadd.f32 %v3810_v45, %v4641_v42  ;;  %v3812_v6 = vadd.f32 %v2732_v59, %v1539_v47 }
 0x1fe   : > { %v2857_v7 = vmax.f32 %v2825_v57, 0.0  ;;  %v2826_v8 = vadd.f32 %v3811_v58, %v4641_v42 }
 0x1ff   : > { %v2855_v9 = vmax.f32 %v2823_v60, 0.0  ;;  %v2824_v21 = vadd.f32 %v3812_v6, %v4641_v42 }
 0x200   : > { %2890 = vst.msk [vmem:[%s4648_s16 + $0xd0] sm:$0xff] %vm2863_vm1, %v2857_v7  ;;  %v2858_v24 = vmax.f32 %v2826_v8, 0.0  ;;  %v3645_v41 = vpop.f32.mrb[28].mxu1 }
 0x201   : > { %2888 = vst.msk [vmem:[%s4648_s16 + $0xc0] sm:$0xff] %vm2863_vm1, %v2855_v9  ;;  %v2856_v56 = vmax.f32 %v2824_v21, 0.0  ;;  %v3781_v26 = vpop.f32.mrb[28].mxu0  ;;  %v1552_v61 = vpop.f32.mrb[29].mxu1 }
 0x202   : > { %2891 = vst.msk [vmem:[%s4648_s16 + $0xd8] sm:$0xff] %vm2863_vm1, %v2858_v24  ;;  %v3813_v62 = vadd.f32 %v3781_v26, %v3645_v41  ;;  %v2745_v39 = vpop.f32.mrb[29].mxu0  ;;  %v3646_v63 = vpop.f32.mrb[30].mxu1 }
 0x203   : > { %2889 = vst.msk [vmem:[%s4648_s16 + $0xc8] sm:$0xff] %vm2863_vm1, %v2856_v56  ;;  %v3814_v14 = vadd.f32 %v2745_v39, %v1552_v61  ;;  %v3782_v40 = vpop.f32.mrb[30].mxu0  ;;  %v1555_v16 = vpop.f32.mrb[31].mxu1 }
 0x204   : > { %v2829_v18 = vadd.f32 %v3813_v62, %v4641_v42  ;;  %v3815_v19 = vadd.f32 %v3782_v40, %v3646_v63  ;;  %v2748_v33 = vpop.f32.mrb[31].mxu0 }
 0x205   : > { %v2827_v36 = vadd.f32 %v3814_v14, %v4641_v42  ;;  %v3816_v37 = vadd.f32 %v2748_v33, %v1555_v16 }
 0x206   : > { %v2861_v52 = vmax.f32 %v2829_v18, 0.0  ;;  %v2830_v53 = vadd.f32 %v3815_v19, %v4641_v42 }
 0x207   : > { %v2859_v54 = vmax.f32 %v2827_v36, 0.0  ;;  %v2828_v55 = vadd.f32 %v3816_v37, %v4641_v42 }
 0x208   : > { %2894 = vst.msk [vmem:[%s4648_s16 + $0xf0] sm:$0xff] %vm2863_vm1, %v2861_v52  ;;  %v2862_v0 = vmax.f32 %v2830_v53, 0.0 }
 0x209   : > { %2892 = vst.msk [vmem:[%s4648_s16 + $0xe0] sm:$0xff] %vm2863_vm1, %v2859_v54  ;;  %v2860_v2 = vmax.f32 %v2828_v55, 0.0 }
 0x20a   : > { %2895 = vst.msk [vmem:[%s4648_s16 + $0xf8] sm:$0xff] %vm2863_vm1, %v2862_v0 }
 0x20b   : > { %2893 = vst.msk [vmem:[%s4648_s16 + $0xe8] sm:$0xff] %vm2863_vm1, %v2860_v2 }
 0x20c PF: > { %s13_s12 = sadd.s32 1, %s4065_s12  }
 0x20d   : > { %p10_p4 = scmp.ge.s32.totalorder %s13_s12, 4  }
 0x20f   :  { %12 = sbr.rel (!%p10_p4) target bundleno = 1 (0x1), region = 72 }

// kernel: net_10_forward.9
= control target key start
LH: loop header
LB: loop body
LE: loop exit
PB: predicated region body
PF: predicated region fallthrough
CT: control target
= control target key end

     0   :  { %s1972_s12 = smov 0   ;;  %s2244_s0 = inlined_call_operand.vmem [shape: f32[2,10,10,64], index: 0, kind: input, shape index: {}]   ;;  %s2245_s1 = inlined_call_operand.vmem [shape: bf16[9,64,96], index: 1, kind: input, shape index: {}]   ;;  %s2246_s2 = inlined_call_operand.vmem [shape: f32[1,96], index: 2, kind: input, shape index: {}]   ;;  %s2247_s3 = inlined_call_operand.vmem [shape: f32[2,64,96], index: 3, kind: output, shape index: {}]  }
   0x1 LB: > { %s1415_s13 = sadd.s32 4294967295, %s1950_s12   ;;  %p1419_p0 = scmp.ge.s32.totalorder %s1950_s12, 1  ;;  %s1950_s12 = sphi %s1972_s12, %s13_s12  }
   0x2   : > { %p137_p1 = scmp.lt.s32.totalorder %s1950_s12, 3 }
   0x4   : > { %p138_p2 = pnand %p1419_p0, %p137_p1 }
   0x5   : > { %v1908_v0 = vld [vmem:[%s2245_s1 + $0x20] sm:$0xff] (!%p138_p2)   ;;  %p161_p3 = scmp.lt.s32.totalorder (!%p138_p2), %s1415_s13, 1  ;;  %v1910_v2 = vld [vmem:[%s2245_s1 + $0x28] sm:$0xff] (!%p138_p2)   ;;  %v1912_v4 = vld [vmem:[%s2245_s1 + $0x30] sm:$0xff] (!%p138_p2)   ;;  %vm237_vm0 = vcmask (!%p138_p2), 523264   ;;  %vm1351_vm1 = vcmask (!%p138_p2), 785408  }
   0x6   : > { %141 = sbr.rel (%p138_p2) target bundleno = 309 (0x135), region = 32  ;;  %v1909_v1 = vld [vmem:[%s2245_s1 + $0x80] sm:$0xff] (!%p138_p2)   ;;  %1683 = vmatprep.subr.bf16.mxu1 (!%p138_p2), %v1908_v0  ;;  %v1911_v3 = vld [vmem:[%s2245_s1 + $0x88] sm:$0xff] (!%p138_p2)   ;;  %v1913_v5 = vld [vmem:[%s2245_s1 + $0x90] sm:$0xff] (!%p138_p2)  }
   0x7   : > { %1747 = vmatprep.subr.bf16.mxu0 (!%p138_p2), %v1909_v1  ;;  %1684 = vmatpush3.bf16.msra.mxu1 (!%p138_p2), %v1908_v0  ;;  %v1914_v6 = vld [vmem:[%s2245_s1 + $0x38] sm:$0xff] (!%p138_p2)   ;;  %v1916_v14 = vld [vmem:[%s2245_s1] sm:$0xff] (!%p138_p2)   ;;  %v1918_v21 = vld [vmem:[%s2245_s1 + $0x8] sm:$0xff] (!%p138_p2)  }
   0x8   : > { %1748 = vmatpush3.bf16.msra.mxu0 (!%p138_p2), %v1909_v1  ;;  %1685 = vmatprep.subr.bf16.mxu1 (!%p138_p2), %v1910_v2  ;;  %v1915_v10 = vld [vmem:[%s2245_s1 + $0x98] sm:$0xff] (!%p138_p2)   ;;  %v1917_v16 = vld [vmem:[%s2245_s1 + $0xa0] sm:$0xff] (!%p138_p2)   ;;  %v1919_v22 = vld [vmem:[%s2245_s1 + $0xa8] sm:$0xff] (!%p138_p2)  }
   0x9   : > { %1749 = vmatprep.subr.bf16.mxu0 (!%p138_p2), %v1911_v3  ;;  %v1920_v26 = vld [vmem:[%s2245_s1 + $0x10] sm:$0xff] (!%p138_p2)   ;;  %v1922_v35 = vld [vmem:[%s2245_s1 + $0x18] sm:$0xff] (!%p138_p2)   ;;  %v1924_v41 = vld [vmem:[%s2245_s1 + $0x40] sm:$0xff] (!%p138_p2)  }
   0xa   : > { %v1921_v28 = vld [vmem:[%s2245_s1 + $0xb0] sm:$0xff] (!%p138_p2)   ;;  %v1923_v36 = vld [vmem:[%s2245_s1 + $0xb8] sm:$0xff] (!%p138_p2)   ;;  %v1925_v44 = vld [vmem:[%s2245_s1 + $0xc0] sm:$0xff] (!%p138_p2)  }
   0xb   : > { %1686 = vmatpush3.bf16.msra.mxu1 (!%p138_p2), %v1910_v2  ;;  %v1926_v51 = vld [vmem:[%s2245_s1 + $0x48] sm:$0xff] (!%p138_p2)   ;;  %v1928_v57 = vld [vmem:[%s2245_s1 + $0x50] sm:$0xff] (!%p138_p2)   ;;  %v1930_v0 = vld [vmem:[%s2245_s1 + $0x58] sm:$0xff] (!%p138_p2)  }
   0xc   : > { %1750 = vmatpush3.bf16.msra.mxu0 (!%p138_p2), %v1911_v3  ;;  %1687 = vmatprep.subr.bf16.mxu1 (!%p138_p2), %v1912_v4  ;;  %v1927_v52 = vld [vmem:[%s2245_s1 + $0xc8] sm:$0xff] (!%p138_p2)   ;;  %v1929_v60 = vld [vmem:[%s2245_s1 + $0xd0] sm:$0xff] (!%p138_p2)   ;;  %v1931_v1 = vld [vmem:[%s2245_s1 + $0xd8] sm:$0xff] (!%p138_p2)  }
   0xd   : > { %s2249_s13 = smov (!%p161_p3, %s1415_s13), 1  ;;  %1751 = vmatprep.subr.bf16.mxu0 %v1913_v5  ;;  %v1932_v3 = vld [vmem:[%s2245_s1 + $0x60] sm:$0xff]  }
   0xe   : > { %s1899_s24 = smul.u32 160, %s2249_s13  ;;  %s1610_s18 = sshll.u32 %s2249_s13, 6 }
   0xf   : > { %1688 = vmatpush3.bf16.msra.mxu1 %v1912_v4  ;;  %v1933_v4 = vld [vmem:[%s2245_s1 + $0xe0] sm:$0xff]   ;;  %s170_s21 = scalar_lea.vmem %s2247_s3, %s1610_s18 }
  0x10   : > { %s2004_s29 = scalar_lea.vmem %s2244_s0, %s1899_s24  ;;  %1752 = vmatpush3.bf16.msra.mxu0 %v1913_v5  ;;  %1689 = vmatprep.subr.bf16.mxu1 %v1914_v6 }
  0x11   : > { %v192_v7 = vld [vmem:[%s2004_s29 + $0x1] sm:$0xff]  ;;  %v193_v8 = vld [vmem:[%s2004_s29 + $0x11] sm:$0xff]  ;;  %1753 = vmatprep.subr.bf16.mxu0 %v1915_v10 }
  0x12   : > { %v1488_v9 = vld [vmem:[%s2004_s29 + $0x21] sm:$0xff]  ;;  %v200_v11 = vpack.c.bf16 %v193_v8, %v192_v7  ;;  %v195_v13 = vld [vmem:[%s2004_s29 + $0x31] sm:$0xff] }
  0x13   : > { %v685_v12 = vpack.c.bf16 %v1488_v9, %v193_v8  ;;  %v1490_v15 = vld [vmem:[%s2004_s29 + $0x41] sm:$0xff]  ;;  %v2025_v17 = vpack.c.bf16 %v195_v13, %v1488_v9  ;;  %v197_v18 = vld [vmem:[%s2004_s29 + $0x51] sm:$0xff]  ;;  %1690 = vmatpush3.bf16.msra.mxu1 %v1914_v6 }
  0x14   : > { %1691 = vmatprep.mubr.msk.bf16.mxu1 %vm237_vm0, %v200_v11  ;;  %v686_v19 = vpack.c.bf16 %v1490_v15, %v195_v13  ;;  %v1492_v20 = vld [vmem:[%s2004_s29 + $0x61] sm:$0xff]  ;;  %1754 = vmatpush3.bf16.msra.mxu0 %v1915_v10  ;;  %v2035_v23 = vpack.c.bf16 %v197_v18, %v1490_v15  ;;  %v199_v25 = vld [vmem:[%s2004_s29 + $0x71] sm:$0xff] }
  0x15   : > { %1755 = vmatprep.mubr.msk.bf16.mxu0 %vm237_vm0, %v685_v12  ;;  %1699 = vmatprep.subr.bf16.mxu1 %v1916_v14  ;;  %v687_v24 = vpack.c.bf16 %v1492_v20, %v197_v18  ;;  %v2045_v27 = vld [vmem:[%s2004_s29 + $0x81] sm:$0xff]  ;;  %v2054_v30 = vpack.c.bf16 %v199_v25, %v1492_v20  ;;  %v2057_v31 = vld [vmem:[%s2004_s29 + $0x10] sm:$0xff]  ;;  %v1938_v15 = vld [vmem:[%s2245_s1 + $0x78] sm:$0xff]  }
  0x16   : > { %1763 = vmatprep.subr.bf16.mxu0 %v1917_v16  ;;  %1692 = vmatmul.mubr.msk.bf16.vlgmr.msra.gmra.mrb[0].mxu1 %vm237_vm0, %v2025_v17  ;;  %v172_v29 = vld [vmem:[%s2004_s29] sm:$0xff]  ;;  %v2060_v32 = vld [vmem:[%s2004_s29 + $0x12] sm:$0xff]  ;;  %v688_v33 = vpack.c.bf16 %v2045_v27, %v199_v25  ;;  %v1934_v6 = vld [vmem:[%s2245_s1 + $0x68] sm:$0xff]  }
  0x17   : > { %1756 = vmatmul.mubr.msk.bf16.vlgmr.msra.gmra.mrb[0].mxu0 %vm237_vm0, %v686_v19  ;;  %1700 = vmatpush3.bf16.msra.mxu1 %v1916_v14  ;;  %v2064_v34 = vld [vmem:[%s2004_s29 + $0x22] sm:$0xff]  ;;  %v180_v37 = vpack.c.bf16 %v2057_v31, %v172_v29  ;;  %v2081_v40 = vld [vmem:[%s2004_s29 + $0x30] sm:$0xff] }
  0x18   : > { %1764 = vmatpush3.bf16.msra.mxu0 %v1917_v16  ;;  %1701 = vmatprep.subr.bf16.mxu1 %v1918_v21  ;;  %v815_v38 = vpack.c.bf16 %v2064_v34, %v2060_v32  ;;  %v2078_v39 = vld [vmem:[%s2004_s29 + $0x20] sm:$0xff]  ;;  %v1513_v42 = vld [vmem:[%s2004_s29 + $0x32] sm:$0xff]  ;;  %v1935_v7 = vld [vmem:[%s2245_s1 + $0xe8] sm:$0xff]  }
  0x19   : > { %1765 = vmatprep.subr.bf16.mxu0 %v1919_v22  ;;  %1695 = vmatprep.mubr.msk.bf16.mxu1 %vm237_vm0, %v2035_v23  ;;  %v1514_v43 = vld [vmem:[%s2004_s29 + $0x42] sm:$0xff]  ;;  %v2097_v46 = vld [vmem:[%s2004_s29 + $0x50] sm:$0xff]  ;;  %v181_v47 = vpack.c.bf16 %v2081_v40, %v2078_v39  ;;  %v2154_v5 = vpack.c.bf16 %v1513_v42, %v2064_v34  ;;  %v1939_v16 = vld [vmem:[%s2245_s1 + $0xf8] sm:$0xff]   ;;  %v555_v18 = vpack.c.bf16 %v2078_v39, %v2057_v31 }
  0x1a   : > { %1759 = vmatprep.mubr.msk.bf16.mxu0 %vm237_vm0, %v687_v24  ;;  %v2093_v45 = vld [vmem:[%s2004_s29 + $0x40] sm:$0xff]  ;;  %v1515_v48 = vld [vmem:[%s2004_s29 + $0x52] sm:$0xff]  ;;  %v816_v49 = vpack.c.bf16 %v1514_v43, %v1513_v42 }
  0x1b   : > { %1702 = vmatpush3.bf16.msra.mxu1 %v1918_v21  ;;  %v1516_v50 = vld [vmem:[%s2004_s29 + $0x62] sm:$0xff]  ;;  %v182_v53 = vpack.c.bf16 %v2097_v46, %v2093_v45  ;;  %v2116_v55 = vld [vmem:[%s2004_s29 + $0x70] sm:$0xff]  ;;  %v2162_v8 = vpack.c.bf16 %v1515_v48, %v1514_v43  ;;  %v556_v20 = vpack.c.bf16 %v2093_v45, %v2081_v40  ;;  %v1607_v45 = vld [vmem:[%s2246_s2] ss:$0 sm:$0xff] }
  0x1c   : > { %1766 = vmatpush3.bf16.msra.mxu0 %v1919_v22  ;;  %1703 = vmatprep.subr.bf16.mxu1 %v1920_v26  ;;  %v2113_v54 = vld [vmem:[%s2004_s29 + $0x60] sm:$0xff]  ;;  %v817_v56 = vpack.c.bf16 %v1516_v50, %v1515_v48  ;;  %v1517_v58 = vld [vmem:[%s2004_s29 + $0x72] sm:$0xff]  ;;  %v1941_v21 = vld [vmem:[%s2245_s1 + $0x108] sm:$0xff]  }
  0x1d   : > { %1767 = vmatprep.subr.bf16.mxu0 %v1921_v28  ;;  %v2125_v59 = vld [vmem:[%s2004_s29 + $0x82] sm:$0xff]  ;;  %v183_v61 = vpack.c.bf16 %v2116_v55, %v2113_v54  ;;  %v1936_v9 = vld [vmem:[%s2245_s1 + $0x70] sm:$0xff]   ;;  %v427_v13 = vpack.c.bf16 %v1517_v58, %v1516_v50  ;;  %v557_v22 = vpack.c.bf16 %v2113_v54, %v2097_v46 }
  0x1e   : > { %1696 = vmatmul.mubr.msk.bf16.gmra.mrb[4].mxu1 %vm237_vm0, %v2054_v30  ;;  %v416_v62 = vld [vmem:[%s2004_s29 + $0x2] sm:$0xff]  ;;  %v818_v63 = vpack.c.bf16 %v2125_v59, %v1517_v58  ;;  %v1542_v11 = vld [vmem:[%s2004_s29 + $0x90] sm:$0xff] }
  0x1f   : > { %1760 = vmatmul.mubr.msk.bf16.gmra.mrb[4].mxu0 %vm237_vm0, %v688_v33  ;;  %1704 = vmatpush3.bf16.msra.mxu1 %v1920_v26  ;;  %v424_v2 = vpack.c.bf16 %v2060_v32, %v416_v62  ;;  %v1541_v10 = vld [vmem:[%s2004_s29 + $0x80] sm:$0xff]  ;;  %v1937_v12 = vld [vmem:[%s2245_s1 + $0xf0] sm:$0xff]   ;;  %v1943_v26 = vld [vmem:[%s2245_s1 + $0x118] sm:$0xff]  }
  0x20   : > { %1768 = vmatpush3.bf16.msra.mxu0 %v1921_v28  ;;  %1705 = vmatprep.subr.bf16.mxu1 %v1922_v35  ;;  %v949_v14 = vpack.c.bf16 %v1542_v11, %v1541_v10  ;;  %v1940_v19 = vld [vmem:[%s2245_s1 + $0x100] sm:$0xff]   ;;  %v1942_v24 = vld [vmem:[%s2245_s1 + $0x110] sm:$0xff]   ;;  %v558_v25 = vpack.c.bf16 %v1541_v10, %v2116_v55 }
  0x21   : > { %1769 = vmatprep.subr.bf16.mxu0 %v1923_v36  ;;  %1707 = vmatprep.mubr.msk.bf16.mxu1 %vm237_vm0, %v180_v37  ;;  %v1590_v28 = vld [vmem:[%s2004_s29 + $0x92] sm:$0xff] }
  0x22   : > { %1771 = vmatprep.mubr.msk.bf16.mxu0 %vm237_vm0, %v815_v38 }
  0x23   : > { %1706 = vmatpush3.bf16.msra.mxu1 %v1922_v35 }
  0x24   : > { %1770 = vmatpush3.bf16.msra.mxu0 %v1923_v36  ;;  %1715 = vmatprep.subr.bf16.mxu1 %v1924_v41 }
  0x25   : > { %1779 = vmatprep.subr.bf16.mxu0 %v1925_v44 }
  0x26   : > { %1708 = vmatmul.mubr.msk.bf16.vlgmr.msra.gmra.mrb[0].mxu1 %vm237_vm0, %v181_v47 }
  0x27   : > { %1772 = vmatmul.mubr.msk.bf16.vlgmr.msra.gmra.mrb[0].mxu0 %vm237_vm0, %v816_v49  ;;  %1716 = vmatpush3.bf16.msra.mxu1 %v1924_v41 }
  0x28   : > { %1780 = vmatpush3.bf16.msra.mxu0 %v1925_v44  ;;  %1717 = vmatprep.subr.bf16.mxu1 %v1926_v51 }
  0x29   : > { %1781 = vmatprep.subr.bf16.mxu0 %v1927_v52  ;;  %1711 = vmatprep.mubr.msk.bf16.mxu1 %vm237_vm0, %v182_v53 }
  0x2a   : > { %1775 = vmatprep.mubr.msk.bf16.mxu0 %vm237_vm0, %v817_v56 }
  0x2b   : > { %1718 = vmatpush3.bf16.msra.mxu1 %v1926_v51 }
  0x2c   : > { %1782 = vmatpush3.bf16.msra.mxu0 %v1927_v52  ;;  %1719 = vmatprep.subr.bf16.mxu1 %v1928_v57 }
  0x2d   : > { %1783 = vmatprep.subr.bf16.mxu0 %v1929_v60 }
  0x2e   : > { %1712 = vmatmul.mubr.msk.bf16.gmra.mrb[4].mxu1 %vm237_vm0, %v183_v61 }
  0x2f   : > { %1776 = vmatmul.mubr.msk.bf16.gmra.mrb[4].mxu0 %vm237_vm0, %v818_v63  ;;  %1720 = vmatpush3.bf16.msra.mxu1 %v1928_v57 }
  0x30   : > { %1784 = vmatpush3.bf16.msra.mxu0 %v1929_v60  ;;  %1721 = vmatprep.subr.bf16.mxu1 %v1930_v0 }
  0x31   : > { %1785 = vmatprep.subr.bf16.mxu0 %v1931_v1  ;;  %1723 = vmatprep.mubr.msk.bf16.mxu1 %vm237_vm0, %v424_v2 }
  0x32   : > { %1787 = vmatprep.mubr.msk.bf16.mxu0 %vm237_vm0, %v181_v47 }
  0x33   : > { %1722 = vmatpush3.bf16.msra.mxu1 %v1930_v0 }
  0x34   : > { %1786 = vmatpush3.bf16.msra.mxu0 %v1931_v1  ;;  %1731 = vmatprep.subr.bf16.mxu1 %v1932_v3 }
  0x35   : > { %1795 = vmatprep.subr.bf16.mxu0 %v1933_v4 }
  0x36   : > { %1724 = vmatmul.mubr.msk.bf16.vlgmr.msra.gmra.mrb[0].mxu1 %vm237_vm0, %v2154_v5 }
  0x37   : > { %1788 = vmatmul.mubr.msk.bf16.vlgmr.msra.gmra.mrb[0].mxu0 %vm237_vm0, %v182_v53  ;;  %1732 = vmatpush3.bf16.msra.mxu1 %v1932_v3 }
  0x38   : > { %1796 = vmatpush3.bf16.msra.mxu0 %v1933_v4  ;;  %1733 = vmatprep.subr.bf16.mxu1 %v1934_v6 }
  0x39   : > { %1797 = vmatprep.subr.bf16.mxu0 %v1935_v7  ;;  %1727 = vmatprep.mubr.msk.bf16.mxu1 %vm237_vm0, %v2162_v8 }
  0x3a   : > { %1791 = vmatprep.mubr.msk.bf16.mxu0 %vm237_vm0, %v183_v61 }
  0x3b   : > { %1734 = vmatpush3.bf16.msra.mxu1 %v1934_v6 }
  0x3c   : > { %1798 = vmatpush3.bf16.msra.mxu0 %v1935_v7  ;;  %1735 = vmatprep.subr.bf16.mxu1 %v1936_v9 }
  0x3d   : > { %1799 = vmatprep.subr.bf16.mxu0 %v1937_v12 }
  0x3e   : > { %1728 = vmatmul.mubr.msk.bf16.gmra.mrb[4].mxu1 %vm237_vm0, %v427_v13 }
  0x3f   : > { %1792 = vmatmul.mubr.msk.bf16.gmra.mrb[4].mxu0 %vm237_vm0, %v949_v14  ;;  %1736 = vmatpush3.bf16.msra.mxu1 %v1936_v9 }
  0x40   : > { %1800 = vmatpush3.bf16.msra.mxu0 %v1937_v12  ;;  %1737 = vmatprep.subr.bf16.mxu1 %v1938_v15 }
  0x41   : > { %1801 = vmatprep.subr.bf16.mxu0 %v1939_v16  ;;  %1739 = vmatprep.mubr.msk.bf16.mxu1 %vm237_vm0, %v555_v18 }
  0x42   : > { %1803 = vmatprep.mubr.msk.bf16.mxu0 %vm237_vm0, %v2025_v17  ;;  %v1566_v17 = vld [vmem:[%s2004_s29 + $0x91] sm:$0xff] }
  0x43   : > { %1738 = vmatpush3.bf16.msra.mxu1 %v1938_v15 }
  0x44   : > { %1802 = vmatpush3.bf16.msra.mxu0 %v1939_v16  ;;  %1827 = vmatprep.subr.bf16.mxu1 %v1940_v19 }
  0x45   : > { %1811 = vmatprep.subr.bf16.mxu0 %v1940_v19 }
  0x46   : > { %1740 = vmatmul.mubr.msk.bf16.vlgmr.msra.gmra.mrb[0].mxu1 %vm237_vm0, %v556_v20 }
  0x47   : > { %1804 = vmatmul.mubr.msk.bf16.vlgmr.msra.gmra.mrb[0].mxu0 %vm237_vm0, %v2035_v23  ;;  %1831 = vmatpush3.bf16.msra.mxu1 %v1940_v19  ;;  %v1079_v23 = vpack.c.bf16 %v1566_v17, %v2045_v27  ;;  %v1209_v27 = vpack.c.bf16 %v1590_v28, %v2125_v59 }
  0x48   : > { %1812 = vmatpush3.bf16.msra.mxu0 %v1940_v19  ;;  %1828 = vmatprep.subr.bf16.mxu1 %v1941_v21 }
  0x49   : > { %1813 = vmatprep.subr.bf16.mxu0 %v1941_v21  ;;  %1743 = vmatprep.mubr.msk.bf16.mxu1 %vm237_vm0, %v557_v22 }
  0x4a   : > { %1807 = vmatprep.mubr.msk.bf16.mxu0 %vm237_vm0, %v2054_v30 }
  0x4b   : > { %1832 = vmatpush3.bf16.msra.mxu1 %v1941_v21 }
  0x4c   : > { %1814 = vmatpush3.bf16.msra.mxu0 %v1941_v21  ;;  %1829 = vmatprep.subr.bf16.mxu1 %v1942_v24 }
  0x4d   : > { %1815 = vmatprep.subr.bf16.mxu0 %v1942_v24 }
  0x4e   : > { %1744 = vmatmul.mubr.msk.bf16.gmra.mrb[4].mxu1 %vm237_vm0, %v558_v25 }
  0x4f   : > { %1808 = vmatmul.mubr.msk.bf16.gmra.mrb[4].mxu0 %vm237_vm0, %v1079_v23  ;;  %1833 = vmatpush3.bf16.msra.mxu1 %v1942_v24 }
  0x50   : > { %1816 = vmatpush3.bf16.msra.mxu0 %v1942_v24  ;;  %1830 = vmatprep.subr.bf16.mxu1 %v1943_v26 }
  0x51   : > { %1817 = vmatprep.subr.bf16.mxu0 %v1943_v26  ;;  %1819 = vmatprep.mubr.msk.bf16.mxu0 %vm237_vm0, %v2154_v5 }
  0x52   : > { %1823 = vmatprep.mubr.msk.bf16.mxu1 %vm237_vm0, %v427_v13 }
  0x53   : > { %1834 = vmatpush3.bf16.msra.mxu1 %v1943_v26 }
  0x54   : > { %1818 = vmatpush3.bf16.msra.mxu0 %v1943_v26 }
  0x56   : > { %1824 = vmatmul.mubr.msk.bf16.vlgmr.msra.gmra.mrb[8].mxu1 %vm237_vm0, %v1209_v27 }
  0x57   : > { %1820 = vmatmul.mubr.msk.bf16.vlgmr.msra.gmra.mrb[0].mxu0 %vm237_vm0, %v2162_v8 }
 0x119   : > { %v1741_v29 = vpop.f32.mrb[0].mxu1 }
 0x11a   : > { %v638_v30 = vpop.f32.mrb[1].mxu1 }
 0x11b   : > { %v1742_v31 = vpop.f32.mrb[2].mxu1 }
 0x11c   : > { %v641_v32 = vpop.f32.mrb[3].mxu1 }
 0x121   : > { %v1745_v33 = vpop.f32.mrb[4].mxu1 }
 0x122   : > { %v1809_v34 = vpop.f32.mrb[4].mxu0  ;;  %v654_v35 = vpop.f32.mrb[5].mxu1 }
 0x123   : > { %v1839_v36 = vadd.f32 %v1809_v34, %v1745_v33  ;;  %v1175_v37 = vpop.f32.mrb[5].mxu0  ;;  %v1746_v38 = vpop.f32.mrb[6].mxu1 }
 0x124   : > { %v1841_v39 = vadd.f32 %v1175_v37, %v654_v35  ;;  %v1810_v40 = vpop.f32.mrb[6].mxu0  ;;  %v657_v41 = vpop.f32.mrb[7].mxu1 }
 0x125   : > { %v1843_v42 = vadd.f32 %v1810_v40, %v1746_v38  ;;  %v1178_v43 = vpop.f32.mrb[7].mxu0 }
 0x126   : > { %v1845_v44 = vadd.f32 %v1178_v43, %v657_v41 }
 0x129   : > { %v1825_v46 = vpop.f32.mrb[8].mxu1 }
 0x12a   : > { %v1821_v47 = vpop.f32.mrb[0].mxu0  ;;  %v1840_v48 = vadd.f32 %v1839_v36, %v1825_v46  ;;  %v1305_v49 = vpop.f32.mrb[9].mxu1 }
 0x12b   : > { %v1835_v50 = vadd.f32 %v1821_v47, %v1741_v29  ;;  %v1289_v51 = vpop.f32.mrb[1].mxu0  ;;  %v1842_v52 = vadd.f32 %v1841_v39, %v1305_v49  ;;  %v1826_v53 = vpop.f32.mrb[10].mxu1 }
 0x12c   : > { %v1341_v54 = vadd.f32 %v1840_v48, %v1607_v45  ;;  %v1836_v55 = vadd.f32 %v1289_v51, %v638_v30  ;;  %v1822_v56 = vpop.f32.mrb[2].mxu0  ;;  %v1844_v57 = vadd.f32 %v1843_v42, %v1826_v53  ;;  %v1308_v58 = vpop.f32.mrb[11].mxu1 }
 0x12d   : > { %v1337_v59 = vadd.f32 %v1835_v50, %v1607_v45  ;;  %v1339_v60 = vadd.f32 %v1842_v52, %v1607_v45  ;;  %v1837_v61 = vadd.f32 %v1822_v56, %v1742_v31  ;;  %v1292_v62 = vpop.f32.mrb[3].mxu0  ;;  %v1846_v63 = vadd.f32 %v1845_v44, %v1308_v58 }
 0x12e   : > { %v1349_v0 = vmax.f32 %v1341_v54, 0.0  ;;  %v1335_v1 = vadd.f32 %v1836_v55, %v1607_v45  ;;  %v1342_v2 = vadd.f32 %v1844_v57, %v1607_v45  ;;  %v1838_v3 = vadd.f32 %v1292_v62, %v641_v32 }
 0x12f   : > { %v1345_v4 = vmax.f32 %v1337_v59, 0.0  ;;  %v1347_v5 = vmax.f32 %v1339_v60, 0.0  ;;  %v1338_v6 = vadd.f32 %v1837_v61, %v1607_v45  ;;  %v1340_v7 = vadd.f32 %v1846_v63, %v1607_v45 }
 0x130   : > { %1358 = vst.msk [vmem:[%s170_s21 + $0x30] sm:$0xff] %vm1351_vm1, %v1349_v0  ;;  %v1343_v8 = vmax.f32 %v1335_v1, 0.0  ;;  %v1350_v9 = vmax.f32 %v1342_v2, 0.0  ;;  %v1336_v10 = vadd.f32 %v1838_v3, %v1607_v45 }
 0x131   : > { %1354 = vst.msk [vmem:[%s170_s21 + $0x10] sm:$0xff] %vm1351_vm1, %v1345_v4  ;;  %1356 = vst.msk [vmem:[%s170_s21 + $0x20] sm:$0xff] %vm1351_vm1, %v1347_v5  ;;  %v1346_v11 = vmax.f32 %v1338_v6, 0.0  ;;  %v1348_v12 = vmax.f32 %v1340_v7, 0.0 }
 0x132   : > { %1352 = vst.msk [vmem:[%s170_s21] sm:$0xff] %vm1351_vm1, %v1343_v8  ;;  %1359 = vst.msk [vmem:[%s170_s21 + $0x38] sm:$0xff] %vm1351_vm1, %v1350_v9  ;;  %v1344_v13 = vmax.f32 %v1336_v10, 0.0 }
 0x133   : > { %1355 = vst.msk [vmem:[%s170_s21 + $0x18] sm:$0xff] %vm1351_vm1, %v1346_v11  ;;  %1357 = vst.msk [vmem:[%s170_s21 + $0x28] sm:$0xff] %vm1351_vm1, %v1348_v12 }
 0x134   : > { %1353 = vst.msk [vmem:[%s170_s21 + $0x8] sm:$0xff] %vm1351_vm1, %v1344_v13 }
 0x135 PF: > { %s13_s12 = sadd.s32 1, %s1950_s12  }
 0x136   : > { %p10_p4 = scmp.ge.s32.totalorder %s13_s12, 4  }
 0x138   :  { %12 = sbr.rel (!%p10_p4) target bundleno = 1 (0x1), region = 72 }

// kernel: net_10_forward.8
= control target key start
LH: loop header
LB: loop body
LE: loop exit
PB: predicated region body
PF: predicated region fallthrough
CT: control target
= control target key end

     0   :  { %s4222_s12 = smov 0   ;;  %s4916_s0 = inlined_call_operand.vmem [shape: f32[2,18,18,32], index: 0, kind: input, shape index: {}]   ;;  %s4917_s1 = inlined_call_operand.vmem [shape: bf16[9,32,64], index: 1, kind: input, shape index: {}]   ;;  %s4918_s2 = inlined_call_operand.vmem [shape: f32[1,64], index: 2, kind: input, shape index: {}]   ;;  %s4919_s3 = inlined_call_operand.vmem [shape: f32[2,256,64], index: 3, kind: output, shape index: {}]  }
   0x1 LB: > { %s3023_s13 = sadd.s32 4294967295, %s4200_s12   ;;  %p3027_p0 = scmp.ge.s32.totalorder %s4200_s12, 1  ;;  %s4200_s12 = sphi %s4222_s12, %s13_s12  }
   0x2   : > { %p137_p1 = scmp.lt.s32.totalorder %s4200_s12, 3 }
   0x4   : > { %p138_p2 = pnand %p3027_p0, %p137_p1 }
   0x5   : > { %v4176_v0 = vld [vmem:[%s4917_s1 + $0x10] sm:$0xff] (!%p138_p2)   ;;  %p161_p3 = scmp.lt.s32.totalorder (!%p138_p2), %s3023_s13, 1  ;;  %v4236_v1 = vld [vmem:[%s4917_s1 + $0x40] sm:$0xff] (!%p138_p2)   ;;  %v4178_v2 = vld [vmem:[%s4917_s1 + $0x18] sm:$0xff] (!%p138_p2)   ;;  %vm289_vm0 = vcmask (!%p138_p2), 261120   ;;  %vm2935_vm1 = vcmask (!%p138_p2), 523264  }
   0x6   : > { %141 = sbr.rel (%p138_p2) target bundleno = 524 (0x20c), region = 32  ;;  %3583 = vmatprep.subr.bf16.mxu1 (!%p138_p2), %v4176_v0  ;;  %3727 = vmatprep.subr.bf16.mxu0 (!%p138_p2), %v4236_v1  ;;  %v4247_v3 = vld [vmem:[%s4917_s1 + $0x48] sm:$0xff] (!%p138_p2)   ;;  %v4180_v4 = vld [vmem:[%s4917_s1] sm:$0xff] (!%p138_p2)   ;;  %v4181_v5 = vld [vmem:[%s4917_s1 + $0x50] sm:$0xff] (!%p138_p2)  }
   0x7   : > { %3584 = vmatpush3.bf16.msra.mxu1 (!%p138_p2), %v4176_v0  ;;  %3728 = vmatpush3.bf16.msra.mxu0 (!%p138_p2), %v4236_v1  ;;  %v4182_v18 = vld [vmem:[%s4917_s1 + $0x58] sm:$0xff] (!%p138_p2)   ;;  %v4183_v23 = vld [vmem:[%s4917_s1 + $0x8] sm:$0xff] (!%p138_p2)   ;;  %v4184_v25 = vld [vmem:[%s4917_s1 + $0x60] sm:$0xff] (!%p138_p2)  }
   0x8   : > { %3585 = vmatprep.subr.bf16.mxu1 (!%p138_p2), %v4178_v2  ;;  %3729 = vmatprep.subr.bf16.mxu0 (!%p138_p2), %v4247_v3  ;;  %v4323_v33 = vld [vmem:[%s4917_s1 + $0x20] sm:$0xff] (!%p138_p2)   ;;  %v4186_v52 = vld [vmem:[%s4917_s1 + $0x68] sm:$0xff] (!%p138_p2)   ;;  %v4386_v61 = vld [vmem:[%s4917_s1 + $0x70] sm:$0xff] (!%p138_p2)  }
   0xb   : > { %3586 = vmatpush3.bf16.msra.mxu1 (!%p138_p2), %v4178_v2  ;;  %3730 = vmatpush3.bf16.msra.mxu0 (!%p138_p2), %v4247_v3 }
   0xc   : > { %3619 = vmatprep.subr.bf16.mxu1 (!%p138_p2), %v4180_v4  ;;  %3763 = vmatprep.subr.bf16.mxu0 (!%p138_p2), %v4181_v5 }
   0xd   : > { %s4921_s13 = smov (!%p161_p3, %s3023_s13), 1 }
   0xe   : > { %s4167_s22 = smul.u32 432, %s4921_s13  ;;  %s3420_s4 = sshll.u32 %s4921_s13, 8 }
   0xf   : > { %s4812_s7 = scalar_lea.vmem %s4919_s3, %s3420_s4 }
  0x10   : > { %s4261_s29 = scalar_lea.vmem %s4916_s0, %s4167_s22 }
  0x11   : > { %v224_v6 = vld [vmem:[%s4261_s29 + $0x1] sm:$0xff]  ;;  %v225_v7 = vld [vmem:[%s4261_s29 + $0x9] sm:$0xff]  ;;  %v3147_v8 = vld [vmem:[%s4261_s29 + $0x19] sm:$0xff] }
  0x12   : > { %v256_v9 = vpack.c.bf16 %v225_v7, %v224_v6  ;;  %v3148_v10 = vld [vmem:[%s4261_s29 + $0x21] sm:$0xff]  ;;  %v3149_v11 = vld [vmem:[%s4261_s29 + $0x31] sm:$0xff]  ;;  %v3150_v12 = vld [vmem:[%s4261_s29 + $0x39] sm:$0xff] }
  0x13   : > { %v1365_v13 = vpack.c.bf16 %v3148_v10, %v3147_v8  ;;  %v4270_v14 = vpack.c.bf16 %v3150_v12, %v3149_v11  ;;  %v3151_v15 = vld [vmem:[%s4261_s29 + $0x49] sm:$0xff]  ;;  %v3152_v16 = vld [vmem:[%s4261_s29 + $0x51] sm:$0xff]  ;;  %v3153_v19 = vld [vmem:[%s4261_s29 + $0x61] sm:$0xff] }
  0x14   : > { %3587 = vmatprep.mubr.msk.bf16.mxu1 %vm289_vm0, %v256_v9  ;;  %v4275_v17 = vpack.c.bf16 %v3152_v16, %v3151_v15  ;;  %v3154_v20 = vld [vmem:[%s4261_s29 + $0x69] sm:$0xff]  ;;  %v3155_v21 = vld [vmem:[%s4261_s29 + $0x79] sm:$0xff]  ;;  %v3156_v22 = vld [vmem:[%s4261_s29 + $0x81] sm:$0xff] }
  0x15   : > { %3731 = vmatprep.mubr.msk.bf16.mxu0 %vm289_vm0, %v1365_v13  ;;  %3588 = vmatmul.mubr.msk.bf16.vlgmr.msra.gmra.mrb[0].mxu1 %vm289_vm0, %v1365_v13  ;;  %v4295_v24 = vpack.c.bf16 %v3154_v20, %v3153_v19  ;;  %v4300_v26 = vpack.c.bf16 %v3156_v22, %v3155_v21  ;;  %v3157_v27 = vld [vmem:[%s4261_s29 + $0x91] sm:$0xff]  ;;  %v3158_v28 = vld [vmem:[%s4261_s29 + $0x99] sm:$0xff]  ;;  %v3159_v29 = vld [vmem:[%s4261_s29 + $0xa9] sm:$0xff] }
  0x16   : > { %3732 = vmatmul.mubr.msk.bf16.vlgmr.msra.gmra.mrb[0].mxu0 %vm289_vm0, %v4270_v14  ;;  %3620 = vmatpush3.bf16.msra.mxu1 %v4180_v4  ;;  %v3160_v30 = vld [vmem:[%s4261_s29 + $0xb1] sm:$0xff]  ;;  %v4314_v31 = vpack.c.bf16 %v3158_v28, %v3157_v27  ;;  %v3161_v34 = vld [vmem:[%s4261_s29 + $0xc1] sm:$0xff]  ;;  %v3162_v35 = vld [vmem:[%s4261_s29 + $0xc9] sm:$0xff] }
  0x17   : > { %3764 = vmatpush3.bf16.msra.mxu0 %v4181_v5  ;;  %3591 = vmatprep.mubr.msk.bf16.mxu1 %vm289_vm0, %v4270_v14  ;;  %v4316_v32 = vpack.c.bf16 %v3160_v30, %v3159_v29  ;;  %v3201_v36 = vld [vmem:[%s4261_s29 + $0x1a] sm:$0xff]  ;;  %v3202_v37 = vld [vmem:[%s4261_s29 + $0x22] sm:$0xff]  ;;  %v4336_v38 = vpack.c.bf16 %v3162_v35, %v3161_v34  ;;  %v3203_v42 = vld [vmem:[%s4261_s29 + $0x32] sm:$0xff] }
  0x18   : > { %3735 = vmatprep.mubr.msk.bf16.mxu0 %vm289_vm0, %v4275_v17  ;;  %3765 = vmatprep.subr.bf16.mxu0 %v4182_v18  ;;  %v4338_v39 = vpack.c.bf16 %v3202_v37, %v3201_v36  ;;  %v242_v40 = vld [vmem:[%s4261_s29 + $0xd9] sm:$0xff]  ;;  %v243_v41 = vld [vmem:[%s4261_s29 + $0xe1] sm:$0xff]  ;;  %v244_v44 = vld [vmem:[%s4261_s29 + $0xf1] sm:$0xff] }
  0x19   : > { %3621 = vmatprep.subr.bf16.mxu1 %v4183_v23  ;;  %v3204_v43 = vld [vmem:[%s4261_s29 + $0x3a] sm:$0xff]  ;;  %v3205_v46 = vld [vmem:[%s4261_s29 + $0x4a] sm:$0xff]  ;;  %v3206_v47 = vld [vmem:[%s4261_s29 + $0x52] sm:$0xff]  ;;  %v4356_v48 = vpack.c.bf16 %v243_v41, %v242_v40 }
  0x1a   : > { %3622 = vmatpush3.bf16.msra.mxu1 %v4183_v23  ;;  %v245_v45 = vld [vmem:[%s4261_s29 + $0xf9] sm:$0xff]  ;;  %v4358_v49 = vpack.c.bf16 %v3204_v43, %v3203_v42  ;;  %v4362_v51 = vpack.c.bf16 %v3206_v47, %v3205_v46  ;;  %v246_v53 = vld [vmem:[%s4261_s29 + $0x109] sm:$0xff]  ;;  %v247_v54 = vld [vmem:[%s4261_s29 + $0x111] sm:$0xff] }
  0x1b   : > { %3766 = vmatpush3.bf16.msra.mxu0 %v4182_v18  ;;  %3655 = vmatprep.subr.bf16.mxu1 %v4323_v33  ;;  %v4360_v50 = vpack.c.bf16 %v245_v45, %v244_v44  ;;  %v3207_v55 = vld [vmem:[%s4261_s29 + $0x62] sm:$0xff]  ;;  %v3208_v56 = vld [vmem:[%s4261_s29 + $0x6a] sm:$0xff]  ;;  %v3209_v59 = vld [vmem:[%s4261_s29 + $0x7a] sm:$0xff]  ;;  %v4388_v62 = vpack.c.bf16 %v247_v54, %v246_v53 }
  0x1c   : > { %3799 = vmatprep.subr.bf16.mxu0 %v4184_v25  ;;  %v248_v57 = vld [vmem:[%s4261_s29 + $0x121] sm:$0xff]  ;;  %v249_v58 = vld [vmem:[%s4261_s29 + $0x129] sm:$0xff]  ;;  %v4390_v63 = vpack.c.bf16 %v3208_v56, %v3207_v55  ;;  %v250_v4 = vld [vmem:[%s4261_s29 + $0x139] sm:$0xff] }
  0x1d   : > { %3592 = vmatmul.mubr.msk.bf16.gmra.mrb[4].mxu1 %vm289_vm0, %v4275_v17  ;;  %v3210_v60 = vld [vmem:[%s4261_s29 + $0x82] sm:$0xff]  ;;  %v4392_v0 = vpack.c.bf16 %v249_v58, %v248_v57  ;;  %v3211_v6 = vld [vmem:[%s4261_s29 + $0x92] sm:$0xff]  ;;  %v3212_v7 = vld [vmem:[%s4261_s29 + $0x9a] sm:$0xff] }
  0x1e   : > { %3736 = vmatmul.mubr.msk.bf16.gmra.mrb[4].mxu0 %vm289_vm0, %v4295_v24  ;;  %3595 = vmatprep.mubr.msk.bf16.mxu1 %vm289_vm0, %v4295_v24  ;;  %v4394_v2 = vpack.c.bf16 %v3210_v60, %v3209_v59  ;;  %v251_v5 = vld [vmem:[%s4261_s29 + $0x141] sm:$0xff]  ;;  %v252_v8 = vld [vmem:[%s4261_s29 + $0x151] sm:$0xff]  ;;  %v253_v9 = vld [vmem:[%s4261_s29 + $0x159] sm:$0xff]  ;;  %v4415_v13 = vpack.c.bf16 %v3212_v7, %v3211_v6 }
  0x1f   : > { %3739 = vmatprep.mubr.msk.bf16.mxu0 %vm289_vm0, %v4300_v26  ;;  %v3213_v10 = vld [vmem:[%s4261_s29 + $0xaa] sm:$0xff]  ;;  %v3214_v11 = vld [vmem:[%s4261_s29 + $0xb2] sm:$0xff]  ;;  %v4413_v12 = vpack.c.bf16 %v251_v5, %v250_v4  ;;  %v4417_v15 = vpack.c.bf16 %v253_v9, %v252_v8  ;;  %v3215_v20 = vld [vmem:[%s4261_s29 + $0xc2] sm:$0xff] }
  0x20   : > { %v4419_v16 = vpack.c.bf16 %v3214_v11, %v3213_v10  ;;  %v254_v18 = vld [vmem:[%s4261_s29 + $0x169] sm:$0xff]  ;;  %v255_v19 = vld [vmem:[%s4261_s29 + $0x171] sm:$0xff]  ;;  %v172_v22 = vld [vmem:[%s4261_s29] sm:$0xff] }
  0x21   : > { %v3216_v21 = vld [vmem:[%s4261_s29 + $0xca] sm:$0xff]  ;;  %v3218_v27 = vld [vmem:[%s4261_s29 + $0xe2] sm:$0xff]  ;;  %v4437_v28 = vpack.c.bf16 %v255_v19, %v254_v18  ;;  %v174_v35 = vld [vmem:[%s4261_s29 + $0x18] sm:$0xff] }
  0x22   : > { %v173_v23 = vld [vmem:[%s4261_s29 + $0x8] sm:$0xff]  ;;  %v4439_v29 = vpack.c.bf16 %v3216_v21, %v3215_v20  ;;  %v175_v36 = vld [vmem:[%s4261_s29 + $0x20] sm:$0xff]  ;;  %v3219_v37 = vld [vmem:[%s4261_s29 + $0xf2] sm:$0xff] }
  0x23   : > { %v204_v30 = vpack.c.bf16 %v173_v23, %v172_v22  ;;  %v3220_v40 = vld [vmem:[%s4261_s29 + $0xfa] sm:$0xff]  ;;  %v176_v41 = vld [vmem:[%s4261_s29 + $0x30] sm:$0xff]  ;;  %v4458_v45 = vpack.c.bf16 %v175_v36, %v174_v35  ;;  %v4187_v53 = vld [vmem:[%s4917_s1 + $0x28] sm:$0xff]  }
  0x24   : > { %v177_v42 = vld [vmem:[%s4261_s29 + $0x38] sm:$0xff]  ;;  %v3221_v43 = vld [vmem:[%s4261_s29 + $0x10a] sm:$0xff]  ;;  %v4460_v46 = vpack.c.bf16 %v3220_v40, %v3219_v37  ;;  %v3223_v56 = vld [vmem:[%s4261_s29 + $0x122] sm:$0xff] }
  0x25   : > { %3596 = vmatmul.mubr.msk.bf16.gmra.mrb[8].mxu1 %vm289_vm0, %v4300_v26  ;;  %v3222_v44 = vld [vmem:[%s4261_s29 + $0x112] sm:$0xff]  ;;  %v4462_v47 = vpack.c.bf16 %v177_v42, %v176_v41  ;;  %v178_v54 = vld [vmem:[%s4261_s29 + $0x48] sm:$0xff]  ;;  %v180_v58 = vld [vmem:[%s4261_s29 + $0x60] sm:$0xff] }
  0x26   : > { %3740 = vmatmul.mubr.msk.bf16.gmra.mrb[8].mxu0 %vm289_vm0, %v4314_v31  ;;  %3599 = vmatprep.mubr.msk.bf16.mxu1 %vm289_vm0, %v4314_v31  ;;  %v179_v55 = vld [vmem:[%s4261_s29 + $0x50] sm:$0xff]  ;;  %v181_v59 = vld [vmem:[%s4261_s29 + $0x68] sm:$0xff]  ;;  %v182_v9 = vld [vmem:[%s4261_s29 + $0x78] sm:$0xff] }
  0x27   : > { %3743 = vmatprep.mubr.msk.bf16.mxu0 %vm289_vm0, %v4316_v32  ;;  %v3224_v57 = vld [vmem:[%s4261_s29 + $0x12a] sm:$0xff]  ;;  %v3226_v4 = vld [vmem:[%s4261_s29 + $0x142] sm:$0xff]  ;;  %v4491_v5 = vpack.c.bf16 %v179_v55, %v178_v54  ;;  %v4495_v7 = vpack.c.bf16 %v181_v59, %v180_v58  ;;  %v3227_v11 = vld [vmem:[%s4261_s29 + $0x152] sm:$0xff] }
  0x28   : > { %v4487_v60 = vld [vmem:[%s4917_s1 + $0x30] sm:$0xff]   ;;  %v4493_v6 = vpack.c.bf16 %v3224_v57, %v3223_v56  ;;  %v183_v10 = vld [vmem:[%s4261_s29 + $0x80] sm:$0xff]  ;;  %v185_v20 = vld [vmem:[%s4261_s29 + $0x98] sm:$0xff] }
  0x29   : > { %v3228_v18 = vld [vmem:[%s4261_s29 + $0x15a] sm:$0xff]  ;;  %v184_v19 = vld [vmem:[%s4261_s29 + $0x90] sm:$0xff]  ;;  %v4516_v23 = vpack.c.bf16 %v183_v10, %v182_v9  ;;  %v186_v35 = vld [vmem:[%s4261_s29 + $0xa8] sm:$0xff] }
  0x2a   : > { %v3229_v21 = vld [vmem:[%s4261_s29 + $0x16a] sm:$0xff]  ;;  %v3230_v22 = vld [vmem:[%s4261_s29 + $0x172] sm:$0xff]  ;;  %v3231_v37 = vld [vmem:[%s4261_s29 + $0x182] sm:$0xff] }
  0x2b   : > { %v187_v36 = vld [vmem:[%s4261_s29 + $0xb0] sm:$0xff]  ;;  %v188_v41 = vld [vmem:[%s4261_s29 + $0xc0] sm:$0xff]  ;;  %v189_v42 = vld [vmem:[%s4261_s29 + $0xc8] sm:$0xff] }
  0x2c   : > { %v3232_v40 = vld [vmem:[%s4261_s29 + $0x18a] sm:$0xff]  ;;  %v190_v54 = vld [vmem:[%s4261_s29 + $0xd8] sm:$0xff]  ;;  %v191_v55 = vld [vmem:[%s4261_s29 + $0xe0] sm:$0xff] }
  0x2d   : > { %3600 = vmatmul.mubr.msk.bf16.gmra.mrb[12].mxu1 %vm289_vm0, %v4316_v32  ;;  %v192_v56 = vld [vmem:[%s4261_s29 + $0xf0] sm:$0xff]  ;;  %v193_v57 = vld [vmem:[%s4261_s29 + $0xf8] sm:$0xff]  ;;  %v4556_v58 = vpack.c.bf16 %v191_v55, %v190_v54  ;;  %v196_v10 = vld [vmem:[%s4261_s29 + $0x120] sm:$0xff] }
  0x2e   : > { %3744 = vmatmul.mubr.msk.bf16.gmra.mrb[12].mxu0 %vm289_vm0, %v4336_v38  ;;  %3603 = vmatprep.mubr.msk.bf16.mxu1 %vm289_vm0, %v4336_v38  ;;  %v4558_v59 = vpack.c.bf16 %v193_v57, %v192_v56  ;;  %v195_v9 = vld [vmem:[%s4261_s29 + $0x110] sm:$0xff]  ;;  %v4191_v57 = vld [vmem:[%s4917_s1 + $0x38] sm:$0xff]  }
  0x2f   : > { %3767 = vmatprep.mubr.msk.bf16.mxu0 %vm289_vm0, %v4338_v39  ;;  %v721_v54 = vld [vmem:[%s4261_s29 + $0xa] sm:$0xff] }
  0x35   : > { %3604 = vmatmul.mubr.msk.bf16.gmra.mrb[16].mxu1 %vm289_vm0, %v4356_v48 }
  0x36   : > { %3768 = vmatmul.mubr.msk.bf16.vlgmr.msra.gmra.mrb[0].mxu0 %vm289_vm0, %v4358_v49  ;;  %3607 = vmatprep.mubr.msk.bf16.mxu1 %vm289_vm0, %v4360_v50 }
  0x37   : > { %3800 = vmatpush3.bf16.msra.mxu0 %v4184_v25  ;;  %3771 = vmatprep.mubr.msk.bf16.mxu0 %vm289_vm0, %v4362_v51  ;;  %v3217_v25 = vld [vmem:[%s4261_s29 + $0xda] sm:$0xff] }
  0x38   : > { %3801 = vmatprep.subr.bf16.mxu0 %v4186_v52  ;;  %v4441_v34 = vpack.c.bf16 %v3218_v27, %v3217_v25  ;;  %v4518_v25 = vpack.c.bf16 %v3228_v18, %v3227_v11  ;;  %v4520_v27 = vpack.c.bf16 %v185_v20, %v184_v19  ;;  %v197_v11 = vld [vmem:[%s4261_s29 + $0x128] sm:$0xff]  ;;  %v4192_v18 = vld [vmem:[%s4917_s1 + $0x80] sm:$0xff]  }
  0x39   : > { %v4581_v20 = vpack.c.bf16 %v197_v11, %v196_v10  ;;  %v4193_v11 = vld [vmem:[%s4917_s1 + $0x88] sm:$0xff]  }
  0x3b   : > { %3802 = vmatpush3.bf16.msra.mxu0 %v4186_v52  ;;  %v4464_v52 = vpack.c.bf16 %v3222_v44, %v3221_v43  ;;  %v4538_v43 = vpack.c.bf16 %v187_v36, %v186_v35  ;;  %v4540_v44 = vpack.c.bf16 %v3232_v40, %v3231_v37  ;;  %v201_v35 = vld [vmem:[%s4261_s29 + $0x158] sm:$0xff]  ;;  %v202_v40 = vld [vmem:[%s4261_s29 + $0x168] sm:$0xff] }
  0x3c   : > { %3835 = vmatprep.subr.bf16.mxu0 %v4386_v61 }
  0x3d   : > { %3608 = vmatmul.mubr.msk.bf16.gmra.mrb[20].mxu1 %vm289_vm0, %v4388_v62 }
  0x3e   : > { %3772 = vmatmul.mubr.msk.bf16.gmra.mrb[4].mxu0 %vm289_vm0, %v4390_v63  ;;  %3611 = vmatprep.mubr.msk.bf16.mxu1 %vm289_vm0, %v4392_v0 }
  0x3f   : > { %3775 = vmatprep.mubr.msk.bf16.mxu0 %vm289_vm0, %v4394_v2 }
  0x45   : > { %3612 = vmatmul.mubr.msk.bf16.gmra.mrb[24].mxu1 %vm289_vm0, %v4413_v12 }
  0x46   : > { %3776 = vmatmul.mubr.msk.bf16.gmra.mrb[8].mxu0 %vm289_vm0, %v4415_v13  ;;  %3615 = vmatprep.mubr.msk.bf16.mxu1 %vm289_vm0, %v4417_v15 }
  0x47   : > { %3779 = vmatprep.mubr.msk.bf16.mxu0 %vm289_vm0, %v4419_v16 }
  0x4d   : > { %3616 = vmatmul.mubr.msk.bf16.gmra.mrb[28].mxu1 %vm289_vm0, %v4437_v28 }
  0x4e   : > { %3780 = vmatmul.mubr.msk.bf16.gmra.mrb[12].mxu0 %vm289_vm0, %v4439_v29  ;;  %3623 = vmatprep.mubr.msk.bf16.mxu1 %vm289_vm0, %v204_v30  ;;  %v4522_v30 = vpack.c.bf16 %v3230_v22, %v3229_v21  ;;  %v199_v21 = vld [vmem:[%s4261_s29 + $0x140] sm:$0xff]  ;;  %v200_v22 = vld [vmem:[%s4261_s29 + $0x150] sm:$0xff] }
  0x4f   : > { %3783 = vmatprep.mubr.msk.bf16.mxu0 %vm289_vm0, %v4441_v34  ;;  %v4597_v37 = vpack.c.bf16 %v201_v35, %v200_v22 }
  0x55   : > { %3624 = vmatmul.mubr.msk.bf16.vlgmr.msra.gmra.mrb[0].mxu1 %vm289_vm0, %v4458_v45 }
  0x56   : > { %3784 = vmatmul.mubr.msk.bf16.gmra.mrb[16].mxu0 %vm289_vm0, %v4460_v46  ;;  %3656 = vmatpush3.bf16.msra.mxu1 %v4323_v33  ;;  %v3225_v33 = vld [vmem:[%s4261_s29 + $0x13a] sm:$0xff] }
  0x57   : > { %3627 = vmatprep.mubr.msk.bf16.mxu1 %vm289_vm0, %v4462_v47  ;;  %3787 = vmatprep.mubr.msk.bf16.mxu0 %vm289_vm0, %v4464_v52  ;;  %v4497_v8 = vpack.c.bf16 %v3226_v4, %v3225_v33  ;;  %v4190_v33 = vld [vmem:[%s4917_s1 + $0x78] sm:$0xff]   ;;  %v194_v4 = vld [vmem:[%s4261_s29 + $0x108] sm:$0xff] }
  0x58   : > { %3657 = vmatprep.subr.bf16.mxu1 %v4187_v53  ;;  %v4579_v19 = vpack.c.bf16 %v195_v9, %v194_v4  ;;  %v3285_v4 = vld [vmem:[%s4261_s29 + $0x198] sm:$0xff]  ;;  %v3286_v9 = vld [vmem:[%s4261_s29 + $0x1a0] sm:$0xff] }
  0x59   : > { %v1993_v10 = vpack.c.bf16 %v3286_v9, %v3285_v4 }
  0x5a   : > { %3658 = vmatpush3.bf16.msra.mxu1 %v4187_v53  ;;  %v4542_v53 = vpack.c.bf16 %v189_v42, %v188_v41  ;;  %v203_v41 = vld [vmem:[%s4261_s29 + $0x170] sm:$0xff]  ;;  %v720_v42 = vld [vmem:[%s4261_s29 + $0x2] sm:$0xff] }
  0x5b   : > { %3691 = vmatprep.subr.bf16.mxu1 %v4487_v60  ;;  %v4611_v55 = vpack.c.bf16 %v203_v41, %v202_v40  ;;  %v752_v56 = vpack.c.bf16 %v721_v54, %v720_v42 }
  0x5d   : > { %3628 = vmatmul.mubr.msk.bf16.gmra.mrb[4].mxu1 %vm289_vm0, %v4491_v5 }
  0x5e   : > { %3788 = vmatmul.mubr.msk.bf16.gmra.mrb[20].mxu0 %vm289_vm0, %v4493_v6  ;;  %3631 = vmatprep.mubr.msk.bf16.mxu1 %vm289_vm0, %v4495_v7 }
  0x5f   : > { %3791 = vmatprep.mubr.msk.bf16.mxu0 %vm289_vm0, %v4497_v8 }
  0x65   : > { %3632 = vmatmul.mubr.msk.bf16.gmra.mrb[8].mxu1 %vm289_vm0, %v4516_v23 }
  0x66   : > { %3792 = vmatmul.mubr.msk.bf16.gmra.mrb[24].mxu0 %vm289_vm0, %v4518_v25  ;;  %3635 = vmatprep.mubr.msk.bf16.mxu1 %vm289_vm0, %v4520_v27 }
  0x67   : > { %3795 = vmatprep.mubr.msk.bf16.mxu0 %vm289_vm0, %v4522_v30 }
  0x6d   : > { %3636 = vmatmul.mubr.msk.bf16.gmra.mrb[12].mxu1 %vm289_vm0, %v4538_v43 }
  0x6e   : > { %3796 = vmatmul.mubr.msk.bf16.gmra.mrb[28].mxu0 %vm289_vm0, %v4540_v44  ;;  %3639 = vmatprep.mubr.msk.bf16.mxu1 %vm289_vm0, %v4542_v53 }
  0x6f   : > { %3803 = vmatprep.mubr.msk.bf16.mxu0 %vm289_vm0, %v4462_v47 }
  0x75   : > { %3640 = vmatmul.mubr.msk.bf16.gmra.mrb[16].mxu1 %vm289_vm0, %v4556_v58 }
  0x76   : > { %3804 = vmatmul.mubr.msk.bf16.vlgmr.msra.gmra.mrb[0].mxu0 %vm289_vm0, %v4491_v5  ;;  %3643 = vmatprep.mubr.msk.bf16.mxu1 %vm289_vm0, %v4558_v59 }
  0x77   : > { %3836 = vmatpush3.bf16.msra.mxu0 %v4386_v61  ;;  %3807 = vmatprep.mubr.msk.bf16.mxu0 %vm289_vm0, %v4495_v7  ;;  %v198_v61 = vld [vmem:[%s4261_s29 + $0x138] sm:$0xff] }
  0x78   : > { %3837 = vmatprep.subr.bf16.mxu0 %v4190_v33  ;;  %v4595_v36 = vpack.c.bf16 %v199_v21, %v198_v61 }
  0x7b   : > { %3838 = vmatpush3.bf16.msra.mxu0 %v4190_v33 }
  0x7c   : > { %3871 = vmatprep.subr.bf16.mxu0 %v4192_v18 }
  0x7d   : > { %3644 = vmatmul.mubr.msk.bf16.gmra.mrb[20].mxu1 %vm289_vm0, %v4579_v19 }
  0x7e   : > { %3808 = vmatmul.mubr.msk.bf16.gmra.mrb[4].mxu0 %vm289_vm0, %v4516_v23  ;;  %3647 = vmatprep.mubr.msk.bf16.mxu1 %vm289_vm0, %v4581_v20 }
  0x7f   : > { %3811 = vmatprep.mubr.msk.bf16.mxu0 %vm289_vm0, %v4520_v27 }
  0x85   : > { %3648 = vmatmul.mubr.msk.bf16.gmra.mrb[24].mxu1 %vm289_vm0, %v4595_v36 }
  0x86   : > { %3812 = vmatmul.mubr.msk.bf16.gmra.mrb[8].mxu0 %vm289_vm0, %v4538_v43  ;;  %3651 = vmatprep.mubr.msk.bf16.mxu1 %vm289_vm0, %v4597_v37 }
  0x87   : > { %3815 = vmatprep.mubr.msk.bf16.mxu0 %vm289_vm0, %v4542_v53 }
  0x8d   : > { %3652 = vmatmul.mubr.msk.bf16.gmra.mrb[28].mxu1 %vm289_vm0, %v4611_v55 }
  0x8e   : > { %3816 = vmatmul.mubr.msk.bf16.gmra.mrb[12].mxu0 %vm289_vm0, %v4556_v58  ;;  %3659 = vmatprep.mubr.msk.bf16.mxu1 %vm289_vm0, %v752_v56 }
  0x8f   : > { %3819 = vmatprep.mubr.msk.bf16.mxu0 %vm289_vm0, %v4558_v59 }
  0x95   : > { %3660 = vmatmul.mubr.msk.bf16.vlgmr.msra.gmra.mrb[0].mxu1 %vm289_vm0, %v4338_v39  ;;  %v3283_v39 = vld [vmem:[%s4261_s29 + $0x180] sm:$0xff] }
  0x96   : > { %3820 = vmatmul.mubr.msk.bf16.gmra.mrb[16].mxu0 %vm289_vm0, %v4579_v19  ;;  %3692 = vmatpush3.bf16.msra.mxu1 %v4487_v60  ;;  %v3284_v60 = vld [vmem:[%s4261_s29 + $0x188] sm:$0xff] }
  0x97   : > { %3663 = vmatprep.mubr.msk.bf16.mxu1 %vm289_vm0, %v4358_v49  ;;  %3823 = vmatprep.mubr.msk.bf16.mxu0 %vm289_vm0, %v4581_v20  ;;  %v4643_v33 = vpack.c.bf16 %v3284_v60, %v3283_v39 }
  0x98   : > { %3693 = vmatprep.subr.bf16.mxu1 %v4191_v57 }
  0x9a   : > { %3694 = vmatpush3.bf16.msra.mxu1 %v4191_v57 }
  0x9b   : > { %3907 = vmatprep.subr.bf16.mxu1 %v4236_v1 }
  0x9d   : > { %3664 = vmatmul.mubr.msk.bf16.gmra.mrb[4].mxu1 %vm289_vm0, %v4362_v51 }
  0x9e   : > { %3824 = vmatmul.mubr.msk.bf16.gmra.mrb[20].mxu0 %vm289_vm0, %v4595_v36  ;;  %3667 = vmatprep.mubr.msk.bf16.mxu1 %vm289_vm0, %v4390_v63 }
  0x9f   : > { %3827 = vmatprep.mubr.msk.bf16.mxu0 %vm289_vm0, %v4597_v37 }
  0xa5   : > { %3668 = vmatmul.mubr.msk.bf16.gmra.mrb[8].mxu1 %vm289_vm0, %v4394_v2 }
  0xa6   : > { %3828 = vmatmul.mubr.msk.bf16.gmra.mrb[24].mxu0 %vm289_vm0, %v4611_v55  ;;  %3671 = vmatprep.mubr.msk.bf16.mxu1 %vm289_vm0, %v4415_v13 }
  0xa7   : > { %3831 = vmatprep.mubr.msk.bf16.mxu0 %vm289_vm0, %v4643_v33 }
  0xad   : > { %3672 = vmatmul.mubr.msk.bf16.gmra.mrb[12].mxu1 %vm289_vm0, %v4419_v16 }
  0xae   : > { %3832 = vmatmul.mubr.msk.bf16.gmra.mrb[28].mxu0 %vm289_vm0, %v1993_v10  ;;  %3675 = vmatprep.mubr.msk.bf16.mxu1 %vm289_vm0, %v4439_v29 }
  0xaf   : > { %3839 = vmatprep.mubr.msk.bf16.mxu0 %vm289_vm0, %v4270_v14  ;;  %v3338_v14 = vld [vmem:[%s4261_s29 + $0x189] sm:$0xff] }
  0xb5   : > { %3676 = vmatmul.mubr.msk.bf16.gmra.mrb[16].mxu1 %vm289_vm0, %v4441_v34 }
  0xb6   : > { %3840 = vmatmul.mubr.msk.bf16.vlgmr.msra.gmra.mrb[0].mxu0 %vm289_vm0, %v4275_v17  ;;  %3679 = vmatprep.mubr.msk.bf16.mxu1 %vm289_vm0, %v4460_v46 }
  0xb7   : > { %3872 = vmatpush3.bf16.msra.mxu0 %v4192_v18  ;;  %3843 = vmatprep.mubr.msk.bf16.mxu0 %vm289_vm0, %v4295_v24  ;;  %v3340_v24 = vld [vmem:[%s4261_s29 + $0x1a1] sm:$0xff] }
  0xb8   : > { %3873 = vmatprep.subr.bf16.mxu0 %v4193_v11 }
  0xbb   : > { %3874 = vmatpush3.bf16.msra.mxu0 %v4193_v11 }
  0xbd   : > { %3680 = vmatmul.mubr.msk.bf16.gmra.mrb[20].mxu1 %vm289_vm0, %v4464_v52 }
  0xbe   : > { %3844 = vmatmul.mubr.msk.bf16.gmra.mrb[4].mxu0 %vm289_vm0, %v4300_v26  ;;  %3683 = vmatprep.mubr.msk.bf16.mxu1 %vm289_vm0, %v4493_v6 }
  0xbf   : > { %3847 = vmatprep.mubr.msk.bf16.mxu0 %vm289_vm0, %v4314_v31  ;;  %v3393_v31 = vld [vmem:[%s4261_s29 + $0x19a] sm:$0xff] }
  0xc5   : > { %3684 = vmatmul.mubr.msk.bf16.gmra.mrb[24].mxu1 %vm289_vm0, %v4497_v8 }
  0xc6   : > { %3848 = vmatmul.mubr.msk.bf16.gmra.mrb[8].mxu0 %vm289_vm0, %v4316_v32  ;;  %3687 = vmatprep.mubr.msk.bf16.mxu1 %vm289_vm0, %v4518_v25  ;;  %v3394_v32 = vld [vmem:[%s4261_s29 + $0x1a2] sm:$0xff] }
  0xc7   : > { %3851 = vmatprep.mubr.msk.bf16.mxu0 %vm289_vm0, %v4336_v38  ;;  %v2605_v38 = vpack.c.bf16 %v3394_v32, %v3393_v31 }
  0xcd   : > { %3688 = vmatmul.mubr.msk.bf16.gmra.mrb[28].mxu1 %vm289_vm0, %v4522_v30 }
  0xce   : > { %3852 = vmatmul.mubr.msk.bf16.gmra.mrb[12].mxu0 %vm289_vm0, %v4356_v48  ;;  %3695 = vmatprep.mubr.msk.bf16.mxu1 %vm289_vm0, %v4458_v45 }
  0xcf   : > { %3855 = vmatprep.mubr.msk.bf16.mxu0 %vm289_vm0, %v4360_v50 }
  0xd5   : > { %3696 = vmatmul.mubr.msk.bf16.vlgmr.msra.gmra.mrb[0].mxu1 %vm289_vm0, %v4462_v47  ;;  %v4805_v47 = vld [vmem:[%s4918_s2] ss:$0 sm:$0xff] }
  0xd6   : > { %3856 = vmatmul.mubr.msk.bf16.gmra.mrb[16].mxu0 %vm289_vm0, %v4388_v62  ;;  %3909 = vmatpush3.bf16.msra.mxu1 %v4236_v1  ;;  %v3337_v1 = vld [vmem:[%s4261_s29 + $0x181] sm:$0xff] }
  0xd7   : > { %3699 = vmatprep.mubr.msk.bf16.mxu1 %vm289_vm0, %v4491_v5  ;;  %3859 = vmatprep.mubr.msk.bf16.mxu0 %vm289_vm0, %v4392_v0  ;;  %v2298_v17 = vpack.c.bf16 %v3338_v14, %v3337_v1 }
  0xd8   : > { %3908 = vmatprep.subr.bf16.mxu1 %v4247_v3 }
  0xda   : > { %3910 = vmatpush3.bf16.msra.mxu1 %v4247_v3  ;;  %v3339_v3 = vld [vmem:[%s4261_s29 + $0x199] sm:$0xff] }
  0xdb   : > { %v2299_v26 = vpack.c.bf16 %v3340_v24, %v3339_v3 }
  0xdd   : > { %3700 = vmatmul.mubr.msk.bf16.gmra.mrb[4].mxu1 %vm289_vm0, %v4495_v7 }
  0xde   : > { %3860 = vmatmul.mubr.msk.bf16.gmra.mrb[20].mxu0 %vm289_vm0, %v4413_v12  ;;  %3703 = vmatprep.mubr.msk.bf16.mxu1 %vm289_vm0, %v4516_v23 }
  0xdf   : > { %3863 = vmatprep.mubr.msk.bf16.mxu0 %vm289_vm0, %v4417_v15 }
  0xe5   : > { %3704 = vmatmul.mubr.msk.bf16.gmra.mrb[8].mxu1 %vm289_vm0, %v4520_v27 }
  0xe6   : > { %3864 = vmatmul.mubr.msk.bf16.gmra.mrb[24].mxu0 %vm289_vm0, %v4437_v28  ;;  %3707 = vmatprep.mubr.msk.bf16.mxu1 %vm289_vm0, %v4538_v43 }
  0xe7   : > { %3867 = vmatprep.mubr.msk.bf16.mxu0 %vm289_vm0, %v2298_v17 }
  0xed   : > { %3708 = vmatmul.mubr.msk.bf16.gmra.mrb[12].mxu1 %vm289_vm0, %v4542_v53 }
  0xee   : > { %3868 = vmatmul.mubr.msk.bf16.gmra.mrb[28].mxu0 %vm289_vm0, %v2299_v26  ;;  %3711 = vmatprep.mubr.msk.bf16.mxu1 %vm289_vm0, %v4556_v58 }
  0xef   : > { %3875 = vmatprep.mubr.msk.bf16.mxu0 %vm289_vm0, %v4358_v49 }
  0xf5   : > { %3712 = vmatmul.mubr.msk.bf16.gmra.mrb[16].mxu1 %vm289_vm0, %v4558_v59 }
  0xf6   : > { %3876 = vmatmul.mubr.msk.bf16.vlgmr.msra.gmra.mrb[0].mxu0 %vm289_vm0, %v4362_v51  ;;  %3715 = vmatprep.mubr.msk.bf16.mxu1 %vm289_vm0, %v4579_v19 }
  0xf7   : > { %3879 = vmatprep.mubr.msk.bf16.mxu0 %vm289_vm0, %v4390_v63 }
  0xfd   : > { %3716 = vmatmul.mubr.msk.bf16.gmra.mrb[20].mxu1 %vm289_vm0, %v4581_v20 }
  0xfe   : > { %3880 = vmatmul.mubr.msk.bf16.gmra.mrb[4].mxu0 %vm289_vm0, %v4394_v2  ;;  %3719 = vmatprep.mubr.msk.bf16.mxu1 %vm289_vm0, %v4595_v36 }
  0xff   : > { %3883 = vmatprep.mubr.msk.bf16.mxu0 %vm289_vm0, %v4415_v13 }
 0x105   : > { %3720 = vmatmul.mubr.msk.bf16.gmra.mrb[24].mxu1 %vm289_vm0, %v4597_v37 }
 0x106   : > { %3884 = vmatmul.mubr.msk.bf16.gmra.mrb[8].mxu0 %vm289_vm0, %v4419_v16  ;;  %3723 = vmatprep.mubr.msk.bf16.mxu1 %vm289_vm0, %v4611_v55 }
 0x107   : > { %3887 = vmatprep.mubr.msk.bf16.mxu0 %vm289_vm0, %v4439_v29 }
 0x10d   : > { %3724 = vmatmul.mubr.msk.bf16.gmra.mrb[28].mxu1 %vm289_vm0, %v4643_v33 }
 0x10e   : > { %3888 = vmatmul.mubr.msk.bf16.gmra.mrb[12].mxu0 %vm289_vm0, %v4441_v34  ;;  %3747 = vmatprep.mubr.msk.bf16.mxu1 %vm289_vm0, %v4356_v48 }
 0x10f   : > { %3891 = vmatprep.mubr.msk.bf16.mxu0 %vm289_vm0, %v4460_v46 }
 0x115   : > { %3748 = vmatmul.mubr.msk.bf16.vlgmr.msra.gmra.mrb[16].mxu1 %vm289_vm0, %v4360_v50 }
 0x116   : > { %3892 = vmatmul.mubr.msk.bf16.gmra.mrb[16].mxu0 %vm289_vm0, %v4464_v52  ;;  %3751 = vmatprep.mubr.msk.bf16.mxu1 %vm289_vm0, %v4388_v62 }
 0x117   : > { %3895 = vmatprep.mubr.msk.bf16.mxu0 %vm289_vm0, %v4493_v6 }
 0x11d   : > { %3752 = vmatmul.mubr.msk.bf16.gmra.mrb[20].mxu1 %vm289_vm0, %v4392_v0 }
 0x11e   : > { %3896 = vmatmul.mubr.msk.bf16.gmra.mrb[20].mxu0 %vm289_vm0, %v4497_v8  ;;  %3755 = vmatprep.mubr.msk.bf16.mxu1 %vm289_vm0, %v4413_v12 }
 0x11f   : > { %3899 = vmatprep.mubr.msk.bf16.mxu0 %vm289_vm0, %v4518_v25 }
 0x125   : > { %3756 = vmatmul.mubr.msk.bf16.gmra.mrb[24].mxu1 %vm289_vm0, %v4417_v15 }
 0x126   : > { %3900 = vmatmul.mubr.msk.bf16.gmra.mrb[24].mxu0 %vm289_vm0, %v4522_v30  ;;  %3759 = vmatprep.mubr.msk.bf16.mxu1 %vm289_vm0, %v4437_v28 }
 0x127   : > { %3903 = vmatprep.mubr.msk.bf16.mxu0 %vm289_vm0, %v4540_v44 }
 0x12d   : > { %3760 = vmatmul.mubr.msk.bf16.gmra.mrb[28].mxu1 %vm289_vm0, %v2298_v17 }
 0x12e   : > { %3904 = vmatmul.mubr.msk.bf16.gmra.mrb[28].mxu0 %vm289_vm0, %v2605_v38 }
 0x1a8   : > { %v3697_v48 = vpop.f32.mrb[0].mxu1 }
 0x1a9   : > { %v1174_v49 = vpop.f32.mrb[1].mxu1 }
 0x1aa   : > { %v3698_v50 = vpop.f32.mrb[2].mxu1 }
 0x1ab   : > { %v1177_v51 = vpop.f32.mrb[3].mxu1 }
 0x1b0   : > { %v3701_v62 = vpop.f32.mrb[4].mxu1 }
 0x1b1   : > { %v1190_v63 = vpop.f32.mrb[5].mxu1 }
 0x1b2   : > { %v3702_v0 = vpop.f32.mrb[6].mxu1 }
 0x1b3   : > { %v1193_v2 = vpop.f32.mrb[7].mxu1 }
 0x1b8   : > { %v3705_v12 = vpop.f32.mrb[8].mxu1 }
 0x1b9   : > { %v1206_v13 = vpop.f32.mrb[9].mxu1 }
 0x1ba   : > { %v3706_v15 = vpop.f32.mrb[10].mxu1 }
 0x1bb   : > { %v1209_v16 = vpop.f32.mrb[11].mxu1 }
 0x1c0   : > { %v4794_v28 = vpop.f32.mrb[12].mxu1 }
 0x1c1   : > { %v4796_v29 = vpop.f32.mrb[13].mxu1 }
 0x1c2   : > { %v4798_v34 = vpop.f32.mrb[14].mxu1 }
 0x1c3   : > { %v4800_v45 = vpop.f32.mrb[15].mxu1 }
 0x1c9   : > { %v3877_v46 = vpop.f32.mrb[0].mxu0 }
 0x1ca   : > { %v3911_v52 = vadd.f32 %v3877_v46, %v3697_v48  ;;  %v2705_v5 = vpop.f32.mrb[1].mxu0 }
 0x1cb   : > { %v3912_v6 = vadd.f32 %v2705_v5, %v1174_v49  ;;  %v3878_v7 = vpop.f32.mrb[2].mxu0 }
 0x1cc   : > { %v2873_v8 = vadd.f32 %v3911_v52, %v4805_v47  ;;  %v3913_v23 = vadd.f32 %v3878_v7, %v3698_v50  ;;  %v2708_v25 = vpop.f32.mrb[3].mxu0 }
 0x1cd   : > { %v2871_v27 = vadd.f32 %v3912_v6, %v4805_v47  ;;  %v3914_v30 = vadd.f32 %v2708_v25, %v1177_v51 }
 0x1ce   : > { %v2905_v43 = vmax.f32 %v2873_v8, 0.0  ;;  %v2874_v44 = vadd.f32 %v3913_v23, %v4805_v47 }
 0x1cf   : > { %v2903_v53 = vmax.f32 %v2871_v27, 0.0  ;;  %v2872_v58 = vadd.f32 %v3914_v30, %v4805_v47 }
 0x1d0   : > { %2938 = vst.msk [vmem:[%s4812_s7 + $0x10] sm:$0xff] %vm2935_vm1, %v2905_v43  ;;  %v2906_v59 = vmax.f32 %v2874_v44, 0.0 }
 0x1d1   : > { %2936 = vst.msk [vmem:[%s4812_s7] sm:$0xff] %vm2935_vm1, %v2903_v53  ;;  %v2904_v18 = vmax.f32 %v2872_v58, 0.0  ;;  %v3881_v19 = vpop.f32.mrb[4].mxu0 }
 0x1d2   : > { %2939 = vst.msk [vmem:[%s4812_s7 + $0x18] sm:$0xff] %vm2935_vm1, %v2906_v59  ;;  %v3915_v20 = vadd.f32 %v3881_v19, %v3701_v62  ;;  %v2721_v61 = vpop.f32.mrb[5].mxu0 }
 0x1d3   : > { %2937 = vst.msk [vmem:[%s4812_s7 + $0x8] sm:$0xff] %vm2935_vm1, %v2904_v18  ;;  %v3916_v21 = vadd.f32 %v2721_v61, %v1190_v63  ;;  %v3882_v22 = vpop.f32.mrb[6].mxu0 }
 0x1d4   : > { %v2877_v35 = vadd.f32 %v3915_v20, %v4805_v47  ;;  %v3917_v36 = vadd.f32 %v3882_v22, %v3702_v0  ;;  %v2724_v37 = vpop.f32.mrb[7].mxu0 }
 0x1d5   : > { %v2875_v40 = vadd.f32 %v3916_v21, %v4805_v47  ;;  %v3918_v41 = vadd.f32 %v2724_v37, %v1193_v2 }
 0x1d6   : > { %v2909_v42 = vmax.f32 %v2877_v35, 0.0  ;;  %v2878_v54 = vadd.f32 %v3917_v36, %v4805_v47 }
 0x1d7   : > { %v2907_v55 = vmax.f32 %v2875_v40, 0.0  ;;  %v2876_v56 = vadd.f32 %v3918_v41, %v4805_v47 }
 0x1d8   : > { %2942 = vst.msk [vmem:[%s4812_s7 + $0x30] sm:$0xff] %vm2935_vm1, %v2909_v42  ;;  %v2910_v57 = vmax.f32 %v2878_v54, 0.0 }
 0x1d9   : > { %2940 = vst.msk [vmem:[%s4812_s7 + $0x20] sm:$0xff] %vm2935_vm1, %v2907_v55  ;;  %v2908_v39 = vmax.f32 %v2876_v56, 0.0  ;;  %v3885_v60 = vpop.f32.mrb[8].mxu0 }
 0x1da   : > { %2943 = vst.msk [vmem:[%s4812_s7 + $0x38] sm:$0xff] %vm2935_vm1, %v2910_v57  ;;  %v3919_v33 = vadd.f32 %v3885_v60, %v3705_v12  ;;  %v2737_v4 = vpop.f32.mrb[9].mxu0 }
 0x1db   : > { %2941 = vst.msk [vmem:[%s4812_s7 + $0x28] sm:$0xff] %vm2935_vm1, %v2908_v39  ;;  %v3920_v9 = vadd.f32 %v2737_v4, %v1206_v13  ;;  %v3886_v10 = vpop.f32.mrb[10].mxu0 }
 0x1dc   : > { %v2881_v11 = vadd.f32 %v3919_v33, %v4805_v47  ;;  %v3921_v1 = vadd.f32 %v3886_v10, %v3706_v15  ;;  %v2740_v14 = vpop.f32.mrb[11].mxu0 }
 0x1dd   : > { %v2879_v17 = vadd.f32 %v3920_v9, %v4805_v47  ;;  %v3922_v3 = vadd.f32 %v2740_v14, %v1209_v16 }
 0x1de   : > { %v2913_v24 = vmax.f32 %v2881_v11, 0.0  ;;  %v2882_v26 = vadd.f32 %v3921_v1, %v4805_v47 }
 0x1df   : > { %v2911_v31 = vmax.f32 %v2879_v17, 0.0  ;;  %v2880_v32 = vadd.f32 %v3922_v3, %v4805_v47 }
 0x1e0   : > { %2946 = vst.msk [vmem:[%s4812_s7 + $0x50] sm:$0xff] %vm2935_vm1, %v2913_v24  ;;  %v2914_v38 = vmax.f32 %v2882_v26, 0.0 }
 0x1e1   : > { %2944 = vst.msk [vmem:[%s4812_s7 + $0x40] sm:$0xff] %vm2935_vm1, %v2911_v31  ;;  %v2912_v48 = vmax.f32 %v2880_v32, 0.0  ;;  %v3889_v49 = vpop.f32.mrb[12].mxu0 }
 0x1e2   : > { %2947 = vst.msk [vmem:[%s4812_s7 + $0x58] sm:$0xff] %vm2935_vm1, %v2914_v38  ;;  %v3923_v50 = vadd.f32 %v3889_v49, %v4794_v28  ;;  %v2753_v51 = vpop.f32.mrb[13].mxu0 }
 0x1e3   : > { %2945 = vst.msk [vmem:[%s4812_s7 + $0x48] sm:$0xff] %vm2935_vm1, %v2912_v48  ;;  %v3924_v62 = vadd.f32 %v2753_v51, %v4796_v29  ;;  %v3890_v63 = vpop.f32.mrb[14].mxu0 }
 0x1e4   : > { %v2885_v0 = vadd.f32 %v3923_v50, %v4805_v47  ;;  %v3925_v2 = vadd.f32 %v3890_v63, %v4798_v34  ;;  %v2756_v12 = vpop.f32.mrb[15].mxu0 }
 0x1e5   : > { %v2883_v13 = vadd.f32 %v3924_v62, %v4805_v47  ;;  %v3926_v15 = vadd.f32 %v2756_v12, %v4800_v45 }
 0x1e6   : > { %v2917_v16 = vmax.f32 %v2885_v0, 0.0  ;;  %v2886_v28 = vadd.f32 %v3925_v2, %v4805_v47 }
 0x1e7   : > { %v2915_v46 = vmax.f32 %v2883_v13, 0.0  ;;  %v2884_v52 = vadd.f32 %v3926_v15, %v4805_v47 }
 0x1e8   : > { %2950 = vst.msk [vmem:[%s4812_s7 + $0x70] sm:$0xff] %vm2935_vm1, %v2917_v16  ;;  %v2918_v29 = vmax.f32 %v2886_v28, 0.0  ;;  %v3749_v5 = vpop.f32.mrb[16].mxu1 }
 0x1e9   : > { %2948 = vst.msk [vmem:[%s4812_s7 + $0x60] sm:$0xff] %vm2935_vm1, %v2915_v46  ;;  %v2916_v6 = vmax.f32 %v2884_v52, 0.0  ;;  %v3893_v34 = vpop.f32.mrb[16].mxu0  ;;  %v1544_v7 = vpop.f32.mrb[17].mxu1 }
 0x1ea   : > { %2951 = vst.msk [vmem:[%s4812_s7 + $0x78] sm:$0xff] %vm2935_vm1, %v2918_v29  ;;  %v3927_v8 = vadd.f32 %v3893_v34, %v3749_v5  ;;  %v2769_v45 = vpop.f32.mrb[17].mxu0  ;;  %v3750_v23 = vpop.f32.mrb[18].mxu1 }
 0x1eb   : > { %2949 = vst.msk [vmem:[%s4812_s7 + $0x68] sm:$0xff] %vm2935_vm1, %v2916_v6  ;;  %v3928_v25 = vadd.f32 %v2769_v45, %v1544_v7  ;;  %v3894_v27 = vpop.f32.mrb[18].mxu0  ;;  %v1547_v30 = vpop.f32.mrb[19].mxu1 }
 0x1ec   : > { %v2889_v43 = vadd.f32 %v3927_v8, %v4805_v47  ;;  %v3929_v44 = vadd.f32 %v3894_v27, %v3750_v23  ;;  %v2772_v53 = vpop.f32.mrb[19].mxu0 }
 0x1ed   : > { %v2887_v58 = vadd.f32 %v3928_v25, %v4805_v47  ;;  %v3930_v59 = vadd.f32 %v2772_v53, %v1547_v30 }
 0x1ee   : > { %v2921_v18 = vmax.f32 %v2889_v43, 0.0  ;;  %v2890_v19 = vadd.f32 %v3929_v44, %v4805_v47 }
 0x1ef   : > { %v2919_v20 = vmax.f32 %v2887_v58, 0.0  ;;  %v2888_v61 = vadd.f32 %v3930_v59, %v4805_v47 }
 0x1f0   : > { %2954 = vst.msk [vmem:[%s4812_s7 + $0x90] sm:$0xff] %vm2935_vm1, %v2921_v18  ;;  %v2922_v21 = vmax.f32 %v2890_v19, 0.0  ;;  %v3753_v22 = vpop.f32.mrb[20].mxu1 }
 0x1f1   : > { %2952 = vst.msk [vmem:[%s4812_s7 + $0x80] sm:$0xff] %vm2935_vm1, %v2919_v20  ;;  %v2920_v35 = vmax.f32 %v2888_v61, 0.0  ;;  %v3897_v36 = vpop.f32.mrb[20].mxu0  ;;  %v1560_v37 = vpop.f32.mrb[21].mxu1 }
 0x1f2   : > { %2955 = vst.msk [vmem:[%s4812_s7 + $0x98] sm:$0xff] %vm2935_vm1, %v2922_v21  ;;  %v3931_v40 = vadd.f32 %v3897_v36, %v3753_v22  ;;  %v2785_v41 = vpop.f32.mrb[21].mxu0  ;;  %v3754_v42 = vpop.f32.mrb[22].mxu1 }
 0x1f3   : > { %2953 = vst.msk [vmem:[%s4812_s7 + $0x88] sm:$0xff] %vm2935_vm1, %v2920_v35  ;;  %v3932_v54 = vadd.f32 %v2785_v41, %v1560_v37  ;;  %v3898_v55 = vpop.f32.mrb[22].mxu0  ;;  %v1563_v56 = vpop.f32.mrb[23].mxu1 }
 0x1f4   : > { %v2893_v57 = vadd.f32 %v3931_v40, %v4805_v47  ;;  %v3933_v39 = vadd.f32 %v3898_v55, %v3754_v42  ;;  %v2788_v60 = vpop.f32.mrb[23].mxu0 }
 0x1f5   : > { %v2891_v33 = vadd.f32 %v3932_v54, %v4805_v47  ;;  %v3934_v4 = vadd.f32 %v2788_v60, %v1563_v56 }
 0x1f6   : > { %v2925_v9 = vmax.f32 %v2893_v57, 0.0  ;;  %v2894_v10 = vadd.f32 %v3933_v39, %v4805_v47 }
 0x1f7   : > { %v2923_v11 = vmax.f32 %v2891_v33, 0.0  ;;  %v2892_v1 = vadd.f32 %v3934_v4, %v4805_v47 }
 0x1f8   : > { %2958 = vst.msk [vmem:[%s4812_s7 + $0xb0] sm:$0xff] %vm2935_vm1, %v2925_v9  ;;  %v2926_v14 = vmax.f32 %v2894_v10, 0.0  ;;  %v3757_v17 = vpop.f32.mrb[24].mxu1 }
 0x1f9   : > { %2956 = vst.msk [vmem:[%s4812_s7 + $0xa0] sm:$0xff] %vm2935_vm1, %v2923_v11  ;;  %v2924_v3 = vmax.f32 %v2892_v1, 0.0  ;;  %v3901_v24 = vpop.f32.mrb[24].mxu0  ;;  %v1576_v26 = vpop.f32.mrb[25].mxu1 }
 0x1fa   : > { %2959 = vst.msk [vmem:[%s4812_s7 + $0xb8] sm:$0xff] %vm2935_vm1, %v2926_v14  ;;  %v3935_v31 = vadd.f32 %v3901_v24, %v3757_v17  ;;  %v2801_v32 = vpop.f32.mrb[25].mxu0  ;;  %v3758_v38 = vpop.f32.mrb[26].mxu1 }
 0x1fb   : > { %2957 = vst.msk [vmem:[%s4812_s7 + $0xa8] sm:$0xff] %vm2935_vm1, %v2924_v3  ;;  %v3936_v48 = vadd.f32 %v2801_v32, %v1576_v26  ;;  %v3902_v49 = vpop.f32.mrb[26].mxu0  ;;  %v1579_v50 = vpop.f32.mrb[27].mxu1 }
 0x1fc   : > { %v2897_v51 = vadd.f32 %v3935_v31, %v4805_v47  ;;  %v3937_v62 = vadd.f32 %v3902_v49, %v3758_v38  ;;  %v2804_v63 = vpop.f32.mrb[27].mxu0 }
 0x1fd   : > { %v2895_v0 = vadd.f32 %v3936_v48, %v4805_v47  ;;  %v3938_v2 = vadd.f32 %v2804_v63, %v1579_v50 }
 0x1fe   : > { %v2929_v12 = vmax.f32 %v2897_v51, 0.0  ;;  %v2898_v13 = vadd.f32 %v3937_v62, %v4805_v47 }
 0x1ff   : > { %v2927_v15 = vmax.f32 %v2895_v0, 0.0  ;;  %v2896_v16 = vadd.f32 %v3938_v2, %v4805_v47 }
 0x200   : > { %2962 = vst.msk [vmem:[%s4812_s7 + $0xd0] sm:$0xff] %vm2935_vm1, %v2929_v12  ;;  %v2930_v28 = vmax.f32 %v2898_v13, 0.0  ;;  %v3761_v46 = vpop.f32.mrb[28].mxu1 }
 0x201   : > { %2960 = vst.msk [vmem:[%s4812_s7 + $0xc0] sm:$0xff] %vm2935_vm1, %v2927_v15  ;;  %v2928_v52 = vmax.f32 %v2896_v16, 0.0  ;;  %v3905_v29 = vpop.f32.mrb[28].mxu0  ;;  %v1592_v5 = vpop.f32.mrb[29].mxu1 }
 0x202   : > { %2963 = vst.msk [vmem:[%s4812_s7 + $0xd8] sm:$0xff] %vm2935_vm1, %v2930_v28  ;;  %v3939_v6 = vadd.f32 %v3905_v29, %v3761_v46  ;;  %v2817_v34 = vpop.f32.mrb[29].mxu0  ;;  %v3762_v7 = vpop.f32.mrb[30].mxu1 }
 0x203   : > { %2961 = vst.msk [vmem:[%s4812_s7 + $0xc8] sm:$0xff] %vm2935_vm1, %v2928_v52  ;;  %v3940_v8 = vadd.f32 %v2817_v34, %v1592_v5  ;;  %v3906_v45 = vpop.f32.mrb[30].mxu0  ;;  %v1595_v23 = vpop.f32.mrb[31].mxu1 }
 0x204   : > { %v2901_v25 = vadd.f32 %v3939_v6, %v4805_v47  ;;  %v3941_v27 = vadd.f32 %v3906_v45, %v3762_v7  ;;  %v2820_v30 = vpop.f32.mrb[31].mxu0 }
 0x205   : > { %v2899_v43 = vadd.f32 %v3940_v8, %v4805_v47  ;;  %v3942_v44 = vadd.f32 %v2820_v30, %v1595_v23 }
 0x206   : > { %v2933_v53 = vmax.f32 %v2901_v25, 0.0  ;;  %v2902_v58 = vadd.f32 %v3941_v27, %v4805_v47 }
 0x207   : > { %v2931_v59 = vmax.f32 %v2899_v43, 0.0  ;;  %v2900_v18 = vadd.f32 %v3942_v44, %v4805_v47 }
 0x208   : > { %2966 = vst.msk [vmem:[%s4812_s7 + $0xf0] sm:$0xff] %vm2935_vm1, %v2933_v53  ;;  %v2934_v19 = vmax.f32 %v2902_v58, 0.0 }
 0x209   : > { %2964 = vst.msk [vmem:[%s4812_s7 + $0xe0] sm:$0xff] %vm2935_vm1, %v2931_v59  ;;  %v2932_v20 = vmax.f32 %v2900_v18, 0.0 }
 0x20a   : > { %2967 = vst.msk [vmem:[%s4812_s7 + $0xf8] sm:$0xff] %vm2935_vm1, %v2934_v19 }
 0x20b   : > { %2965 = vst.msk [vmem:[%s4812_s7 + $0xe8] sm:$0xff] %vm2935_vm1, %v2932_v20 }
 0x20c PF: > { %s13_s12 = sadd.s32 1, %s4200_s12  }
 0x20d   : > { %p10_p4 = scmp.ge.s32.totalorder %s13_s12, 4  }
 0x20f   :  { %12 = sbr.rel (!%p10_p4) target bundleno = 1 (0x1), region = 72 }

// kernel: net_10_forward.11
= control target key start
LH: loop header
LB: loop body
LE: loop exit
PB: predicated region body
PF: predicated region fallthrough
CT: control target
= control target key end

     0   :  { %v957_v1 = vmov 0.0   ;;  %vm958_vm0 = vmmov 0   ;;  %vm18_vm1 = vcmask 1043456   ;;  %vm65_vm2 = vcmask 1041409   ;;  %s1184_s0 = inlined_call_operand.vmem [shape: f32[2,4,128], index: 0, kind: input, shape index: {}]   ;;  %s1185_s1 = inlined_call_operand.vmem [shape: bf16[5,128,128], index: 1, kind: input, shape index: {}]   ;;  %s1186_s2 = inlined_call_operand.vmem [shape: f32[5,1,128], index: 2, kind: input, shape index: {}]   ;;  %s1187_s3 = inlined_call_operand.hbm [shape: f32[2,128], index: 3, kind: output, shape index: {}]  }
   0x1   :  { %v893_v0 = vld [vmem:[%s1185_s1] sm:$0xff]   ;;  %790 = vmatprep.subr.bf16.mxu0 %v957_v1  ;;  %810 = vmatprep.subr.bf16.mxu1 %v957_v1  ;;  %v894_v2 = vld [vmem:[%s1185_s1 + $0x8] sm:$0xff]   ;;  %v895_v3 = vld [vmem:[%s1185_s1 + $0x10] sm:$0xff]  }
   0x2   :  { %791 = vmatpush3.bf16.msra.mxu0 %v893_v0  ;;  %806 = vmatprep.mubr.msk.bf16.mxu0 %vm958_vm0, %v957_v1  ;;  %v16_v4 = vld [vmem:[%s1184_s0] sm:$0xf]  ;;  %v17_v5 = vld [vmem:[%s1184_s0 + $0x4] sm:$0xf]  ;;  %v896_v6 = vld [vmem:[%s1185_s1 + $0x18] sm:$0xff]  }
   0x3   :  { %792 = vmatprep.subr.bf16.mxu0 %v957_v1  ;;  %826 = vmatprep.mubr.msk.bf16.mxu1 %vm958_vm0, %v957_v1  ;;  %v19_v7 = vsel %vm18_vm1, %v16_v4, 0.0  ;;  %v26_v8 = vsel %vm18_vm1, %v17_v5, 0.0  ;;  %v901_v9 = vld [vmem:[%s1185_s1 + $0x40] sm:$0xff]   ;;  %v902_v12 = vld [vmem:[%s1185_s1 + $0x48] sm:$0xff]   ;;  %v903_v18 = vld [vmem:[%s1185_s1 + $0x50] sm:$0xff]  }
   0x4   :  { %v20_v10 = vrot.slane %v19_v7, 4  ;;  %v27_v11 = vrot.slane %v26_v8, 4  ;;  %811 = vmatpush3.bf16.msra.mxu1 %v901_v9  ;;  %v897_v15 = vld [vmem:[%s1185_s1 + $0x20] sm:$0xff]   ;;  %v898_v19 = vld [vmem:[%s1185_s1 + $0x28] sm:$0xff]   ;;  %v904_v22 = vld [vmem:[%s1185_s1 + $0x58] sm:$0xff]  }
   0x5   :  { %812 = vmatprep.subr.bf16.mxu1 %v957_v1  ;;  %v899_v25 = vld [vmem:[%s1185_s1 + $0x30] sm:$0xff]   ;;  %v905_v28 = vld [vmem:[%s1185_s1 + $0x60] sm:$0xff]   ;;  %v900_v31 = vld [vmem:[%s1185_s1 + $0x38] sm:$0xff]  }
   0x6   :  { %793 = vmatpush3.bf16.msra.mxu0 %v894_v2  ;;  %v21_v13 = vadd.f32 %v20_v10, %v19_v7  ;;  %v28_v14 = vadd.f32 %v27_v11, %v26_v8  ;;  %v906_v34 = vld [vmem:[%s1185_s1 + $0x68] sm:$0xff]  }
   0x7   :  { %794 = vmatprep.subr.bf16.mxu0 %v957_v1 }
   0x8   :  { %v22_v16 = vrot.slane %v21_v13, 2  ;;  %v29_v17 = vrot.slane %v28_v14, 2  ;;  %813 = vmatpush3.bf16.msra.mxu1 %v902_v12 }
   0x9   :  { %814 = vmatprep.subr.bf16.mxu1 %v957_v1 }
   0xa   :  { %795 = vmatpush3.bf16.msra.mxu0 %v895_v3  ;;  %v23_v20 = vadd.f32 %v22_v16, %v21_v13  ;;  %v30_v21 = vadd.f32 %v29_v17, %v28_v14 }
   0xb   :  { %796 = vmatprep.subr.bf16.mxu0 %v957_v1 }
   0xc   :  { %v24_v23 = vrot.slane %v23_v20, 1  ;;  %v31_v24 = vrot.slane %v30_v21, 1  ;;  %815 = vmatpush3.bf16.msra.mxu1 %v903_v18 }
   0xd   :  { %816 = vmatprep.subr.bf16.mxu1 %v957_v1 }
   0xe   :  { %797 = vmatpush3.bf16.msra.mxu0 %v896_v6  ;;  %v25_v26 = vadd.f32 %v24_v23, %v23_v20  ;;  %v32_v27 = vadd.f32 %v31_v24, %v30_v21 }
   0xf   :  { %798 = vmatprep.subr.bf16.mxu0 %v957_v1 }
  0x10   :  { %v34_v29 = vmul.f32 0.25, %v25_v26  ;;  %v35_v30 = vmul.f32 0.25, %v32_v27  ;;  %817 = vmatpush3.bf16.msra.mxu1 %v904_v22 }
  0x11   :  { %818 = vmatprep.subr.bf16.mxu1 %v957_v1 }
  0x12   :  { %799 = vmatpush3.bf16.msra.mxu0 %v897_v15  ;;  %v36_v32 = vpack.c.bf16 %v34_v29, %v34_v29  ;;  %v37_v33 = vpack.c.bf16 %v35_v30, %v35_v30 }
  0x13   :  { %800 = vmatprep.subr.bf16.mxu0 %v957_v1 }
  0x14   :  { %v63_v35 = vunpack.c.l.b16 %v36_v32  ;;  %v64_v36 = vunpack.c.l.b16 %v37_v33  ;;  %819 = vmatpush3.bf16.msra.mxu1 %v905_v28 }
  0x15   :  { %820 = vmatprep.subr.bf16.mxu1 %v957_v1 }
  0x16   :  { %801 = vmatpush3.bf16.msra.mxu0 %v898_v19  ;;  %v66_v37 = vsel %vm65_vm2, %v64_v36, %v63_v35 }
  0x17   :  { %802 = vmatprep.subr.bf16.mxu0 %v957_v1  ;;  %v67_v38 = vpack.c.b16 %v66_v37, %v66_v37 }
  0x18   :  { %821 = vmatpush3.bf16.msra.mxu1 %v906_v34 }
  0x19   :  { %822 = vmatprep.subr.bf16.mxu1 %v957_v1 }
  0x1a   :  { %803 = vmatpush3.bf16.msra.mxu0 %v899_v25 }
  0x1b   :  { %804 = vmatprep.subr.bf16.mxu0 %v957_v1 }
  0x1e   :  { %805 = vmatpush3.bf16.msra.mxu0 %v900_v31 }
  0x1f   :  { %830 = vmatprep.subr.bf16.mxu0 %v957_v1 }
  0x21   :  { %807 = vmatmul.mubr.bf16.vlgmr.msra.gmra.mrb[0].mxu0 %v67_v38 }
  0x22   :  { %8 = vsyncpa [#allocation3], 0  ;;  %846 = vmatprep.mubr.msk.bf16.mxu0 %vm958_vm0, %v957_v1  ;;  %v907_v39 = vld [vmem:[%s1185_s1 + $0x70] sm:$0xff]   ;;  %v908_v40 = vld [vmem:[%s1185_s1 + $0x78] sm:$0xff]   ;;  %s959_s22 = smov [#allocation2]  }
  0x23   :  { %823 = vmatpush3.bf16.msra.mxu1 %v907_v39  ;;  %v909_v41 = vld [vmem:[%s1185_s1 + $0x80] sm:$0xff]   ;;  %v910_v42 = vld [vmem:[%s1185_s1 + $0x88] sm:$0xff]   ;;  %v911_v43 = vld [vmem:[%s1185_s1 + $0x90] sm:$0xff]   ;;  %s624_s23 = sshll.u32 %s959_s22, 4  ;;  %s625_s23 = int_to_ptr.vmem [resolvable:$true] %s624_s23 }
  0x24   :  { %824 = vmatprep.subr.bf16.mxu1 %v957_v1  ;;  %831 = vmatpush3.bf16.msra.mxu0 %v909_v41  ;;  %v912_v44 = vld [vmem:[%s1185_s1 + $0x98] sm:$0xff]   ;;  %v913_v45 = vld [vmem:[%s1185_s1 + $0xa0] sm:$0xff]   ;;  %v914_v46 = vld [vmem:[%s1185_s1 + $0xa8] sm:$0xff]   ;;  %p938_p1 = scmp.lt.s32.totalorder %s625_s23, %s625_s23 }
  0x25   :  { %832 = vmatprep.subr.bf16.mxu0 %v957_v1  ;;  %v632_v47 = vld [vmem:[%s1186_s2] ss:$0 sm:$0xff]  ;;  %v915_v55 = vld [vmem:[%s1185_s1 + $0xb0] sm:$0xff]   ;;  %v916_v56 = vld [vmem:[%s1185_s1 + $0xb8] sm:$0xff]  }
  0x26   :  { %v917_v57 = vld [vmem:[%s1185_s1 + $0xc0] sm:$0xff]   ;;  %v918_v58 = vld [vmem:[%s1185_s1 + $0xc8] sm:$0xff]   ;;  %v919_v59 = vld [vmem:[%s1185_s1 + $0xd0] sm:$0xff]  }
  0x27   :  { %825 = vmatpush3.bf16.msra.mxu1 %v908_v40  ;;  %v920_v60 = vld [vmem:[%s1185_s1 + $0xd8] sm:$0xff]   ;;  %v921_v61 = vld [vmem:[%s1185_s1 + $0xe0] sm:$0xff]   ;;  %v922_v62 = vld [vmem:[%s1185_s1 + $0xe8] sm:$0xff]  }
  0x28   :  { %850 = vmatprep.subr.bf16.mxu1 %v957_v1  ;;  %833 = vmatpush3.bf16.msra.mxu0 %v910_v42  ;;  %v658_v63 = vld [vmem:[%s1186_s2 + $0x1] ss:$0 sm:$0xff]  ;;  %v923_v8 = vld [vmem:[%s1185_s1 + $0xf0] sm:$0xff]   ;;  %v924_v9 = vld [vmem:[%s1185_s1 + $0xf8] sm:$0xff]  }
  0x29   :  { %834 = vmatprep.subr.bf16.mxu0 %v957_v1  ;;  %v925_v10 = vld [vmem:[%s1185_s1 + $0x100] sm:$0xff]   ;;  %v926_v11 = vld [vmem:[%s1185_s1 + $0x108] sm:$0xff]   ;;  %v927_v12 = vld [vmem:[%s1185_s1 + $0x110] sm:$0xff]  }
  0x2a   :  { %v928_v13 = vld [vmem:[%s1185_s1 + $0x118] sm:$0xff]   ;;  %v929_v14 = vld [vmem:[%s1185_s1 + $0x120] sm:$0xff]   ;;  %v930_v15 = vld [vmem:[%s1185_s1 + $0x128] sm:$0xff]  }
  0x2b   :  { %v684_v16 = vld [vmem:[%s1186_s2 + $0x2] ss:$0 sm:$0xff]  ;;  %v931_v24 = vld [vmem:[%s1185_s1 + $0x130] sm:$0xff]   ;;  %v932_v25 = vld [vmem:[%s1185_s1 + $0x138] sm:$0xff]   ;;  %s933_s1 = scalar_lea.vmem %s625_s23, 32 }
  0x2c   :  { %835 = vmatpush3.bf16.msra.mxu0 %v911_v43  ;;  %v710_v26 = vld [vmem:[%s1186_s2 + $0x3] ss:$0 sm:$0xff]  ;;  %p934_p0 = scmp.ne.s32.totalorder %s625_s23, %s933_s1  ;;  %p939_p2 = scmp.lt.s32.totalorder %s933_s1, %s933_s1 }
  0x2d   :  { %836 = vmatprep.subr.bf16.mxu0 %v957_v1 }
  0x2e   :  { %p940_p3 = por %p939_p2, %p938_p1 }
  0x30   :  { %837 = vmatpush3.bf16.msra.mxu0 %v912_v44  ;;  %p941_p4 = pnand %p940_p3, %p934_p0 }
  0x31   :  { %838 = vmatprep.subr.bf16.mxu0 %v957_v1 }
  0x34   :  { %839 = vmatpush3.bf16.msra.mxu0 %v913_v45 }
  0x35   :  { %840 = vmatprep.subr.bf16.mxu0 %v957_v1 }
  0x38   :  { %841 = vmatpush3.bf16.msra.mxu0 %v914_v46 }
  0x39   :  { %842 = vmatprep.subr.bf16.mxu0 %v957_v1 }
  0x3c   :  { %843 = vmatpush3.bf16.msra.mxu0 %v915_v55 }
  0x3d   :  { %844 = vmatprep.subr.bf16.mxu0 %v957_v1 }
  0x40   :  { %845 = vmatpush3.bf16.msra.mxu0 %v916_v56 }
  0x41   :  { %870 = vmatprep.subr.bf16.mxu0 %v957_v1 }
  0xf4   :  { %v151_v48 = vpop.f32.mrb[0].mxu0 }
  0xf5   :  { %v152_v49 = vadd.f32 %v632_v47, %v151_v48  ;;  %v808_v50 = vpop.f32.mrb[1].mxu0 }
  0xf6   :  { %v154_v51 = vpop.f32.mrb[2].mxu0 }
  0xf7   :  { %v157_v52 = vmax.f32 %v152_v49, 0.0  ;;  %v809_v53 = vpop.f32.mrb[3].mxu0 }
  0xf9   :  { %v158_v54 = vpack.c.bf16 %v157_v52, %v157_v52 }
  0xfb   :  { %827 = vmatmul.mubr.bf16.vlgmr.msra.gmra.mrb[0].mxu1 %v158_v54 }
  0xfc   :  { %866 = vmatprep.mubr.msk.bf16.mxu1 %vm958_vm0, %v957_v1  ;;  %851 = vmatpush3.bf16.msra.mxu1 %v917_v57 }
  0xfd   :  { %852 = vmatprep.subr.bf16.mxu1 %v957_v1 }
 0x100   :  { %853 = vmatpush3.bf16.msra.mxu1 %v918_v58 }
 0x101   :  { %854 = vmatprep.subr.bf16.mxu1 %v957_v1 }
 0x104   :  { %855 = vmatpush3.bf16.msra.mxu1 %v919_v59 }
 0x105   :  { %856 = vmatprep.subr.bf16.mxu1 %v957_v1 }
 0x108   :  { %857 = vmatpush3.bf16.msra.mxu1 %v920_v60 }
 0x109   :  { %858 = vmatprep.subr.bf16.mxu1 %v957_v1 }
 0x10c   :  { %859 = vmatpush3.bf16.msra.mxu1 %v921_v61 }
 0x10d   :  { %860 = vmatprep.subr.bf16.mxu1 %v957_v1 }
 0x110   :  { %861 = vmatpush3.bf16.msra.mxu1 %v922_v62 }
 0x111   :  { %862 = vmatprep.subr.bf16.mxu1 %v957_v1 }
 0x114   :  { %863 = vmatpush3.bf16.msra.mxu1 %v923_v8 }
 0x115   :  { %864 = vmatprep.subr.bf16.mxu1 %v957_v1 }
 0x118   :  { %865 = vmatpush3.bf16.msra.mxu1 %v924_v9 }
 0x1ce   :  { %v266_v0 = vpop.f32.mrb[0].mxu1 }
 0x1cf   :  { %v267_v2 = vadd.f32 %v658_v63, %v266_v0  ;;  %v828_v3 = vpop.f32.mrb[1].mxu1 }
 0x1d0   :  { %v269_v4 = vpop.f32.mrb[2].mxu1 }
 0x1d1   :  { %v272_v5 = vmax.f32 %v267_v2, 0.0  ;;  %v829_v6 = vpop.f32.mrb[3].mxu1 }
 0x1d3   :  { %v273_v7 = vpack.c.bf16 %v272_v5, %v272_v5 }
 0x1d5   :  { %847 = vmatmul.mubr.bf16.vlgmr.msra.gmra.mrb[4].mxu0 %v273_v7 }
 0x1d6   :  { %886 = vmatprep.mubr.msk.bf16.mxu0 %vm958_vm0, %v957_v1  ;;  %871 = vmatpush3.bf16.msra.mxu0 %v925_v10 }
 0x1d7   :  { %872 = vmatprep.subr.bf16.mxu0 %v957_v1 }
 0x1da   :  { %873 = vmatpush3.bf16.msra.mxu0 %v926_v11 }
 0x1db   :  { %874 = vmatprep.subr.bf16.mxu0 %v957_v1 }
 0x1de   :  { %875 = vmatpush3.bf16.msra.mxu0 %v927_v12 }
 0x1df   :  { %876 = vmatprep.subr.bf16.mxu0 %v957_v1 }
 0x1e2   :  { %877 = vmatpush3.bf16.msra.mxu0 %v928_v13 }
 0x1e3   :  { %878 = vmatprep.subr.bf16.mxu0 %v957_v1 }
 0x1e6   :  { %879 = vmatpush3.bf16.msra.mxu0 %v929_v14 }
 0x1e7   :  { %880 = vmatprep.subr.bf16.mxu0 %v957_v1 }
 0x1ea   :  { %881 = vmatpush3.bf16.msra.mxu0 %v930_v15 }
 0x1eb   :  { %882 = vmatprep.subr.bf16.mxu0 %v957_v1 }
 0x1ee   :  { %883 = vmatpush3.bf16.msra.mxu0 %v931_v24 }
 0x1ef   :  { %884 = vmatprep.subr.bf16.mxu0 %v957_v1  ;;  %v736_v1 = vld [vmem:[%s1186_s2 + $0x4] ss:$0 sm:$0xff] }
 0x1f2   :  { %885 = vmatpush3.bf16.msra.mxu0 %v932_v25 }
 0x2a8   :  { %v381_v17 = vpop.f32.mrb[4].mxu0 }
 0x2a9   :  { %v382_v18 = vadd.f32 %v684_v16, %v381_v17  ;;  %v848_v19 = vpop.f32.mrb[5].mxu0 }
 0x2aa   :  { %v384_v20 = vpop.f32.mrb[6].mxu0 }
 0x2ab   :  { %v387_v21 = vmax.f32 %v382_v18, 0.0  ;;  %v849_v22 = vpop.f32.mrb[7].mxu0 }
 0x2ad   :  { %v388_v23 = vpack.c.bf16 %v387_v21, %v387_v21 }
 0x2af   :  { %867 = vmatmul.mubr.bf16.vlgmr.msra.gmra.mrb[4].mxu1 %v388_v23 }
 0x382   :  { %v496_v27 = vpop.f32.mrb[4].mxu1 }
 0x383   :  { %v497_v28 = vadd.f32 %v710_v26, %v496_v27  ;;  %v868_v29 = vpop.f32.mrb[5].mxu1 }
 0x384   :  { %v499_v30 = vpop.f32.mrb[6].mxu1 }
 0x385   :  { %v502_v31 = vmax.f32 %v497_v28, 0.0  ;;  %v869_v32 = vpop.f32.mrb[7].mxu1 }
 0x387   :  { %v503_v33 = vpack.c.bf16 %v502_v31, %v502_v31 }
 0x389   :  { %887 = vmatmul.mubr.bf16.vlgmr.msra.gmra.mrb[8].mxu0 %v503_v33 }
 0x45c   :  { %v611_v34 = vpop.f32.mrb[8].mxu0 }
 0x45d   :  { %v612_v35 = vadd.f32 %v736_v1, %v611_v34  ;;  %v888_v36 = vpop.f32.mrb[9].mxu0 }
 0x45e   :  { %v614_v37 = vpop.f32.mrb[10].mxu0 }
 0x45f   :  { %617 = vst [vmem:[#allocation2] sm:$0x3] %v612_v35  ;;  %v889_v38 = vpop.f32.mrb[11].mxu0 }
 0x460   :  { %944 = shalt.err (!%p941_p4)
}
 0x461   :  { %s945_s2 = scalar_lea.hbm %s1187_s3, 32 }
 0x462   :  { %p946_p5 = scmp.ne.s32.totalorder %s1187_s3, %s945_s2  ;;  %p949_p6 = scmp.lt.u32.totalorder %s945_s2, %s1187_s3 }
 0x464   :  { %p951_p7 = pnand %p949_p6, %p946_p5 }
 0x466   :  { %954 = shalt.err (!%p951_p7)
}
 0x467   :  { %627 = dma.vmem_to_hbm [thread:$0]  %s625_s23, 32, %s1187_s3, [#allocation3]  }
 0x468   :  { %955 = dma.done.wait [#allocation3], 32  }
 0x469   :  { %956 = vsyncadd [#allocation3], 4294967264 }
 0x46a   :  { %631 = vsyncpa [#allocation3], 1 }

// kernel: net_10_forward.10
= control target key start
LH: loop header
LB: loop body
LE: loop exit
PB: predicated region body
PF: predicated region fallthrough
CT: control target
= control target key end

     0   :  { %s2241_s12 = smov 0   ;;  %s2581_s0 = inlined_call_operand.vmem [shape: f32[2,10,10,96], index: 0, kind: input, shape index: {}]   ;;  %s2582_s1 = inlined_call_operand.vmem [shape: bf16[9,96,128], index: 1, kind: input, shape index: {}]   ;;  %s2583_s2 = inlined_call_operand.vmem [shape: f32[1,128], index: 2, kind: input, shape index: {}]   ;;  %s2584_s3 = inlined_call_operand.vmem [shape: f32[2,64,128], index: 3, kind: output, shape index: {}]  }
   0x1 LB: > { %s1558_s13 = sadd.s32 4294967295, %s2219_s12   ;;  %p1562_p0 = scmp.ge.s32.totalorder %s2219_s12, 1  ;;  %s2219_s12 = sphi %s2241_s12, %s13_s12  }
   0x2   : > { %p137_p1 = scmp.lt.s32.totalorder %s2219_s12, 3 }
   0x4   : > { %p138_p2 = pnand %p1562_p0, %p137_p1 }
   0x5   : > { %v2159_v0 = vld [vmem:[%s2582_s1 + $0x30] sm:$0xff] (!%p138_p2)   ;;  %p161_p3 = scmp.lt.s32.totalorder (!%p138_p2), %s1558_s13, 1  ;;  %v2160_v1 = vld [vmem:[%s2582_s1 + $0xc0] sm:$0xff] (!%p138_p2)   ;;  %v2161_v2 = vld [vmem:[%s2582_s1 + $0x38] sm:$0xff] (!%p138_p2)   ;;  %vm257_vm0 = vcmask (!%p138_p2), 785408  }
   0x6   : > { %141 = sbr.rel (%p138_p2) target bundleno = 348 (0x15c), region = 32  ;;  %1894 = vmatprep.subr.bf16.mxu1 (!%p138_p2), %v2159_v0  ;;  %1974 = vmatprep.subr.bf16.mxu0 (!%p138_p2), %v2160_v1  ;;  %v2162_v3 = vld [vmem:[%s2582_s1 + $0xc8] sm:$0xff] (!%p138_p2)   ;;  %v2163_v4 = vld [vmem:[%s2582_s1 + $0x40] sm:$0xff] (!%p138_p2)   ;;  %v2164_v5 = vld [vmem:[%s2582_s1 + $0xd0] sm:$0xff] (!%p138_p2)  }
   0x7   : > { %1895 = vmatpush3.bf16.msra.mxu1 (!%p138_p2), %v2159_v0  ;;  %1975 = vmatpush3.bf16.msra.mxu0 (!%p138_p2), %v2160_v1  ;;  %v2165_v6 = vld [vmem:[%s2582_s1 + $0x48] sm:$0xff] (!%p138_p2)   ;;  %v2166_v7 = vld [vmem:[%s2582_s1 + $0xd8] sm:$0xff] (!%p138_p2)   ;;  %v2167_v8 = vld [vmem:[%s2582_s1 + $0x50] sm:$0xff] (!%p138_p2)  }
   0x8   : > { %1896 = vmatprep.subr.bf16.mxu1 (!%p138_p2), %v2161_v2  ;;  %1976 = vmatprep.subr.bf16.mxu0 (!%p138_p2), %v2162_v3  ;;  %v2168_v11 = vld [vmem:[%s2582_s1 + $0xe0] sm:$0xff] (!%p138_p2)   ;;  %v2169_v15 = vld [vmem:[%s2582_s1 + $0x58] sm:$0xff] (!%p138_p2)   ;;  %v2170_v16 = vld [vmem:[%s2582_s1 + $0xe8] sm:$0xff] (!%p138_p2)  }
   0x9   : > { %v2171_v17 = vld [vmem:[%s2582_s1] sm:$0xff] (!%p138_p2)   ;;  %v2172_v20 = vld [vmem:[%s2582_s1 + $0xf0] sm:$0xff] (!%p138_p2)   ;;  %v2173_v25 = vld [vmem:[%s2582_s1 + $0x8] sm:$0xff] (!%p138_p2)  }
   0xa   : > { %v2174_v26 = vld [vmem:[%s2582_s1 + $0xf8] sm:$0xff] (!%p138_p2)   ;;  %v2175_v30 = vld [vmem:[%s2582_s1 + $0x10] sm:$0xff] (!%p138_p2)   ;;  %v2176_v32 = vld [vmem:[%s2582_s1 + $0x100] sm:$0xff] (!%p138_p2)  }
   0xb   : > { %1897 = vmatpush3.bf16.msra.mxu1 (!%p138_p2), %v2161_v2  ;;  %1977 = vmatpush3.bf16.msra.mxu0 (!%p138_p2), %v2162_v3  ;;  %v2177_v39 = vld [vmem:[%s2582_s1 + $0x18] sm:$0xff] (!%p138_p2)   ;;  %v2178_v40 = vld [vmem:[%s2582_s1 + $0x108] sm:$0xff] (!%p138_p2)   ;;  %v2179_v43 = vld [vmem:[%s2582_s1 + $0x20] sm:$0xff] (!%p138_p2)  }
   0xc   : > { %1898 = vmatprep.subr.bf16.mxu1 (!%p138_p2), %v2163_v4  ;;  %1978 = vmatprep.subr.bf16.mxu0 (!%p138_p2), %v2164_v5  ;;  %v2180_v44 = vld [vmem:[%s2582_s1 + $0x110] sm:$0xff] (!%p138_p2)   ;;  %v2181_v45 = vld [vmem:[%s2582_s1 + $0x28] sm:$0xff] (!%p138_p2)   ;;  %v2182_v46 = vld [vmem:[%s2582_s1 + $0x118] sm:$0xff] (!%p138_p2)  }
   0xd   : > { %s2586_s13 = smov (!%p161_p3, %s1558_s13), 1  ;;  %v2183_v48 = vld [vmem:[%s2582_s1 + $0x60] sm:$0xff]   ;;  %v2185_v56 = vld [vmem:[%s2582_s1 + $0x68] sm:$0xff]   ;;  %v2187_v63 = vld [vmem:[%s2582_s1 + $0x70] sm:$0xff]  }
   0xe   : > { %s2150_s26 = smul.u32 160, %s2586_s13  ;;  %v2184_v50 = vld [vmem:[%s2582_s1 + $0x120] sm:$0xff]   ;;  %v2186_v60 = vld [vmem:[%s2582_s1 + $0x128] sm:$0xff]   ;;  %s1803_s30 = sshll.u32 %s2586_s13, 6 }
   0xf   : > { %1899 = vmatpush3.bf16.msra.mxu1 %v2163_v4  ;;  %1979 = vmatpush3.bf16.msra.mxu0 %v2164_v5  ;;  %v2188_v4 = vld [vmem:[%s2582_s1 + $0x130] sm:$0xff]   ;;  %s170_s7 = scalar_lea.vmem %s2584_s3, %s1803_s30 }
  0x10   : > { %s2279_s6 = scalar_lea.vmem %s2581_s0, %s2150_s26  ;;  %1900 = vmatprep.subr.bf16.mxu1 %v2165_v6  ;;  %1980 = vmatprep.subr.bf16.mxu0 %v2166_v7 }
  0x11   : > { %v196_v9 = vld [vmem:[%s2279_s6 + $0x1] sm:$0xff]  ;;  %v197_v10 = vld [vmem:[%s2279_s6 + $0x11] sm:$0xff] }
  0x12   : > { %v204_v12 = vpack.c.bf16 %v197_v10, %v196_v9  ;;  %v1651_v13 = vld [vmem:[%s2279_s6 + $0x21] sm:$0xff]  ;;  %v199_v18 = vld [vmem:[%s2279_s6 + $0x31] sm:$0xff] }
  0x13   : > { %v749_v14 = vpack.c.bf16 %v1651_v13, %v197_v10  ;;  %1901 = vmatpush3.bf16.msra.mxu1 %v2165_v6  ;;  %1981 = vmatpush3.bf16.msra.mxu0 %v2166_v7  ;;  %v1653_v19 = vld [vmem:[%s2279_s6 + $0x41] sm:$0xff]  ;;  %v2306_v21 = vpack.c.bf16 %v199_v18, %v1651_v13  ;;  %v201_v22 = vld [vmem:[%s2279_s6 + $0x51] sm:$0xff] }
  0x14   : > { %1906 = vmatprep.mubr.msk.bf16.mxu1 %vm257_vm0, %v204_v12  ;;  %1902 = vmatprep.subr.bf16.mxu1 %v2167_v8  ;;  %v750_v23 = vpack.c.bf16 %v1653_v19, %v199_v18  ;;  %v1655_v24 = vld [vmem:[%s2279_s6 + $0x61] sm:$0xff]  ;;  %v2316_v27 = vpack.c.bf16 %v201_v22, %v1653_v19  ;;  %v203_v29 = vld [vmem:[%s2279_s6 + $0x71] sm:$0xff] }
  0x15   : > { %1982 = vmatprep.subr.bf16.mxu0 %v2168_v11  ;;  %1986 = vmatprep.mubr.msk.bf16.mxu0 %vm257_vm0, %v749_v14  ;;  %v751_v28 = vpack.c.bf16 %v1655_v24, %v201_v22  ;;  %v2326_v31 = vld [vmem:[%s2279_s6 + $0x81] sm:$0xff]  ;;  %v2334_v33 = vpack.c.bf16 %v203_v29, %v1655_v24  ;;  %v2338_v35 = vld [vmem:[%s2279_s6 + $0x10] sm:$0xff]  ;;  %v2190_v9 = vld [vmem:[%s2582_s1 + $0x138] sm:$0xff]  }
  0x16   : > { %v172_v34 = vld [vmem:[%s2279_s6] sm:$0xff]  ;;  %v752_v36 = vpack.c.bf16 %v2326_v31, %v203_v29  ;;  %v2342_v37 = vld [vmem:[%s2279_s6 + $0x12] sm:$0xff] }
  0x17   : > { %1903 = vmatpush3.bf16.msra.mxu1 %v2167_v8  ;;  %1983 = vmatpush3.bf16.msra.mxu0 %v2168_v11  ;;  %v2345_v38 = vld [vmem:[%s2279_s6 + $0x22] sm:$0xff]  ;;  %v180_v41 = vpack.c.bf16 %v2338_v35, %v172_v34  ;;  %v2380_v49 = vld [vmem:[%s2279_s6 + $0x30] sm:$0xff]  ;;  %v2189_v8 = vld [vmem:[%s2582_s1 + $0x78] sm:$0xff]  }
  0x18   : > { %1904 = vmatprep.subr.bf16.mxu1 %v2169_v15  ;;  %1984 = vmatprep.subr.bf16.mxu0 %v2170_v16  ;;  %v895_v42 = vpack.c.bf16 %v2345_v38, %v2342_v37  ;;  %v2374_v47 = vld [vmem:[%s2279_s6 + $0x20] sm:$0xff]  ;;  %v2386_v51 = vld [vmem:[%s2279_s6 + $0x32] sm:$0xff]  ;;  %v2202_v34 = vld [vmem:[%s2582_s1 + $0x168] sm:$0xff]  }
  0x19   : > { %v2389_v52 = vld [vmem:[%s2279_s6 + $0x42] sm:$0xff]  ;;  %v2395_v54 = vld [vmem:[%s2279_s6 + $0x50] sm:$0xff]  ;;  %v181_v55 = vpack.c.bf16 %v2380_v49, %v2374_v47  ;;  %v2477_v19 = vpack.c.bf16 %v2386_v51, %v2345_v38  ;;  %v2198_v22 = vld [vmem:[%s2582_s1 + $0x158] sm:$0xff]  }
  0x1a   : > { %v2392_v53 = vld [vmem:[%s2279_s6 + $0x40] sm:$0xff]  ;;  %v2403_v57 = vld [vmem:[%s2279_s6 + $0x52] sm:$0xff]  ;;  %v896_v58 = vpack.c.bf16 %v2389_v52, %v2386_v51 }
  0x1b   : > { %1905 = vmatpush3.bf16.msra.mxu1 %v2169_v15  ;;  %1985 = vmatpush3.bf16.msra.mxu0 %v2170_v16  ;;  %v2408_v59 = vld [vmem:[%s2279_s6 + $0x62] sm:$0xff]  ;;  %v182_v61 = vpack.c.bf16 %v2395_v54, %v2392_v53  ;;  %v2425_v1 = vld [vmem:[%s2279_s6 + $0x70] sm:$0xff] }
  0x1c   : > { %1914 = vmatprep.subr.bf16.mxu1 %v2171_v17  ;;  %1994 = vmatprep.subr.bf16.mxu0 %v2172_v20  ;;  %v2416_v62 = vld [vmem:[%s2279_s6 + $0x60] sm:$0xff]  ;;  %v897_v0 = vpack.c.bf16 %v2408_v59, %v2403_v57  ;;  %v1686_v2 = vld [vmem:[%s2279_s6 + $0x72] sm:$0xff]  ;;  %v2193_v15 = vld [vmem:[%s2582_s1 + $0x88] sm:$0xff]  }
  0x1d   : > { %v2430_v3 = vld [vmem:[%s2279_s6 + $0x82] sm:$0xff]  ;;  %v183_v5 = vpack.c.bf16 %v2425_v1, %v2416_v62  ;;  %v2451_v11 = vld [vmem:[%s2279_s6 + $0x91] sm:$0xff]  ;;  %v459_v29 = vpack.c.bf16 %v1686_v2, %v2408_v59 }
  0x1e   : > { %1907 = vmatmul.mubr.msk.bf16.vlgmr.msra.gmra.mrb[0].mxu1 %vm257_vm0, %v2306_v21  ;;  %1987 = vmatmul.mubr.msk.bf16.vlgmr.msra.gmra.mrb[0].mxu0 %vm257_vm0, %v750_v23  ;;  %v448_v6 = vld [vmem:[%s2279_s6 + $0x2] sm:$0xff]  ;;  %v898_v7 = vpack.c.bf16 %v2430_v3, %v1686_v2  ;;  %v1191_v13 = vpack.c.bf16 %v2451_v11, %v2326_v31  ;;  %v2196_v18 = vld [vmem:[%s2582_s1 + $0x150] sm:$0xff]   ;;  %v2487_v23 = vpack.c.bf16 %v2403_v57, %v2389_v52 }
  0x1f   : > { %1915 = vmatpush3.bf16.msra.mxu1 %v2171_v17  ;;  %1995 = vmatpush3.bf16.msra.mxu0 %v2172_v20  ;;  %v456_v10 = vpack.c.bf16 %v2342_v37, %v448_v6  ;;  %v2191_v12 = vld [vmem:[%s2582_s1 + $0x80] sm:$0xff]   ;;  %v2194_v16 = vld [vmem:[%s2582_s1 + $0x148] sm:$0xff]   ;;  %v2195_v17 = vld [vmem:[%s2582_s1 + $0x90] sm:$0xff]  }
  0x20   : > { %1916 = vmatprep.subr.bf16.mxu1 %v2173_v25  ;;  %1996 = vmatprep.subr.bf16.mxu0 %v2174_v26  ;;  %v2192_v14 = vld [vmem:[%s2582_s1 + $0x140] sm:$0xff]   ;;  %v2197_v20 = vld [vmem:[%s2582_s1 + $0x98] sm:$0xff]   ;;  %v2203_v37 = vld [vmem:[%s2582_s1 + $0xb0] sm:$0xff]  }
  0x21   : > { %1910 = vmatprep.mubr.msk.bf16.mxu1 %vm257_vm0, %v2316_v27  ;;  %1990 = vmatprep.mubr.msk.bf16.mxu0 %vm257_vm0, %v751_v28  ;;  %v2199_v24 = vld [vmem:[%s2582_s1 + $0xa0] sm:$0xff]   ;;  %v2204_v38 = vld [vmem:[%s2582_s1 + $0x170] sm:$0xff]   ;;  %v2212_v31 = vld [vmem:[%s2582_s1 + $0x1a8] sm:$0xff]  }
  0x22   : > { %v2200_v28 = vld [vmem:[%s2582_s1 + $0x160] sm:$0xff]  }
  0x23   : > { %1917 = vmatpush3.bf16.msra.mxu1 %v2173_v25  ;;  %1997 = vmatpush3.bf16.msra.mxu0 %v2174_v26  ;;  %v1716_v25 = vld [vmem:[%s2279_s6 + $0x80] sm:$0xff]  ;;  %v1717_v26 = vld [vmem:[%s2279_s6 + $0x90] sm:$0xff] }
  0x24   : > { %1918 = vmatprep.subr.bf16.mxu1 %v2175_v30  ;;  %1998 = vmatprep.subr.bf16.mxu0 %v2176_v32 }
  0x26   : > { %1911 = vmatmul.mubr.msk.bf16.gmra.mrb[4].mxu1 %vm257_vm0, %v2334_v33  ;;  %1991 = vmatmul.mubr.msk.bf16.gmra.mrb[4].mxu0 %vm257_vm0, %v752_v36  ;;  %v603_v36 = vpack.c.bf16 %v2374_v47, %v2338_v35  ;;  %v2205_v35 = vld [vmem:[%s2582_s1 + $0xb8] sm:$0xff]  }
  0x27   : > { %1919 = vmatpush3.bf16.msra.mxu1 %v2175_v30  ;;  %1999 = vmatpush3.bf16.msra.mxu0 %v2176_v32  ;;  %v1045_v30 = vpack.c.bf16 %v1717_v26, %v1716_v25  ;;  %v2201_v32 = vld [vmem:[%s2582_s1 + $0xa8] sm:$0xff]  }
  0x28   : > { %1920 = vmatprep.subr.bf16.mxu1 %v2177_v39  ;;  %2000 = vmatprep.subr.bf16.mxu0 %v2178_v40 }
  0x29   : > { %1926 = vmatprep.mubr.msk.bf16.mxu1 %vm257_vm0, %v180_v41  ;;  %2006 = vmatprep.mubr.msk.bf16.mxu0 %vm257_vm0, %v895_v42  ;;  %v2208_v41 = vld [vmem:[%s2582_s1 + $0x188] sm:$0xff]   ;;  %v605_v42 = vpack.c.bf16 %v2416_v62, %v2395_v54 }
  0x2b   : > { %1921 = vmatpush3.bf16.msra.mxu1 %v2177_v39  ;;  %2001 = vmatpush3.bf16.msra.mxu0 %v2178_v40  ;;  %v2206_v39 = vld [vmem:[%s2582_s1 + $0x178] sm:$0xff]   ;;  %v2207_v40 = vld [vmem:[%s2582_s1 + $0x180] sm:$0xff]  }
  0x2c   : > { %1922 = vmatprep.subr.bf16.mxu1 %v2179_v43  ;;  %2002 = vmatprep.subr.bf16.mxu0 %v2180_v44 }
  0x2f   : > { %1923 = vmatpush3.bf16.msra.mxu1 %v2179_v43  ;;  %2003 = vmatpush3.bf16.msra.mxu0 %v2180_v44  ;;  %v2209_v43 = vld [vmem:[%s2582_s1 + $0x190] sm:$0xff]   ;;  %v606_v44 = vpack.c.bf16 %v1716_v25, %v2425_v1 }
  0x30   : > { %1924 = vmatprep.subr.bf16.mxu1 %v2181_v45  ;;  %2004 = vmatprep.subr.bf16.mxu0 %v2182_v46 }
  0x33   : > { %1925 = vmatpush3.bf16.msra.mxu1 %v2181_v45  ;;  %2005 = vmatpush3.bf16.msra.mxu0 %v2182_v46  ;;  %v1777_v45 = vld [vmem:[%s2279_s6 + $0x92] sm:$0xff] }
  0x34   : > { %1934 = vmatprep.subr.bf16.mxu1 %v2183_v48  ;;  %2014 = vmatprep.subr.bf16.mxu0 %v2184_v50  ;;  %v1337_v46 = vpack.c.bf16 %v1777_v45, %v2430_v3 }
  0x36   : > { %1927 = vmatmul.mubr.msk.bf16.vlgmr.msra.gmra.mrb[0].mxu1 %vm257_vm0, %v181_v55  ;;  %2007 = vmatmul.mubr.msk.bf16.vlgmr.msra.gmra.mrb[0].mxu0 %vm257_vm0, %v896_v58 }
  0x37   : > { %1935 = vmatpush3.bf16.msra.mxu1 %v2183_v48  ;;  %2015 = vmatpush3.bf16.msra.mxu0 %v2184_v50 }
  0x38   : > { %1936 = vmatprep.subr.bf16.mxu1 %v2185_v56  ;;  %2016 = vmatprep.subr.bf16.mxu0 %v2186_v60 }
  0x39   : > { %1930 = vmatprep.mubr.msk.bf16.mxu1 %vm257_vm0, %v182_v61  ;;  %2010 = vmatprep.mubr.msk.bf16.mxu0 %vm257_vm0, %v897_v0 }
  0x3b   : > { %1937 = vmatpush3.bf16.msra.mxu1 %v2185_v56  ;;  %2017 = vmatpush3.bf16.msra.mxu0 %v2186_v60 }
  0x3c   : > { %1938 = vmatprep.subr.bf16.mxu1 %v2187_v63  ;;  %2018 = vmatprep.subr.bf16.mxu0 %v2188_v4 }
  0x3e   : > { %1931 = vmatmul.mubr.msk.bf16.gmra.mrb[4].mxu1 %vm257_vm0, %v183_v5  ;;  %2011 = vmatmul.mubr.msk.bf16.gmra.mrb[4].mxu0 %vm257_vm0, %v898_v7 }
  0x3f   : > { %1939 = vmatpush3.bf16.msra.mxu1 %v2187_v63  ;;  %2019 = vmatpush3.bf16.msra.mxu0 %v2188_v4  ;;  %v1800_v63 = vld [vmem:[%s2583_s2] ss:$0 sm:$0xff] }
  0x40   : > { %1940 = vmatprep.subr.bf16.mxu1 %v2189_v8  ;;  %2020 = vmatprep.subr.bf16.mxu0 %v2190_v9 }
  0x41   : > { %1946 = vmatprep.mubr.msk.bf16.mxu1 %vm257_vm0, %v456_v10  ;;  %2026 = vmatprep.mubr.msk.bf16.mxu0 %vm257_vm0, %v181_v55 }
  0x43   : > { %1941 = vmatpush3.bf16.msra.mxu1 %v2189_v8  ;;  %2021 = vmatpush3.bf16.msra.mxu0 %v2190_v9 }
  0x44   : > { %1942 = vmatprep.subr.bf16.mxu1 %v2191_v12  ;;  %2022 = vmatprep.subr.bf16.mxu0 %v2192_v14 }
  0x47   : > { %1943 = vmatpush3.bf16.msra.mxu1 %v2191_v12  ;;  %2023 = vmatpush3.bf16.msra.mxu0 %v2192_v14 }
  0x48   : > { %1944 = vmatprep.subr.bf16.mxu1 %v2193_v15  ;;  %2024 = vmatprep.subr.bf16.mxu0 %v2194_v16 }
  0x4b   : > { %1945 = vmatpush3.bf16.msra.mxu1 %v2193_v15  ;;  %2025 = vmatpush3.bf16.msra.mxu0 %v2194_v16 }
  0x4c   : > { %1954 = vmatprep.subr.bf16.mxu1 %v2195_v17  ;;  %2034 = vmatprep.subr.bf16.mxu0 %v2196_v18 }
  0x4e   : > { %1947 = vmatmul.mubr.msk.bf16.vlgmr.msra.gmra.mrb[0].mxu1 %vm257_vm0, %v2477_v19  ;;  %2027 = vmatmul.mubr.msk.bf16.vlgmr.msra.gmra.mrb[0].mxu0 %vm257_vm0, %v182_v61 }
  0x4f   : > { %1955 = vmatpush3.bf16.msra.mxu1 %v2195_v17  ;;  %2035 = vmatpush3.bf16.msra.mxu0 %v2196_v18 }
  0x50   : > { %1956 = vmatprep.subr.bf16.mxu1 %v2197_v20  ;;  %2036 = vmatprep.subr.bf16.mxu0 %v2198_v22 }
  0x51   : > { %1950 = vmatprep.mubr.msk.bf16.mxu1 %vm257_vm0, %v2487_v23  ;;  %2030 = vmatprep.mubr.msk.bf16.mxu0 %vm257_vm0, %v183_v5 }
  0x53   : > { %1957 = vmatpush3.bf16.msra.mxu1 %v2197_v20  ;;  %2037 = vmatpush3.bf16.msra.mxu0 %v2198_v22 }
  0x54   : > { %1958 = vmatprep.subr.bf16.mxu1 %v2199_v24  ;;  %2038 = vmatprep.subr.bf16.mxu0 %v2200_v28 }
  0x56   : > { %1951 = vmatmul.mubr.msk.bf16.gmra.mrb[4].mxu1 %vm257_vm0, %v459_v29  ;;  %2031 = vmatmul.mubr.msk.bf16.gmra.mrb[4].mxu0 %vm257_vm0, %v1045_v30 }
  0x57   : > { %1959 = vmatpush3.bf16.msra.mxu1 %v2199_v24  ;;  %2039 = vmatpush3.bf16.msra.mxu0 %v2200_v28 }
  0x58   : > { %1960 = vmatprep.subr.bf16.mxu1 %v2201_v32  ;;  %2040 = vmatprep.subr.bf16.mxu0 %v2202_v34 }
  0x59   : > { %1966 = vmatprep.mubr.msk.bf16.mxu1 %vm257_vm0, %v603_v36  ;;  %2046 = vmatprep.mubr.msk.bf16.mxu0 %vm257_vm0, %v2306_v21  ;;  %v604_v21 = vpack.c.bf16 %v2392_v53, %v2380_v49 }
  0x5b   : > { %1961 = vmatpush3.bf16.msra.mxu1 %v2201_v32  ;;  %2041 = vmatpush3.bf16.msra.mxu0 %v2202_v34 }
  0x5c   : > { %1962 = vmatprep.subr.bf16.mxu1 %v2203_v37  ;;  %2042 = vmatprep.subr.bf16.mxu0 %v2204_v38 }
  0x5f   : > { %1963 = vmatpush3.bf16.msra.mxu1 %v2203_v37  ;;  %2043 = vmatpush3.bf16.msra.mxu0 %v2204_v38 }
  0x60   : > { %1964 = vmatprep.subr.bf16.mxu1 %v2205_v35  ;;  %2044 = vmatprep.subr.bf16.mxu0 %v2206_v39 }
  0x63   : > { %1965 = vmatpush3.bf16.msra.mxu1 %v2205_v35  ;;  %2045 = vmatpush3.bf16.msra.mxu0 %v2206_v39 }
  0x64   : > { %2074 = vmatprep.subr.bf16.mxu1 %v2207_v40  ;;  %2054 = vmatprep.subr.bf16.mxu0 %v2207_v40 }
  0x66   : > { %1967 = vmatmul.mubr.msk.bf16.vlgmr.msra.gmra.mrb[0].mxu1 %vm257_vm0, %v604_v21  ;;  %2047 = vmatmul.mubr.msk.bf16.vlgmr.msra.gmra.mrb[0].mxu0 %vm257_vm0, %v2316_v27  ;;  %v2210_v27 = vld [vmem:[%s2582_s1 + $0x198] sm:$0xff]  }
  0x67   : > { %2080 = vmatpush3.bf16.msra.mxu1 %v2207_v40  ;;  %2055 = vmatpush3.bf16.msra.mxu0 %v2207_v40 }
  0x68   : > { %2075 = vmatprep.subr.bf16.mxu1 %v2208_v41  ;;  %2056 = vmatprep.subr.bf16.mxu0 %v2208_v41 }
  0x69   : > { %1970 = vmatprep.mubr.msk.bf16.mxu1 %vm257_vm0, %v605_v42  ;;  %2050 = vmatprep.mubr.msk.bf16.mxu0 %vm257_vm0, %v2334_v33  ;;  %v2211_v33 = vld [vmem:[%s2582_s1 + $0x1a0] sm:$0xff]  }
  0x6b   : > { %2081 = vmatpush3.bf16.msra.mxu1 %v2208_v41  ;;  %2057 = vmatpush3.bf16.msra.mxu0 %v2208_v41 }
  0x6c   : > { %2076 = vmatprep.subr.bf16.mxu1 %v2209_v43  ;;  %2058 = vmatprep.subr.bf16.mxu0 %v2209_v43 }
  0x6e   : > { %1971 = vmatmul.mubr.msk.bf16.gmra.mrb[4].mxu1 %vm257_vm0, %v606_v44  ;;  %2051 = vmatmul.mubr.msk.bf16.gmra.mrb[4].mxu0 %vm257_vm0, %v1191_v13 }
  0x6f   : > { %2082 = vmatpush3.bf16.msra.mxu1 %v2209_v43  ;;  %2059 = vmatpush3.bf16.msra.mxu0 %v2209_v43 }
  0x70   : > { %2077 = vmatprep.subr.bf16.mxu1 %v2210_v27  ;;  %2060 = vmatprep.subr.bf16.mxu0 %v2210_v27 }
  0x71   : > { %2066 = vmatprep.mubr.msk.bf16.mxu0 %vm257_vm0, %v2477_v19  ;;  %2070 = vmatprep.mubr.msk.bf16.mxu1 %vm257_vm0, %v459_v29 }
  0x73   : > { %2083 = vmatpush3.bf16.msra.mxu1 %v2210_v27  ;;  %2061 = vmatpush3.bf16.msra.mxu0 %v2210_v27 }
  0x74   : > { %2078 = vmatprep.subr.bf16.mxu1 %v2211_v33  ;;  %2062 = vmatprep.subr.bf16.mxu0 %v2211_v33 }
  0x77   : > { %2084 = vmatpush3.bf16.msra.mxu1 %v2211_v33  ;;  %2063 = vmatpush3.bf16.msra.mxu0 %v2211_v33 }
  0x78   : > { %2079 = vmatprep.subr.bf16.mxu1 %v2212_v31  ;;  %2064 = vmatprep.subr.bf16.mxu0 %v2212_v31 }
  0x7b   : > { %2085 = vmatpush3.bf16.msra.mxu1 %v2212_v31  ;;  %2065 = vmatpush3.bf16.msra.mxu0 %v2212_v31 }
  0x7e   : > { %2071 = vmatmul.mubr.msk.bf16.vlgmr.msra.gmra.mrb[8].mxu1 %vm257_vm0, %v1337_v46  ;;  %2067 = vmatmul.mubr.msk.bf16.vlgmr.msra.gmra.mrb[0].mxu0 %vm257_vm0, %v2487_v23 }
 0x139   : > { %v1968_v47 = vpop.f32.mrb[0].mxu1 }
 0x13a   : > { %v702_v48 = vpop.f32.mrb[1].mxu1 }
 0x13b   : > { %v1969_v49 = vpop.f32.mrb[2].mxu1 }
 0x13c   : > { %v705_v50 = vpop.f32.mrb[3].mxu1 }
 0x141   : > { %v1972_v51 = vpop.f32.mrb[4].mxu1  ;;  %v2052_v52 = vpop.f32.mrb[4].mxu0 }
 0x142   : > { %v718_v53 = vpop.f32.mrb[5].mxu1  ;;  %v2090_v54 = vadd.f32 %v2052_v52, %v1972_v51  ;;  %v1303_v55 = vpop.f32.mrb[5].mxu0 }
 0x143   : > { %v1973_v56 = vpop.f32.mrb[6].mxu1  ;;  %v2092_v57 = vadd.f32 %v1303_v55, %v718_v53  ;;  %v2053_v58 = vpop.f32.mrb[6].mxu0 }
 0x144   : > { %v721_v59 = vpop.f32.mrb[7].mxu1  ;;  %v2094_v60 = vadd.f32 %v2053_v58, %v1973_v56  ;;  %v1306_v61 = vpop.f32.mrb[7].mxu0 }
 0x145   : > { %v2096_v62 = vadd.f32 %v1306_v61, %v721_v59 }
 0x151   : > { %v2072_v0 = vpop.f32.mrb[8].mxu1  ;;  %v2068_v1 = vpop.f32.mrb[0].mxu0 }
 0x152   : > { %v2091_v2 = vadd.f32 %v2090_v54, %v2072_v0  ;;  %v1449_v3 = vpop.f32.mrb[9].mxu1  ;;  %v2086_v4 = vadd.f32 %v2068_v1, %v1968_v47  ;;  %v1433_v5 = vpop.f32.mrb[1].mxu0 }
 0x153   : > { %v2093_v6 = vadd.f32 %v2092_v57, %v1449_v3  ;;  %v2073_v7 = vpop.f32.mrb[10].mxu1  ;;  %v2087_v9 = vadd.f32 %v1433_v5, %v702_v48  ;;  %v2069_v10 = vpop.f32.mrb[2].mxu0 }
 0x154   : > { %v1485_v8 = vadd.f32 %v2091_v2, %v1800_v63  ;;  %v2095_v11 = vadd.f32 %v2094_v60, %v2073_v7  ;;  %v1452_v12 = vpop.f32.mrb[11].mxu1  ;;  %v1481_v13 = vadd.f32 %v2086_v4, %v1800_v63  ;;  %v2088_v15 = vadd.f32 %v2069_v10, %v1969_v49  ;;  %v1436_v16 = vpop.f32.mrb[3].mxu0 }
 0x155   : > { %v1483_v14 = vadd.f32 %v2093_v6, %v1800_v63  ;;  %v2097_v17 = vadd.f32 %v2096_v62, %v1452_v12  ;;  %v1479_v19 = vadd.f32 %v2087_v9, %v1800_v63  ;;  %v2089_v22 = vadd.f32 %v1436_v16, %v705_v50 }
 0x156   : > { %v1493_v18 = vmax.f32 %v1485_v8, 0.0  ;;  %v1486_v20 = vadd.f32 %v2095_v11, %v1800_v63  ;;  %v1489_v23 = vmax.f32 %v1481_v13, 0.0  ;;  %v1482_v25 = vadd.f32 %v2088_v15, %v1800_v63 }
 0x157   : > { %v1491_v24 = vmax.f32 %v1483_v14, 0.0  ;;  %v1484_v26 = vadd.f32 %v2097_v17, %v1800_v63  ;;  %v1487_v28 = vmax.f32 %v1479_v19, 0.0  ;;  %v1480_v30 = vadd.f32 %v2089_v22, %v1800_v63 }
 0x158   : > { %1501 = vst [vmem:[%s170_s7 + $0x30] sm:$0xff] %v1493_v18  ;;  %v1494_v29 = vmax.f32 %v1486_v20, 0.0  ;;  %1497 = vst [vmem:[%s170_s7 + $0x10] sm:$0xff] %v1489_v23  ;;  %v1490_v32 = vmax.f32 %v1482_v25, 0.0 }
 0x159   : > { %1499 = vst [vmem:[%s170_s7 + $0x20] sm:$0xff] %v1491_v24  ;;  %v1492_v34 = vmax.f32 %v1484_v26, 0.0  ;;  %1495 = vst [vmem:[%s170_s7] sm:$0xff] %v1487_v28  ;;  %v1488_v36 = vmax.f32 %v1480_v30, 0.0 }
 0x15a   : > { %1502 = vst [vmem:[%s170_s7 + $0x38] sm:$0xff] %v1494_v29  ;;  %1498 = vst [vmem:[%s170_s7 + $0x18] sm:$0xff] %v1490_v32 }
 0x15b   : > { %1500 = vst [vmem:[%s170_s7 + $0x28] sm:$0xff] %v1492_v34  ;;  %1496 = vst [vmem:[%s170_s7 + $0x8] sm:$0xff] %v1488_v36 }
 0x15c PF: > { %s13_s12 = sadd.s32 1, %s2219_s12  }
 0x15d   : > { %p10_p4 = scmp.ge.s32.totalorder %s13_s12, 4  }
 0x15f   :  { %12 = sbr.rel (!%p10_p4) target bundleno = 1 (0x1), region = 72 }

</bundles_post_ra>
